<compile_context>
chip_gen: v7x
topology: tpu7x:2x2x1
jax: 0.10.0
libtpu: 0.0.40
codegen_flags: <defaults>
</compile_context>

<pallas_src>
import functools
import math

import jax
import jax.numpy as jnp
from jax import lax
from jax.experimental import pallas as pl
from jax.experimental.pallas import tpu as pltpu


_MM_DTYPE = jnp.bfloat16   # MXU input dtype; accumulation & elementwise math stay f32
_LN_EPS = 1e-5             # PyTorch nn.LayerNorm default


# ----------------------------- in-kernel helpers -----------------------------

def _mm(a, b):
    """(M,K) @ (K,N) on the MXU in bf16 with f32 accumulation."""
    return jnp.dot(a.astype(_MM_DTYPE), b.astype(_MM_DTYPE),
                   preferred_element_type=jnp.float32)


def _mm_t(a, b):
    """(M,K) x (N,K) -> (M,N): contract dim 1 with dim 1 (rhs-transposed, MXU-native)."""
    return lax.dot_general(a.astype(_MM_DTYPE), b.astype(_MM_DTYPE),
                           dimension_numbers=(((1,), (1,)), ((), ())),
                           preferred_element_type=jnp.float32)


def _layernorm(z, g, b):
    mean = jnp.mean(z, axis=-1, keepdims=True)
    var = jnp.mean(jnp.square(z - mean), axis=-1, keepdims=True)
    return (z - mean) * lax.rsqrt(var + _LN_EPS) * g + b


def _multi_head_attention(q, k, v, wo, bo, *, num_heads, dim_k):
    """MultiHeadAttention without softmax (faithful to the reference `Attention`):
         out = concat_h( (q_h k_h^T / sqrt(dk)) v_h ) @ Wo + bo
       computed as sum_h ((q_h k_h^T / sqrt(dk)) v_h) @ Wo[h*dk:(h+1)*dk, :] + bo,
       which is mathematically identical to concat-then-linear."""
    scale = 1.0 / math.sqrt(float(dim_k))      # == 1/sqrt(Q.size(-1)) per head
    q_bf = (q * scale).astype(_MM_DTYPE)       # fold scale into Q; cast each operand once
    k_bf = k.astype(_MM_DTYPE)
    v_bf = v.astype(_MM_DTYPE)
    acc = None
    for h in range(num_heads):                 # static unroll over heads
        lo, hi = h * dim_k, (h + 1) * dim_k
        s = _mm_t(q_bf[:, lo:hi], k_bf[:, lo:hi])        # (Sq, Sk) scores, NO softmax
        ctx = _mm(s, v_bf[:, lo:hi])                     # (Sq, dk)
        part = _mm(ctx, wo[lo:hi, :])                    # (Sq, D) partial output projection
        acc = part if acc is None else acc + part
    return acc + bo


# ----------------------------- fused decoder kernel ---------------------------

def _decoder_stack_kernel(tgt_ref, mem_ref, pe_ref,
                          wqkv1_ref, bqkv1_ref, wo1_ref, bo1_ref,
                          wq2_ref, bq2_ref, wkv2_ref, bkv2_ref, wo2_ref, bo2_ref,
                          wf1_ref, bf1_ref, wf2_ref, bf2_ref,
                          lng_ref, lnb_ref, wout_ref, bout_ref,
                          o_ref, *, num_layers, num_heads, dim_k):
    """One batch element: full decoder stack + output linear + softmax, all in VMEM."""
    hdk = num_heads * dim_k

    # Position-encoding add fused into the kernel (reference: tgt += PositionEncoding).
    x = tgt_ref[0] + pe_ref[...]                       # (S, D) f32, stays on-chip
    mem_bf = mem_ref[0].astype(_MM_DTYPE)              # cast encoder memory once, reuse per layer

    for l in range(num_layers):                        # static unroll over layers
        lng = lng_ref[l]                               # (3, D): [ln1, ln2, ln3] gamma
        lnb = lnb_ref[l]                               # (3, D): [ln1, ln2, ln3] beta

        # --- sublayer 1: Residual(self-MHA) -> LayerNorm ----------------------------
        qkv = _mm(x, wqkv1_ref[l]) + bqkv1_ref[l]      # fused Q|K|V projection: (S, 3*hdk)
        attn = _multi_head_attention(qkv[:, :hdk], qkv[:, hdk:2 * hdk], qkv[:, 2 * hdk:],
                                     wo1_ref[l], bo1_ref[l],
                                     num_heads=num_heads, dim_k=dim_k)
        x = _layernorm(x + attn, lng[0:1], lnb[0:1])

        # --- sublayer 2: Residual(cross-MHA over encoder memory) -> LayerNorm -------
        q = _mm(x, wq2_ref[l]) + bq2_ref[l]            # (S, hdk)
        kv = _mm(mem_bf, wkv2_ref[l]) + bkv2_ref[l]    # fused K|V projection: (Sm, 2*hdk)
        attn = _multi_head_attention(q, kv[:, :hdk], kv[:, hdk:],
                                     wo2_ref[l], bo2_ref[l],
                                     num_heads=num_heads, dim_k=dim_k)
        x = _layernorm(x + attn, lng[1:2], lnb[1:2])

        # --- sublayer 3: Residual(FFN) -> LayerNorm ----------------------------------
        h = jnp.maximum(_mm(x, wf1_ref[l]) + bf1_ref[l], 0.0)   # Linear1 + fused ReLU
        y = _mm(h, wf2_ref[l]) + bf2_ref[l]                     # Linear2
        x = _layernorm(x + y, lng[2:3], lnb[2:3])

    # --- final output linear + softmax (f32 math, EUP reciprocal) --------------------
    logits = _mm(x, wout_ref[...]) + bout_ref[...]
    m = jnp.max(logits, axis=-1, keepdims=True)
    e = jnp.exp(logits - m)
    o_ref[0] = e * pl.reciprocal(jnp.sum(e, axis=-1, keepdims=True), approx=True)


# ----------------------------- pallas_call wrapper -----------------------------

def _const_spec(shape):
    """Full-array block whose index never changes -> stays resident across the grid."""
    zeros = (0,) * len(shape)
    return pl.BlockSpec(shape, lambda b: zeros)


def position_encoding(seq_len, dim_model):
    pos = jnp.arange(seq_len, dtype=jnp.float32).reshape(-1, 1)
    dim = jnp.arange(dim_model, dtype=jnp.float32).reshape(1, -1)
    phase = pos / jnp.power(10000.0, dim / float(dim_model))
    return jnp.where(dim.astype(jnp.int32) % 2 == 0, jnp.sin(phase), jnp.cos(phase))


def decoder_forward(tgt, memory, params, *, num_heads):
    """softmax(Linear(DecoderLayer^L(tgt + PE, memory)), -1) as a single pallas_call."""
    B, S, D = tgt.shape
    _, Sm, _ = memory.shape
    L, _, hdk = params["wq2"].shape
    dim_k = hdk // num_heads
    FF = params["wf1"].shape[2]

    pe = position_encoding(S, D)                       # (S, D), broadcast over batch

    kernel = functools.partial(_decoder_stack_kernel, num_layers=L,
                               num_heads=num_heads, dim_k=dim_k)

    in_specs = [
        pl.BlockSpec((1, S, D), lambda b: (b, 0, 0)),   # tgt     (per-batch block)
        pl.BlockSpec((1, Sm, D), lambda b: (b, 0, 0)),  # memory  (per-batch block)
        _const_spec((S, D)),                            # position encoding
        _const_spec((L, D, 3 * hdk)), _const_spec((L, 1, 3 * hdk)),   # self-attn  W_qkv, b_qkv
        _const_spec((L, hdk, D)),     _const_spec((L, 1, D)),         # self-attn  W_o,   b_o
        _const_spec((L, D, hdk)),     _const_spec((L, 1, hdk)),       # cross-attn W_q,   b_q
        _const_spec((L, D, 2 * hdk)), _const_spec((L, 1, 2 * hdk)),   # cross-attn W_kv,  b_kv
        _const_spec((L, hdk, D)),     _const_spec((L, 1, D)),         # cross-attn W_o,   b_o
        _const_spec((L, D, FF)),      _const_spec((L, 1, FF)),        # FFN W1, b1
        _const_spec((L, FF, D)),      _const_spec((L, 1, D)),         # FFN W2, b2
        _const_spec((L, 3, D)),       _const_spec((L, 3, D)),         # LayerNorm gamma / beta
        _const_spec((D, D)),          _const_spec((1, D)),            # output linear
    ]

    return pl.pallas_call(
        kernel,
        out_shape=jax.ShapeDtypeStruct((B, S, D), jnp.float32),
        grid=(B,),
        in_specs=in_specs,
        out_specs=pl.BlockSpec((1, S, D), lambda b: (b, 0, 0)),
        compiler_params=pltpu.CompilerParams(dimension_semantics=("parallel",)),
    )(tgt, memory, pe,
      params["wqkv1"], params["bqkv1"], params["wo1"], params["bo1"],
      params["wq2"], params["bq2"], params["wkv2"], params["bkv2"],
      params["wo2"], params["bo2"],
      params["wf1"], params["bf1"], params["wf2"], params["bf2"],
      params["ln_g"], params["ln_b"],
      params["wout"], params["bout"])


# ----------------------------- parameter init ---------------------------------

def _init_linear(key, fan_in, fan_out):
    kw, kb = jax.random.split(key)
    w = (jax.random.normal(kw, (fan_in, fan_out), jnp.float32) * 0.05).astype(_MM_DTYPE)
    b = jax.random.normal(kb, (fan_out,), jnp.float32) * 0.05
    return w, b.reshape(1, fan_out)


def init_params(key, num_layers, dim_model, num_heads, dim_feedforward):
    D, FF = dim_model, dim_feedforward
    dim_k = max(dim_model // num_heads, 1)
    hdk = num_heads * dim_k

    names = ("wqkv1", "bqkv1", "wo1", "bo1", "wq2", "bq2", "wkv2", "bkv2",
             "wo2", "bo2", "wf1", "bf1", "wf2", "bf2", "ln_g", "ln_b")
    per_layer = {n: [] for n in names}
    keys = jax.random.split(key, num_layers + 1)
    for l in range(num_layers):
        ks = jax.random.split(keys[l], 7)
        # Per-head q/k/v nn.Linear's fused column-wise into single wide weights
        # (columns [h*dk:(h+1)*dk] belong to head h -> mathematically identical).
        wqkv1, bqkv1 = _init_linear(ks[0], D, 3 * hdk)   # self-attn fused Q|K|V
        wo1, bo1 = _init_linear(ks[1], hdk, D)
        wq2, bq2 = _init_linear(ks[2], D, hdk)           # cross-attn Q
        wkv2, bkv2 = _init_linear(ks[3], D, 2 * hdk)     # cross-attn fused K|V
        wo2, bo2 = _init_linear(ks[4], hdk, D)
        wf1, bf1 = _init_linear(ks[5], D, FF)
        wf2, bf2 = _init_linear(ks[6], FF, D)
        vals = dict(wqkv1=wqkv1, bqkv1=bqkv1, wo1=wo1, bo1=bo1,
                    wq2=wq2, bq2=bq2, wkv2=wkv2, bkv2=bkv2, wo2=wo2, bo2=bo2,
                    wf1=wf1, bf1=bf1, wf2=wf2, bf2=bf2,
                    ln_g=jnp.ones((3, D), jnp.float32),    # [ln1, ln2, ln3] gamma
                    ln_b=jnp.zeros((3, D), jnp.float32))   # [ln1, ln2, ln3] beta
        for n in names:
            per_layer[n].append(vals[n])
    params = {n: jnp.stack(per_layer[n]) for n in names}   # stacked along layer axis
    wout, bout = _init_linear(keys[-1], D, D)               # TODO(synk): assumed self.linear
    params["wout"] = wout
    params["bout"] = bout
    return params


# --------------------------------- main ----------------------------------------

if __name__ == "__main__":
    B, S, D = 2, 8, 32            # batch, seq_len, dim_model
    NUM_HEADS = 4
    DIM_FF = 64
    NUM_LAYERS = 2

    key = jax.random.PRNGKey(0)
    k_p, k_t, k_m = jax.random.split(key, 3)
    params = init_params(k_p, NUM_LAYERS, D, NUM_HEADS, DIM_FF)
    tgt = jax.random.normal(k_t, (B, S, D), jnp.float32)
    memory = jax.random.normal(k_m, (B, S, D), jnp.float32)

    fwd = jax.jit(functools.partial(decoder_forward, num_heads=NUM_HEADS))
    out = jax.block_until_ready(fwd(tgt, memory, params))

    assert out.shape == (B, S, D)
    assert bool(jnp.all(jnp.isfinite(out)))
    # Rows are softmax distributions; approx=True EUP reciprocal -> sum==1 to ~1e-3.
    assert bool(jnp.allclose(jnp.sum(out, axis=-1), 1.0, atol=5e-3))
    print("KERNEL_OK")
</pallas_src>

<mosaic_0001>
module attributes {stable_mosaic.version = 11 : i64} {
  func.func @_decoder_stack_kernel(%arg0: i32, %arg1: memref<1x8x32xf32, #tpu.memory_space<vmem>>, %arg2: memref<1x8x32xf32, #tpu.memory_space<vmem>>, %arg3: memref<8x32xf32, #tpu.memory_space<vmem>>, %arg4: memref<2x32x96xbf16, #tpu.memory_space<vmem>>, %arg5: memref<2x1x96xf32, #tpu.memory_space<vmem>>, %arg6: memref<2x32x32xbf16, #tpu.memory_space<vmem>>, %arg7: memref<2x1x32xf32, #tpu.memory_space<vmem>>, %arg8: memref<2x32x32xbf16, #tpu.memory_space<vmem>>, %arg9: memref<2x1x32xf32, #tpu.memory_space<vmem>>, %arg10: memref<2x32x64xbf16, #tpu.memory_space<vmem>>, %arg11: memref<2x1x64xf32, #tpu.memory_space<vmem>>, %arg12: memref<2x32x32xbf16, #tpu.memory_space<vmem>>, %arg13: memref<2x1x32xf32, #tpu.memory_space<vmem>>, %arg14: memref<2x32x64xbf16, #tpu.memory_space<vmem>>, %arg15: memref<2x1x64xf32, #tpu.memory_space<vmem>>, %arg16: memref<2x64x32xbf16, #tpu.memory_space<vmem>>, %arg17: memref<2x1x32xf32, #tpu.memory_space<vmem>>, %arg18: memref<2x3x32xf32, #tpu.memory_space<vmem>>, %arg19: memref<2x3x32xf32, #tpu.memory_space<vmem>>, %arg20: memref<32x32xbf16, #tpu.memory_space<vmem>>, %arg21: memref<1x32xf32, #tpu.memory_space<vmem>>, %arg22: memref<1x8x32xf32, #tpu.memory_space<vmem>>) attributes {dimension_semantics = [#tpu.dimension_semantics<parallel>], iteration_bounds = array<i64: 2>, scalar_prefetch = 0 : i64, scratch_operands = 0 : i64, tpu.core_type = #tpu.core_type<tc>, window_params = [{transform_indices = @transform_0, window_bounds = array<i64: 1, 8, 32>}, {transform_indices = @transform_1, window_bounds = array<i64: 1, 8, 32>}, {pipeline_mode = #tpu.pipeline_mode<synchronous>, transform_indices = @transform_2, window_bounds = array<i64: 8, 32>}, {pipeline_mode = #tpu.pipeline_mode<synchronous>, transform_indices = @transform_3, window_bounds = array<i64: 2, 32, 96>}, {pipeline_mode = #tpu.pipeline_mode<synchronous>, transform_indices = @transform_4, window_bounds = array<i64: 2, 1, 96>}, {pipeline_mode = #tpu.pipeline_mode<synchronous>, transform_indices = @transform_5, window_bounds = array<i64: 2, 32, 32>}, {pipeline_mode = #tpu.pipeline_mode<synchronous>, transform_indices = @transform_6, window_bounds = array<i64: 2, 1, 32>}, {pipeline_mode = #tpu.pipeline_mode<synchronous>, transform_indices = @transform_7, window_bounds = array<i64: 2, 32, 32>}, {pipeline_mode = #tpu.pipeline_mode<synchronous>, transform_indices = @transform_8, window_bounds = array<i64: 2, 1, 32>}, {pipeline_mode = #tpu.pipeline_mode<synchronous>, transform_indices = @transform_9, window_bounds = array<i64: 2, 32, 64>}, {pipeline_mode = #tpu.pipeline_mode<synchronous>, transform_indices = @transform_10, window_bounds = array<i64: 2, 1, 64>}, {pipeline_mode = #tpu.pipeline_mode<synchronous>, transform_indices = @transform_11, window_bounds = array<i64: 2, 32, 32>}, {pipeline_mode = #tpu.pipeline_mode<synchronous>, transform_indices = @transform_12, window_bounds = array<i64: 2, 1, 32>}, {pipeline_mode = #tpu.pipeline_mode<synchronous>, transform_indices = @transform_13, window_bounds = array<i64: 2, 32, 64>}, {pipeline_mode = #tpu.pipeline_mode<synchronous>, transform_indices = @transform_14, window_bounds = array<i64: 2, 1, 64>}, {pipeline_mode = #tpu.pipeline_mode<synchronous>, transform_indices = @transform_15, window_bounds = array<i64: 2, 64, 32>}, {pipeline_mode = #tpu.pipeline_mode<synchronous>, transform_indices = @transform_16, window_bounds = array<i64: 2, 1, 32>}, {pipeline_mode = #tpu.pipeline_mode<synchronous>, transform_indices = @transform_17, window_bounds = array<i64: 2, 3, 32>}, {pipeline_mode = #tpu.pipeline_mode<synchronous>, transform_indices = @transform_18, window_bounds = array<i64: 2, 3, 32>}, {pipeline_mode = #tpu.pipeline_mode<synchronous>, transform_indices = @transform_19, window_bounds = array<i64: 32, 32>}, {pipeline_mode = #tpu.pipeline_mode<synchronous>, transform_indices = @transform_20, window_bounds = array<i64: 1, 32>}, {transform_indices = @transform_21, window_bounds = array<i64: 1, 8, 32>}]} {
    %c0 = arith.constant 0 : index
    %c0_0 = arith.constant 0 : index
    %c0_1 = arith.constant 0 : index
    %0 = vector.load %arg1[%c0, %c0_0, %c0_1] : memref<1x8x32xf32, #tpu.memory_space<vmem>>, vector<1x8x32xf32>
    %1 = vector.shape_cast %0 : vector<1x8x32xf32> to vector<8x32xf32>
    %c0_2 = arith.constant 0 : index
    %c0_3 = arith.constant 0 : index
    %2 = vector.load %arg3[%c0_2, %c0_3] : memref<8x32xf32, #tpu.memory_space<vmem>>, vector<8x32xf32>
    %3 = arith.addf %1, %2 : vector<8x32xf32>
    %c0_4 = arith.constant 0 : index
    %c0_5 = arith.constant 0 : index
    %c0_6 = arith.constant 0 : index
    %4 = vector.load %arg2[%c0_4, %c0_5, %c0_6] : memref<1x8x32xf32, #tpu.memory_space<vmem>>, vector<1x8x32xf32>
    %5 = vector.shape_cast %4 : vector<1x8x32xf32> to vector<8x32xf32>
    %6 = arith.truncf %5 : vector<8x32xf32> to vector<8x32xbf16>
    %c0_7 = arith.constant 0 : index
    %c0_8 = arith.constant 0 : index
    %c0_9 = arith.constant 0 : index
    %7 = vector.load %arg18[%c0_7, %c0_8, %c0_9] : memref<2x3x32xf32, #tpu.memory_space<vmem>>, vector<1x3x32xf32>
    %8 = vector.shape_cast %7 : vector<1x3x32xf32> to vector<3x32xf32>
    %c0_10 = arith.constant 0 : index
    %c0_11 = arith.constant 0 : index
    %c0_12 = arith.constant 0 : index
    %9 = vector.load %arg19[%c0_10, %c0_11, %c0_12] : memref<2x3x32xf32, #tpu.memory_space<vmem>>, vector<1x3x32xf32>
    %10 = vector.shape_cast %9 : vector<1x3x32xf32> to vector<3x32xf32>
    %c0_13 = arith.constant 0 : index
    %c0_14 = arith.constant 0 : index
    %c0_15 = arith.constant 0 : index
    %11 = vector.load %arg4[%c0_13, %c0_14, %c0_15] : memref<2x32x96xbf16, #tpu.memory_space<vmem>>, vector<1x32x96xbf16>
    %12 = vector.shape_cast %11 : vector<1x32x96xbf16> to vector<32x96xbf16>
    %13 = arith.truncf %3 : vector<8x32xf32> to vector<8x32xbf16>
    %cst = arith.constant dense<0.000000e+00> : vector<8x96xf32>
    %14 = tpu.matmul %13, %12, %cst {dimension_numbers = #tpu.dot_dimension_numbers<[1], [0], [0], [1], [0, 0, 1, 1], [], []>} : vector<8x32xbf16>, vector<32x96xbf16>, vector<8x96xf32> -> vector<8x96xf32>
    %c0_16 = arith.constant 0 : index
    %c0_17 = arith.constant 0 : index
    %c0_18 = arith.constant 0 : index
    %15 = vector.load %arg5[%c0_16, %c0_17, %c0_18] : memref<2x1x96xf32, #tpu.memory_space<vmem>>, vector<1x1x96xf32>
    %16 = vector.shape_cast %15 : vector<1x1x96xf32> to vector<1x96xf32>
    %17 = vector.broadcast %16 : vector<1x96xf32> to vector<8x96xf32>
    %18 = arith.addf %14, %17 : vector<8x96xf32>
    %19 = vector.extract_strided_slice %18 {offsets = [0, 0], sizes = [8, 32], strides = [1, 1]} : vector<8x96xf32> to vector<8x32xf32>
    %20 = vector.extract_strided_slice %18 {offsets = [0, 32], sizes = [8, 32], strides = [1, 1]} : vector<8x96xf32> to vector<8x32xf32>
    %21 = vector.extract_strided_slice %18 {offsets = [0, 64], sizes = [8, 32], strides = [1, 1]} : vector<8x96xf32> to vector<8x32xf32>
    %c0_19 = arith.constant 0 : index
    %c0_20 = arith.constant 0 : index
    %c0_21 = arith.constant 0 : index
    %22 = vector.load %arg6[%c0_19, %c0_20, %c0_21] : memref<2x32x32xbf16, #tpu.memory_space<vmem>>, vector<1x32x32xbf16>
    %23 = vector.shape_cast %22 : vector<1x32x32xbf16> to vector<32x32xbf16>
    %c0_22 = arith.constant 0 : index
    %c0_23 = arith.constant 0 : index
    %c0_24 = arith.constant 0 : index
    %24 = vector.load %arg7[%c0_22, %c0_23, %c0_24] : memref<2x1x32xf32, #tpu.memory_space<vmem>>, vector<1x1x32xf32>
    %25 = vector.shape_cast %24 : vector<1x1x32xf32> to vector<1x32xf32>
    %cst_25 = arith.constant 0.353553385 : f32
    %26 = vector.broadcast %cst_25 : f32 to vector<8x32xf32>
    %27 = arith.mulf %19, %26 : vector<8x32xf32>
    %28 = arith.truncf %27 : vector<8x32xf32> to vector<8x32xbf16>
    %29 = arith.truncf %20 : vector<8x32xf32> to vector<8x32xbf16>
    %30 = arith.truncf %21 : vector<8x32xf32> to vector<8x32xbf16>
    %31 = vector.extract_strided_slice %28 {offsets = [0, 0], sizes = [8, 8], strides = [1, 1]} : vector<8x32xbf16> to vector<8x8xbf16>
    %32 = vector.extract_strided_slice %29 {offsets = [0, 0], sizes = [8, 8], strides = [1, 1]} : vector<8x32xbf16> to vector<8x8xbf16>
    %cst_26 = arith.constant dense<0.000000e+00> : vector<8x8xf32>
    %33 = tpu.matmul %31, %32, %cst_26 {dimension_numbers = #tpu.dot_dimension_numbers<[1], [1], [0], [0], [0, 0, 1, 0], [], []>} : vector<8x8xbf16>, vector<8x8xbf16>, vector<8x8xf32> -> vector<8x8xf32>
    %34 = vector.extract_strided_slice %30 {offsets = [0, 0], sizes = [8, 8], strides = [1, 1]} : vector<8x32xbf16> to vector<8x8xbf16>
    %35 = arith.truncf %33 : vector<8x8xf32> to vector<8x8xbf16>
    %cst_27 = arith.constant dense<0.000000e+00> : vector<8x8xf32>
    %36 = tpu.matmul %35, %34, %cst_27 {dimension_numbers = #tpu.dot_dimension_numbers<[1], [0], [0], [1], [0, 0, 1, 1], [], []>} : vector<8x8xbf16>, vector<8x8xbf16>, vector<8x8xf32> -> vector<8x8xf32>
    %37 = vector.extract_strided_slice %23 {offsets = [0, 0], sizes = [8, 32], strides = [1, 1]} : vector<32x32xbf16> to vector<8x32xbf16>
    %38 = arith.truncf %36 : vector<8x8xf32> to vector<8x8xbf16>
    %cst_28 = arith.constant dense<0.000000e+00> : vector<8x32xf32>
    %39 = tpu.matmul %38, %37, %cst_28 {dimension_numbers = #tpu.dot_dimension_numbers<[1], [0], [0], [1], [0, 0, 1, 1], [], []>} : vector<8x8xbf16>, vector<8x32xbf16>, vector<8x32xf32> -> vector<8x32xf32>
    %40 = vector.extract_strided_slice %28 {offsets = [0, 8], sizes = [8, 8], strides = [1, 1]} : vector<8x32xbf16> to vector<8x8xbf16>
    %41 = vector.extract_strided_slice %29 {offsets = [0, 8], sizes = [8, 8], strides = [1, 1]} : vector<8x32xbf16> to vector<8x8xbf16>
    %cst_29 = arith.constant dense<0.000000e+00> : vector<8x8xf32>
    %42 = tpu.matmul %40, %41, %cst_29 {dimension_numbers = #tpu.dot_dimension_numbers<[1], [1], [0], [0], [0, 0, 1, 0], [], []>} : vector<8x8xbf16>, vector<8x8xbf16>, vector<8x8xf32> -> vector<8x8xf32>
    %43 = vector.extract_strided_slice %30 {offsets = [0, 8], sizes = [8, 8], strides = [1, 1]} : vector<8x32xbf16> to vector<8x8xbf16>
    %44 = arith.truncf %42 : vector<8x8xf32> to vector<8x8xbf16>
    %cst_30 = arith.constant dense<0.000000e+00> : vector<8x8xf32>
    %45 = tpu.matmul %44, %43, %cst_30 {dimension_numbers = #tpu.dot_dimension_numbers<[1], [0], [0], [1], [0, 0, 1, 1], [], []>} : vector<8x8xbf16>, vector<8x8xbf16>, vector<8x8xf32> -> vector<8x8xf32>
    %46 = vector.extract_strided_slice %23 {offsets = [8, 0], sizes = [8, 32], strides = [1, 1]} : vector<32x32xbf16> to vector<8x32xbf16>
    %47 = arith.truncf %45 : vector<8x8xf32> to vector<8x8xbf16>
    %cst_31 = arith.constant dense<0.000000e+00> : vector<8x32xf32>
    %48 = tpu.matmul %47, %46, %cst_31 {dimension_numbers = #tpu.dot_dimension_numbers<[1], [0], [0], [1], [0, 0, 1, 1], [], []>} : vector<8x8xbf16>, vector<8x32xbf16>, vector<8x32xf32> -> vector<8x32xf32>
    %49 = arith.addf %39, %48 : vector<8x32xf32>
    %50 = vector.extract_strided_slice %28 {offsets = [0, 16], sizes = [8, 8], strides = [1, 1]} : vector<8x32xbf16> to vector<8x8xbf16>
    %51 = vector.extract_strided_slice %29 {offsets = [0, 16], sizes = [8, 8], strides = [1, 1]} : vector<8x32xbf16> to vector<8x8xbf16>
    %cst_32 = arith.constant dense<0.000000e+00> : vector<8x8xf32>
    %52 = tpu.matmul %50, %51, %cst_32 {dimension_numbers = #tpu.dot_dimension_numbers<[1], [1], [0], [0], [0, 0, 1, 0], [], []>} : vector<8x8xbf16>, vector<8x8xbf16>, vector<8x8xf32> -> vector<8x8xf32>
    %53 = vector.extract_strided_slice %30 {offsets = [0, 16], sizes = [8, 8], strides = [1, 1]} : vector<8x32xbf16> to vector<8x8xbf16>
    %54 = arith.truncf %52 : vector<8x8xf32> to vector<8x8xbf16>
    %cst_33 = arith.constant dense<0.000000e+00> : vector<8x8xf32>
    %55 = tpu.matmul %54, %53, %cst_33 {dimension_numbers = #tpu.dot_dimension_numbers<[1], [0], [0], [1], [0, 0, 1, 1], [], []>} : vector<8x8xbf16>, vector<8x8xbf16>, vector<8x8xf32> -> vector<8x8xf32>
    %56 = vector.extract_strided_slice %23 {offsets = [16, 0], sizes = [8, 32], strides = [1, 1]} : vector<32x32xbf16> to vector<8x32xbf16>
    %57 = arith.truncf %55 : vector<8x8xf32> to vector<8x8xbf16>
    %cst_34 = arith.constant dense<0.000000e+00> : vector<8x32xf32>
    %58 = tpu.matmul %57, %56, %cst_34 {dimension_numbers = #tpu.dot_dimension_numbers<[1], [0], [0], [1], [0, 0, 1, 1], [], []>} : vector<8x8xbf16>, vector<8x32xbf16>, vector<8x32xf32> -> vector<8x32xf32>
    %59 = arith.addf %49, %58 : vector<8x32xf32>
    %60 = vector.extract_strided_slice %28 {offsets = [0, 24], sizes = [8, 8], strides = [1, 1]} : vector<8x32xbf16> to vector<8x8xbf16>
    %61 = vector.extract_strided_slice %29 {offsets = [0, 24], sizes = [8, 8], strides = [1, 1]} : vector<8x32xbf16> to vector<8x8xbf16>
    %cst_35 = arith.constant dense<0.000000e+00> : vector<8x8xf32>
    %62 = tpu.matmul %60, %61, %cst_35 {dimension_numbers = #tpu.dot_dimension_numbers<[1], [1], [0], [0], [0, 0, 1, 0], [], []>} : vector<8x8xbf16>, vector<8x8xbf16>, vector<8x8xf32> -> vector<8x8xf32>
    %63 = vector.extract_strided_slice %30 {offsets = [0, 24], sizes = [8, 8], strides = [1, 1]} : vector<8x32xbf16> to vector<8x8xbf16>
    %64 = arith.truncf %62 : vector<8x8xf32> to vector<8x8xbf16>
    %cst_36 = arith.constant dense<0.000000e+00> : vector<8x8xf32>
    %65 = tpu.matmul %64, %63, %cst_36 {dimension_numbers = #tpu.dot_dimension_numbers<[1], [0], [0], [1], [0, 0, 1, 1], [], []>} : vector<8x8xbf16>, vector<8x8xbf16>, vector<8x8xf32> -> vector<8x8xf32>
    %66 = vector.extract_strided_slice %23 {offsets = [24, 0], sizes = [8, 32], strides = [1, 1]} : vector<32x32xbf16> to vector<8x32xbf16>
    %67 = arith.truncf %65 : vector<8x8xf32> to vector<8x8xbf16>
    %cst_37 = arith.constant dense<0.000000e+00> : vector<8x32xf32>
    %68 = tpu.matmul %67, %66, %cst_37 {dimension_numbers = #tpu.dot_dimension_numbers<[1], [0], [0], [1], [0, 0, 1, 1], [], []>} : vector<8x8xbf16>, vector<8x32xbf16>, vector<8x32xf32> -> vector<8x32xf32>
    %69 = arith.addf %59, %68 : vector<8x32xf32>
    %70 = vector.broadcast %25 : vector<1x32xf32> to vector<8x32xf32>
    %71 = arith.addf %69, %70 : vector<8x32xf32>
    %72 = arith.addf %3, %71 : vector<8x32xf32>
    %73 = vector.extract_strided_slice %8 {offsets = [0, 0], sizes = [1, 32], strides = [1, 1]} : vector<3x32xf32> to vector<1x32xf32>
    %74 = vector.extract_strided_slice %10 {offsets = [0, 0], sizes = [1, 32], strides = [1, 1]} : vector<3x32xf32> to vector<1x32xf32>
    %cst_38 = arith.constant dense<0.000000e+00> : vector<8xf32>
    %75 = vector.multi_reduction <add>, %72, %cst_38 [1] : vector<8x32xf32> to vector<8xf32>
    %76 = vector.shape_cast %75 : vector<8xf32> to vector<8x1xf32>
    %cst_39 = arith.constant 3.200000e+01 : f32
    %77 = vector.broadcast %cst_39 : f32 to vector<8x1xf32>
    %78 = arith.divf %76, %77 : vector<8x1xf32>
    %79 = vector.broadcast %78 : vector<8x1xf32> to vector<8x32xf32>
    %80 = arith.subf %72, %79 : vector<8x32xf32>
    %81 = arith.mulf %80, %80 : vector<8x32xf32>
    %cst_40 = arith.constant dense<0.000000e+00> : vector<8xf32>
    %82 = vector.multi_reduction <add>, %81, %cst_40 [1] : vector<8x32xf32> to vector<8xf32>
    %83 = vector.shape_cast %82 : vector<8xf32> to vector<8x1xf32>
    %cst_41 = arith.constant 3.200000e+01 : f32
    %84 = vector.broadcast %cst_41 : f32 to vector<8x1xf32>
    %85 = arith.divf %83, %84 : vector<8x1xf32>
    %86 = vector.broadcast %78 : vector<8x1xf32> to vector<8x32xf32>
    %87 = arith.subf %72, %86 : vector<8x32xf32>
    %cst_42 = arith.constant 9.99999974E-6 : f32
    %88 = vector.broadcast %cst_42 : f32 to vector<8x1xf32>
    %89 = arith.addf %85, %88 : vector<8x1xf32>
    %90 = math.rsqrt %89 : vector<8x1xf32>
    %91 = vector.broadcast %90 : vector<8x1xf32> to vector<8x32xf32>
    %92 = arith.mulf %87, %91 : vector<8x32xf32>
    %93 = vector.broadcast %73 : vector<1x32xf32> to vector<8x32xf32>
    %94 = arith.mulf %92, %93 : vector<8x32xf32>
    %95 = vector.broadcast %74 : vector<1x32xf32> to vector<8x32xf32>
    %96 = arith.addf %94, %95 : vector<8x32xf32>
    %c0_43 = arith.constant 0 : index
    %c0_44 = arith.constant 0 : index
    %c0_45 = arith.constant 0 : index
    %97 = vector.load %arg8[%c0_43, %c0_44, %c0_45] : memref<2x32x32xbf16, #tpu.memory_space<vmem>>, vector<1x32x32xbf16>
    %98 = vector.shape_cast %97 : vector<1x32x32xbf16> to vector<32x32xbf16>
    %99 = arith.truncf %96 : vector<8x32xf32> to vector<8x32xbf16>
    %cst_46 = arith.constant dense<0.000000e+00> : vector<8x32xf32>
    %100 = tpu.matmul %99, %98, %cst_46 {dimension_numbers = #tpu.dot_dimension_numbers<[1], [0], [0], [1], [0, 0, 1, 1], [], []>} : vector<8x32xbf16>, vector<32x32xbf16>, vector<8x32xf32> -> vector<8x32xf32>
    %c0_47 = arith.constant 0 : index
    %c0_48 = arith.constant 0 : index
    %c0_49 = arith.constant 0 : index
    %101 = vector.load %arg9[%c0_47, %c0_48, %c0_49] : memref<2x1x32xf32, #tpu.memory_space<vmem>>, vector<1x1x32xf32>
    %102 = vector.shape_cast %101 : vector<1x1x32xf32> to vector<1x32xf32>
    %103 = vector.broadcast %102 : vector<1x32xf32> to vector<8x32xf32>
    %104 = arith.addf %100, %103 : vector<8x32xf32>
    %c0_50 = arith.constant 0 : index
    %c0_51 = arith.constant 0 : index
    %c0_52 = arith.constant 0 : index
    %105 = vector.load %arg10[%c0_50, %c0_51, %c0_52] : memref<2x32x64xbf16, #tpu.memory_space<vmem>>, vector<1x32x64xbf16>
    %106 = vector.shape_cast %105 : vector<1x32x64xbf16> to vector<32x64xbf16>
    %cst_53 = arith.constant dense<0.000000e+00> : vector<8x64xf32>
    %107 = tpu.matmul %6, %106, %cst_53 {dimension_numbers = #tpu.dot_dimension_numbers<[1], [0], [0], [1], [0, 0, 1, 1], [], []>} : vector<8x32xbf16>, vector<32x64xbf16>, vector<8x64xf32> -> vector<8x64xf32>
    %c0_54 = arith.constant 0 : index
    %c0_55 = arith.constant 0 : index
    %c0_56 = arith.constant 0 : index
    %108 = vector.load %arg11[%c0_54, %c0_55, %c0_56] : memref<2x1x64xf32, #tpu.memory_space<vmem>>, vector<1x1x64xf32>
    %109 = vector.shape_cast %108 : vector<1x1x64xf32> to vector<1x64xf32>
    %110 = vector.broadcast %109 : vector<1x64xf32> to vector<8x64xf32>
    %111 = arith.addf %107, %110 : vector<8x64xf32>
    %112 = vector.extract_strided_slice %111 {offsets = [0, 0], sizes = [8, 32], strides = [1, 1]} : vector<8x64xf32> to vector<8x32xf32>
    %113 = vector.extract_strided_slice %111 {offsets = [0, 32], sizes = [8, 32], strides = [1, 1]} : vector<8x64xf32> to vector<8x32xf32>
    %c0_57 = arith.constant 0 : index
    %c0_58 = arith.constant 0 : index
    %c0_59 = arith.constant 0 : index
    %114 = vector.load %arg12[%c0_57, %c0_58, %c0_59] : memref<2x32x32xbf16, #tpu.memory_space<vmem>>, vector<1x32x32xbf16>
    %115 = vector.shape_cast %114 : vector<1x32x32xbf16> to vector<32x32xbf16>
    %c0_60 = arith.constant 0 : index
    %c0_61 = arith.constant 0 : index
    %c0_62 = arith.constant 0 : index
    %116 = vector.load %arg13[%c0_60, %c0_61, %c0_62] : memref<2x1x32xf32, #tpu.memory_space<vmem>>, vector<1x1x32xf32>
    %117 = vector.shape_cast %116 : vector<1x1x32xf32> to vector<1x32xf32>
    %cst_63 = arith.constant 0.353553385 : f32
    %118 = vector.broadcast %cst_63 : f32 to vector<8x32xf32>
    %119 = arith.mulf %104, %118 : vector<8x32xf32>
    %120 = arith.truncf %119 : vector<8x32xf32> to vector<8x32xbf16>
    %121 = arith.truncf %112 : vector<8x32xf32> to vector<8x32xbf16>
    %122 = arith.truncf %113 : vector<8x32xf32> to vector<8x32xbf16>
    %123 = vector.extract_strided_slice %120 {offsets = [0, 0], sizes = [8, 8], strides = [1, 1]} : vector<8x32xbf16> to vector<8x8xbf16>
    %124 = vector.extract_strided_slice %121 {offsets = [0, 0], sizes = [8, 8], strides = [1, 1]} : vector<8x32xbf16> to vector<8x8xbf16>
    %cst_64 = arith.constant dense<0.000000e+00> : vector<8x8xf32>
    %125 = tpu.matmul %123, %124, %cst_64 {dimension_numbers = #tpu.dot_dimension_numbers<[1], [1], [0], [0], [0, 0, 1, 0], [], []>} : vector<8x8xbf16>, vector<8x8xbf16>, vector<8x8xf32> -> vector<8x8xf32>
    %126 = vector.extract_strided_slice %122 {offsets = [0, 0], sizes = [8, 8], strides = [1, 1]} : vector<8x32xbf16> to vector<8x8xbf16>
    %127 = arith.truncf %125 : vector<8x8xf32> to vector<8x8xbf16>
    %cst_65 = arith.constant dense<0.000000e+00> : vector<8x8xf32>
    %128 = tpu.matmul %127, %126, %cst_65 {dimension_numbers = #tpu.dot_dimension_numbers<[1], [0], [0], [1], [0, 0, 1, 1], [], []>} : vector<8x8xbf16>, vector<8x8xbf16>, vector<8x8xf32> -> vector<8x8xf32>
    %129 = vector.extract_strided_slice %115 {offsets = [0, 0], sizes = [8, 32], strides = [1, 1]} : vector<32x32xbf16> to vector<8x32xbf16>
    %130 = arith.truncf %128 : vector<8x8xf32> to vector<8x8xbf16>
    %cst_66 = arith.constant dense<0.000000e+00> : vector<8x32xf32>
    %131 = tpu.matmul %130, %129, %cst_66 {dimension_numbers = #tpu.dot_dimension_numbers<[1], [0], [0], [1], [0, 0, 1, 1], [], []>} : vector<8x8xbf16>, vector<8x32xbf16>, vector<8x32xf32> -> vector<8x32xf32>
    %132 = vector.extract_strided_slice %120 {offsets = [0, 8], sizes = [8, 8], strides = [1, 1]} : vector<8x32xbf16> to vector<8x8xbf16>
    %133 = vector.extract_strided_slice %121 {offsets = [0, 8], sizes = [8, 8], strides = [1, 1]} : vector<8x32xbf16> to vector<8x8xbf16>
    %cst_67 = arith.constant dense<0.000000e+00> : vector<8x8xf32>
    %134 = tpu.matmul %132, %133, %cst_67 {dimension_numbers = #tpu.dot_dimension_numbers<[1], [1], [0], [0], [0, 0, 1, 0], [], []>} : vector<8x8xbf16>, vector<8x8xbf16>, vector<8x8xf32> -> vector<8x8xf32>
    %135 = vector.extract_strided_slice %122 {offsets = [0, 8], sizes = [8, 8], strides = [1, 1]} : vector<8x32xbf16> to vector<8x8xbf16>
    %136 = arith.truncf %134 : vector<8x8xf32> to vector<8x8xbf16>
    %cst_68 = arith.constant dense<0.000000e+00> : vector<8x8xf32>
    %137 = tpu.matmul %136, %135, %cst_68 {dimension_numbers = #tpu.dot_dimension_numbers<[1], [0], [0], [1], [0, 0, 1, 1], [], []>} : vector<8x8xbf16>, vector<8x8xbf16>, vector<8x8xf32> -> vector<8x8xf32>
    %138 = vector.extract_strided_slice %115 {offsets = [8, 0], sizes = [8, 32], strides = [1, 1]} : vector<32x32xbf16> to vector<8x32xbf16>
    %139 = arith.truncf %137 : vector<8x8xf32> to vector<8x8xbf16>
    %cst_69 = arith.constant dense<0.000000e+00> : vector<8x32xf32>
    %140 = tpu.matmul %139, %138, %cst_69 {dimension_numbers = #tpu.dot_dimension_numbers<[1], [0], [0], [1], [0, 0, 1, 1], [], []>} : vector<8x8xbf16>, vector<8x32xbf16>, vector<8x32xf32> -> vector<8x32xf32>
    %141 = arith.addf %131, %140 : vector<8x32xf32>
    %142 = vector.extract_strided_slice %120 {offsets = [0, 16], sizes = [8, 8], strides = [1, 1]} : vector<8x32xbf16> to vector<8x8xbf16>
    %143 = vector.extract_strided_slice %121 {offsets = [0, 16], sizes = [8, 8], strides = [1, 1]} : vector<8x32xbf16> to vector<8x8xbf16>
    %cst_70 = arith.constant dense<0.000000e+00> : vector<8x8xf32>
    %144 = tpu.matmul %142, %143, %cst_70 {dimension_numbers = #tpu.dot_dimension_numbers<[1], [1], [0], [0], [0, 0, 1, 0], [], []>} : vector<8x8xbf16>, vector<8x8xbf16>, vector<8x8xf32> -> vector<8x8xf32>
    %145 = vector.extract_strided_slice %122 {offsets = [0, 16], sizes = [8, 8], strides = [1, 1]} : vector<8x32xbf16> to vector<8x8xbf16>
    %146 = arith.truncf %144 : vector<8x8xf32> to vector<8x8xbf16>
    %cst_71 = arith.constant dense<0.000000e+00> : vector<8x8xf32>
    %147 = tpu.matmul %146, %145, %cst_71 {dimension_numbers = #tpu.dot_dimension_numbers<[1], [0], [0], [1], [0, 0, 1, 1], [], []>} : vector<8x8xbf16>, vector<8x8xbf16>, vector<8x8xf32> -> vector<8x8xf32>
    %148 = vector.extract_strided_slice %115 {offsets = [16, 0], sizes = [8, 32], strides = [1, 1]} : vector<32x32xbf16> to vector<8x32xbf16>
    %149 = arith.truncf %147 : vector<8x8xf32> to vector<8x8xbf16>
    %cst_72 = arith.constant dense<0.000000e+00> : vector<8x32xf32>
    %150 = tpu.matmul %149, %148, %cst_72 {dimension_numbers = #tpu.dot_dimension_numbers<[1], [0], [0], [1], [0, 0, 1, 1], [], []>} : vector<8x8xbf16>, vector<8x32xbf16>, vector<8x32xf32> -> vector<8x32xf32>
    %151 = arith.addf %141, %150 : vector<8x32xf32>
    %152 = vector.extract_strided_slice %120 {offsets = [0, 24], sizes = [8, 8], strides = [1, 1]} : vector<8x32xbf16> to vector<8x8xbf16>
    %153 = vector.extract_strided_slice %121 {offsets = [0, 24], sizes = [8, 8], strides = [1, 1]} : vector<8x32xbf16> to vector<8x8xbf16>
    %cst_73 = arith.constant dense<0.000000e+00> : vector<8x8xf32>
    %154 = tpu.matmul %152, %153, %cst_73 {dimension_numbers = #tpu.dot_dimension_numbers<[1], [1], [0], [0], [0, 0, 1, 0], [], []>} : vector<8x8xbf16>, vector<8x8xbf16>, vector<8x8xf32> -> vector<8x8xf32>
    %155 = vector.extract_strided_slice %122 {offsets = [0, 24], sizes = [8, 8], strides = [1, 1]} : vector<8x32xbf16> to vector<8x8xbf16>
    %156 = arith.truncf %154 : vector<8x8xf32> to vector<8x8xbf16>
    %cst_74 = arith.constant dense<0.000000e+00> : vector<8x8xf32>
    %157 = tpu.matmul %156, %155, %cst_74 {dimension_numbers = #tpu.dot_dimension_numbers<[1], [0], [0], [1], [0, 0, 1, 1], [], []>} : vector<8x8xbf16>, vector<8x8xbf16>, vector<8x8xf32> -> vector<8x8xf32>
    %158 = vector.extract_strided_slice %115 {offsets = [24, 0], sizes = [8, 32], strides = [1, 1]} : vector<32x32xbf16> to vector<8x32xbf16>
    %159 = arith.truncf %157 : vector<8x8xf32> to vector<8x8xbf16>
    %cst_75 = arith.constant dense<0.000000e+00> : vector<8x32xf32>
    %160 = tpu.matmul %159, %158, %cst_75 {dimension_numbers = #tpu.dot_dimension_numbers<[1], [0], [0], [1], [0, 0, 1, 1], [], []>} : vector<8x8xbf16>, vector<8x32xbf16>, vector<8x32xf32> -> vector<8x32xf32>
    %161 = arith.addf %151, %160 : vector<8x32xf32>
    %162 = vector.broadcast %117 : vector<1x32xf32> to vector<8x32xf32>
    %163 = arith.addf %161, %162 : vector<8x32xf32>
    %164 = arith.addf %96, %163 : vector<8x32xf32>
    %165 = vector.extract_strided_slice %8 {offsets = [1, 0], sizes = [1, 32], strides = [1, 1]} : vector<3x32xf32> to vector<1x32xf32>
    %166 = vector.extract_strided_slice %10 {offsets = [1, 0], sizes = [1, 32], strides = [1, 1]} : vector<3x32xf32> to vector<1x32xf32>
    %cst_76 = arith.constant dense<0.000000e+00> : vector<8xf32>
    %167 = vector.multi_reduction <add>, %164, %cst_76 [1] : vector<8x32xf32> to vector<8xf32>
    %168 = vector.shape_cast %167 : vector<8xf32> to vector<8x1xf32>
    %cst_77 = arith.constant 3.200000e+01 : f32
    %169 = vector.broadcast %cst_77 : f32 to vector<8x1xf32>
    %170 = arith.divf %168, %169 : vector<8x1xf32>
    %171 = vector.broadcast %170 : vector<8x1xf32> to vector<8x32xf32>
    %172 = arith.subf %164, %171 : vector<8x32xf32>
    %173 = arith.mulf %172, %172 : vector<8x32xf32>
    %cst_78 = arith.constant dense<0.000000e+00> : vector<8xf32>
    %174 = vector.multi_reduction <add>, %173, %cst_78 [1] : vector<8x32xf32> to vector<8xf32>
    %175 = vector.shape_cast %174 : vector<8xf32> to vector<8x1xf32>
    %cst_79 = arith.constant 3.200000e+01 : f32
    %176 = vector.broadcast %cst_79 : f32 to vector<8x1xf32>
    %177 = arith.divf %175, %176 : vector<8x1xf32>
    %178 = vector.broadcast %170 : vector<8x1xf32> to vector<8x32xf32>
    %179 = arith.subf %164, %178 : vector<8x32xf32>
    %cst_80 = arith.constant 9.99999974E-6 : f32
    %180 = vector.broadcast %cst_80 : f32 to vector<8x1xf32>
    %181 = arith.addf %177, %180 : vector<8x1xf32>
    %182 = math.rsqrt %181 : vector<8x1xf32>
    %183 = vector.broadcast %182 : vector<8x1xf32> to vector<8x32xf32>
    %184 = arith.mulf %179, %183 : vector<8x32xf32>
    %185 = vector.broadcast %165 : vector<1x32xf32> to vector<8x32xf32>
    %186 = arith.mulf %184, %185 : vector<8x32xf32>
    %187 = vector.broadcast %166 : vector<1x32xf32> to vector<8x32xf32>
    %188 = arith.addf %186, %187 : vector<8x32xf32>
    %c0_81 = arith.constant 0 : index
    %c0_82 = arith.constant 0 : index
    %c0_83 = arith.constant 0 : index
    %189 = vector.load %arg14[%c0_81, %c0_82, %c0_83] : memref<2x32x64xbf16, #tpu.memory_space<vmem>>, vector<1x32x64xbf16>
    %190 = vector.shape_cast %189 : vector<1x32x64xbf16> to vector<32x64xbf16>
    %191 = arith.truncf %188 : vector<8x32xf32> to vector<8x32xbf16>
    %cst_84 = arith.constant dense<0.000000e+00> : vector<8x64xf32>
    %192 = tpu.matmul %191, %190, %cst_84 {dimension_numbers = #tpu.dot_dimension_numbers<[1], [0], [0], [1], [0, 0, 1, 1], [], []>} : vector<8x32xbf16>, vector<32x64xbf16>, vector<8x64xf32> -> vector<8x64xf32>
    %c0_85 = arith.constant 0 : index
    %c0_86 = arith.constant 0 : index
    %c0_87 = arith.constant 0 : index
    %193 = vector.load %arg15[%c0_85, %c0_86, %c0_87] : memref<2x1x64xf32, #tpu.memory_space<vmem>>, vector<1x1x64xf32>
    %194 = vector.shape_cast %193 : vector<1x1x64xf32> to vector<1x64xf32>
    %195 = vector.broadcast %194 : vector<1x64xf32> to vector<8x64xf32>
    %196 = arith.addf %192, %195 : vector<8x64xf32>
    %cst_88 = arith.constant 0.000000e+00 : f32
    %197 = vector.broadcast %cst_88 : f32 to vector<8x64xf32>
    %198 = arith.maximumf %196, %197 : vector<8x64xf32>
    %c0_89 = arith.constant 0 : index
    %c0_90 = arith.constant 0 : index
    %c0_91 = arith.constant 0 : index
    %199 = vector.load %arg16[%c0_89, %c0_90, %c0_91] : memref<2x64x32xbf16, #tpu.memory_space<vmem>>, vector<1x64x32xbf16>
    %200 = vector.shape_cast %199 : vector<1x64x32xbf16> to vector<64x32xbf16>
    %201 = arith.truncf %198 : vector<8x64xf32> to vector<8x64xbf16>
    %cst_92 = arith.constant dense<0.000000e+00> : vector<8x32xf32>
    %202 = tpu.matmul %201, %200, %cst_92 {dimension_numbers = #tpu.dot_dimension_numbers<[1], [0], [0], [1], [0, 0, 1, 1], [], []>} : vector<8x64xbf16>, vector<64x32xbf16>, vector<8x32xf32> -> vector<8x32xf32>
    %c0_93 = arith.constant 0 : index
    %c0_94 = arith.constant 0 : index
    %c0_95 = arith.constant 0 : index
    %203 = vector.load %arg17[%c0_93, %c0_94, %c0_95] : memref<2x1x32xf32, #tpu.memory_space<vmem>>, vector<1x1x32xf32>
    %204 = vector.shape_cast %203 : vector<1x1x32xf32> to vector<1x32xf32>
    %205 = vector.broadcast %204 : vector<1x32xf32> to vector<8x32xf32>
    %206 = arith.addf %202, %205 : vector<8x32xf32>
    %207 = arith.addf %188, %206 : vector<8x32xf32>
    %208 = vector.extract_strided_slice %8 {offsets = [2, 0], sizes = [1, 32], strides = [1, 1]} : vector<3x32xf32> to vector<1x32xf32>
    %209 = vector.extract_strided_slice %10 {offsets = [2, 0], sizes = [1, 32], strides = [1, 1]} : vector<3x32xf32> to vector<1x32xf32>
    %cst_96 = arith.constant dense<0.000000e+00> : vector<8xf32>
    %210 = vector.multi_reduction <add>, %207, %cst_96 [1] : vector<8x32xf32> to vector<8xf32>
    %211 = vector.shape_cast %210 : vector<8xf32> to vector<8x1xf32>
    %cst_97 = arith.constant 3.200000e+01 : f32
    %212 = vector.broadcast %cst_97 : f32 to vector<8x1xf32>
    %213 = arith.divf %211, %212 : vector<8x1xf32>
    %214 = vector.broadcast %213 : vector<8x1xf32> to vector<8x32xf32>
    %215 = arith.subf %207, %214 : vector<8x32xf32>
    %216 = arith.mulf %215, %215 : vector<8x32xf32>
    %cst_98 = arith.constant dense<0.000000e+00> : vector<8xf32>
    %217 = vector.multi_reduction <add>, %216, %cst_98 [1] : vector<8x32xf32> to vector<8xf32>
    %218 = vector.shape_cast %217 : vector<8xf32> to vector<8x1xf32>
    %cst_99 = arith.constant 3.200000e+01 : f32
    %219 = vector.broadcast %cst_99 : f32 to vector<8x1xf32>
    %220 = arith.divf %218, %219 : vector<8x1xf32>
    %221 = vector.broadcast %213 : vector<8x1xf32> to vector<8x32xf32>
    %222 = arith.subf %207, %221 : vector<8x32xf32>
    %cst_100 = arith.constant 9.99999974E-6 : f32
    %223 = vector.broadcast %cst_100 : f32 to vector<8x1xf32>
    %224 = arith.addf %220, %223 : vector<8x1xf32>
    %225 = math.rsqrt %224 : vector<8x1xf32>
    %226 = vector.broadcast %225 : vector<8x1xf32> to vector<8x32xf32>
    %227 = arith.mulf %222, %226 : vector<8x32xf32>
    %228 = vector.broadcast %208 : vector<1x32xf32> to vector<8x32xf32>
    %229 = arith.mulf %227, %228 : vector<8x32xf32>
    %230 = vector.broadcast %209 : vector<1x32xf32> to vector<8x32xf32>
    %231 = arith.addf %229, %230 : vector<8x32xf32>
    %c1 = arith.constant 1 : index
    %c0_101 = arith.constant 0 : index
    %c0_102 = arith.constant 0 : index
    %232 = vector.load %arg18[%c1, %c0_101, %c0_102] : memref<2x3x32xf32, #tpu.memory_space<vmem>>, vector<1x3x32xf32>
    %233 = vector.shape_cast %232 : vector<1x3x32xf32> to vector<3x32xf32>
    %c1_103 = arith.constant 1 : index
    %c0_104 = arith.constant 0 : index
    %c0_105 = arith.constant 0 : index
    %234 = vector.load %arg19[%c1_103, %c0_104, %c0_105] : memref<2x3x32xf32, #tpu.memory_space<vmem>>, vector<1x3x32xf32>
    %235 = vector.shape_cast %234 : vector<1x3x32xf32> to vector<3x32xf32>
    %c1_106 = arith.constant 1 : index
    %c0_107 = arith.constant 0 : index
    %c0_108 = arith.constant 0 : index
    %236 = vector.load %arg4[%c1_106, %c0_107, %c0_108] : memref<2x32x96xbf16, #tpu.memory_space<vmem>>, vector<1x32x96xbf16>
    %237 = vector.shape_cast %236 : vector<1x32x96xbf16> to vector<32x96xbf16>
    %238 = arith.truncf %231 : vector<8x32xf32> to vector<8x32xbf16>
    %cst_109 = arith.constant dense<0.000000e+00> : vector<8x96xf32>
    %239 = tpu.matmul %238, %237, %cst_109 {dimension_numbers = #tpu.dot_dimension_numbers<[1], [0], [0], [1], [0, 0, 1, 1], [], []>} : vector<8x32xbf16>, vector<32x96xbf16>, vector<8x96xf32> -> vector<8x96xf32>
    %c1_110 = arith.constant 1 : index
    %c0_111 = arith.constant 0 : index
    %c0_112 = arith.constant 0 : index
    %240 = vector.load %arg5[%c1_110, %c0_111, %c0_112] : memref<2x1x96xf32, #tpu.memory_space<vmem>>, vector<1x1x96xf32>
    %241 = vector.shape_cast %240 : vector<1x1x96xf32> to vector<1x96xf32>
    %242 = vector.broadcast %241 : vector<1x96xf32> to vector<8x96xf32>
    %243 = arith.addf %239, %242 : vector<8x96xf32>
    %244 = vector.extract_strided_slice %243 {offsets = [0, 0], sizes = [8, 32], strides = [1, 1]} : vector<8x96xf32> to vector<8x32xf32>
    %245 = vector.extract_strided_slice %243 {offsets = [0, 32], sizes = [8, 32], strides = [1, 1]} : vector<8x96xf32> to vector<8x32xf32>
    %246 = vector.extract_strided_slice %243 {offsets = [0, 64], sizes = [8, 32], strides = [1, 1]} : vector<8x96xf32> to vector<8x32xf32>
    %c1_113 = arith.constant 1 : index
    %c0_114 = arith.constant 0 : index
    %c0_115 = arith.constant 0 : index
    %247 = vector.load %arg6[%c1_113, %c0_114, %c0_115] : memref<2x32x32xbf16, #tpu.memory_space<vmem>>, vector<1x32x32xbf16>
    %248 = vector.shape_cast %247 : vector<1x32x32xbf16> to vector<32x32xbf16>
    %c1_116 = arith.constant 1 : index
    %c0_117 = arith.constant 0 : index
    %c0_118 = arith.constant 0 : index
    %249 = vector.load %arg7[%c1_116, %c0_117, %c0_118] : memref<2x1x32xf32, #tpu.memory_space<vmem>>, vector<1x1x32xf32>
    %250 = vector.shape_cast %249 : vector<1x1x32xf32> to vector<1x32xf32>
    %cst_119 = arith.constant 0.353553385 : f32
    %251 = vector.broadcast %cst_119 : f32 to vector<8x32xf32>
    %252 = arith.mulf %244, %251 : vector<8x32xf32>
    %253 = arith.truncf %252 : vector<8x32xf32> to vector<8x32xbf16>
    %254 = arith.truncf %245 : vector<8x32xf32> to vector<8x32xbf16>
    %255 = arith.truncf %246 : vector<8x32xf32> to vector<8x32xbf16>
    %256 = vector.extract_strided_slice %253 {offsets = [0, 0], sizes = [8, 8], strides = [1, 1]} : vector<8x32xbf16> to vector<8x8xbf16>
    %257 = vector.extract_strided_slice %254 {offsets = [0, 0], sizes = [8, 8], strides = [1, 1]} : vector<8x32xbf16> to vector<8x8xbf16>
    %cst_120 = arith.constant dense<0.000000e+00> : vector<8x8xf32>
    %258 = tpu.matmul %256, %257, %cst_120 {dimension_numbers = #tpu.dot_dimension_numbers<[1], [1], [0], [0], [0, 0, 1, 0], [], []>} : vector<8x8xbf16>, vector<8x8xbf16>, vector<8x8xf32> -> vector<8x8xf32>
    %259 = vector.extract_strided_slice %255 {offsets = [0, 0], sizes = [8, 8], strides = [1, 1]} : vector<8x32xbf16> to vector<8x8xbf16>
    %260 = arith.truncf %258 : vector<8x8xf32> to vector<8x8xbf16>
    %cst_121 = arith.constant dense<0.000000e+00> : vector<8x8xf32>
    %261 = tpu.matmul %260, %259, %cst_121 {dimension_numbers = #tpu.dot_dimension_numbers<[1], [0], [0], [1], [0, 0, 1, 1], [], []>} : vector<8x8xbf16>, vector<8x8xbf16>, vector<8x8xf32> -> vector<8x8xf32>
    %262 = vector.extract_strided_slice %248 {offsets = [0, 0], sizes = [8, 32], strides = [1, 1]} : vector<32x32xbf16> to vector<8x32xbf16>
    %263 = arith.truncf %261 : vector<8x8xf32> to vector<8x8xbf16>
    %cst_122 = arith.constant dense<0.000000e+00> : vector<8x32xf32>
    %264 = tpu.matmul %263, %262, %cst_122 {dimension_numbers = #tpu.dot_dimension_numbers<[1], [0], [0], [1], [0, 0, 1, 1], [], []>} : vector<8x8xbf16>, vector<8x32xbf16>, vector<8x32xf32> -> vector<8x32xf32>
    %265 = vector.extract_strided_slice %253 {offsets = [0, 8], sizes = [8, 8], strides = [1, 1]} : vector<8x32xbf16> to vector<8x8xbf16>
    %266 = vector.extract_strided_slice %254 {offsets = [0, 8], sizes = [8, 8], strides = [1, 1]} : vector<8x32xbf16> to vector<8x8xbf16>
    %cst_123 = arith.constant dense<0.000000e+00> : vector<8x8xf32>
    %267 = tpu.matmul %265, %266, %cst_123 {dimension_numbers = #tpu.dot_dimension_numbers<[1], [1], [0], [0], [0, 0, 1, 0], [], []>} : vector<8x8xbf16>, vector<8x8xbf16>, vector<8x8xf32> -> vector<8x8xf32>
    %268 = vector.extract_strided_slice %255 {offsets = [0, 8], sizes = [8, 8], strides = [1, 1]} : vector<8x32xbf16> to vector<8x8xbf16>
    %269 = arith.truncf %267 : vector<8x8xf32> to vector<8x8xbf16>
    %cst_124 = arith.constant dense<0.000000e+00> : vector<8x8xf32>
    %270 = tpu.matmul %269, %268, %cst_124 {dimension_numbers = #tpu.dot_dimension_numbers<[1], [0], [0], [1], [0, 0, 1, 1], [], []>} : vector<8x8xbf16>, vector<8x8xbf16>, vector<8x8xf32> -> vector<8x8xf32>
    %271 = vector.extract_strided_slice %248 {offsets = [8, 0], sizes = [8, 32], strides = [1, 1]} : vector<32x32xbf16> to vector<8x32xbf16>
    %272 = arith.truncf %270 : vector<8x8xf32> to vector<8x8xbf16>
    %cst_125 = arith.constant dense<0.000000e+00> : vector<8x32xf32>
    %273 = tpu.matmul %272, %271, %cst_125 {dimension_numbers = #tpu.dot_dimension_numbers<[1], [0], [0], [1], [0, 0, 1, 1], [], []>} : vector<8x8xbf16>, vector<8x32xbf16>, vector<8x32xf32> -> vector<8x32xf32>
    %274 = arith.addf %264, %273 : vector<8x32xf32>
    %275 = vector.extract_strided_slice %253 {offsets = [0, 16], sizes = [8, 8], strides = [1, 1]} : vector<8x32xbf16> to vector<8x8xbf16>
    %276 = vector.extract_strided_slice %254 {offsets = [0, 16], sizes = [8, 8], strides = [1, 1]} : vector<8x32xbf16> to vector<8x8xbf16>
    %cst_126 = arith.constant dense<0.000000e+00> : vector<8x8xf32>
    %277 = tpu.matmul %275, %276, %cst_126 {dimension_numbers = #tpu.dot_dimension_numbers<[1], [1], [0], [0], [0, 0, 1, 0], [], []>} : vector<8x8xbf16>, vector<8x8xbf16>, vector<8x8xf32> -> vector<8x8xf32>
    %278 = vector.extract_strided_slice %255 {offsets = [0, 16], sizes = [8, 8], strides = [1, 1]} : vector<8x32xbf16> to vector<8x8xbf16>
    %279 = arith.truncf %277 : vector<8x8xf32> to vector<8x8xbf16>
    %cst_127 = arith.constant dense<0.000000e+00> : vector<8x8xf32>
    %280 = tpu.matmul %279, %278, %cst_127 {dimension_numbers = #tpu.dot_dimension_numbers<[1], [0], [0], [1], [0, 0, 1, 1], [], []>} : vector<8x8xbf16>, vector<8x8xbf16>, vector<8x8xf32> -> vector<8x8xf32>
    %281 = vector.extract_strided_slice %248 {offsets = [16, 0], sizes = [8, 32], strides = [1, 1]} : vector<32x32xbf16> to vector<8x32xbf16>
    %282 = arith.truncf %280 : vector<8x8xf32> to vector<8x8xbf16>
    %cst_128 = arith.constant dense<0.000000e+00> : vector<8x32xf32>
    %283 = tpu.matmul %282, %281, %cst_128 {dimension_numbers = #tpu.dot_dimension_numbers<[1], [0], [0], [1], [0, 0, 1, 1], [], []>} : vector<8x8xbf16>, vector<8x32xbf16>, vector<8x32xf32> -> vector<8x32xf32>
    %284 = arith.addf %274, %283 : vector<8x32xf32>
    %285 = vector.extract_strided_slice %253 {offsets = [0, 24], sizes = [8, 8], strides = [1, 1]} : vector<8x32xbf16> to vector<8x8xbf16>
    %286 = vector.extract_strided_slice %254 {offsets = [0, 24], sizes = [8, 8], strides = [1, 1]} : vector<8x32xbf16> to vector<8x8xbf16>
    %cst_129 = arith.constant dense<0.000000e+00> : vector<8x8xf32>
    %287 = tpu.matmul %285, %286, %cst_129 {dimension_numbers = #tpu.dot_dimension_numbers<[1], [1], [0], [0], [0, 0, 1, 0], [], []>} : vector<8x8xbf16>, vector<8x8xbf16>, vector<8x8xf32> -> vector<8x8xf32>
    %288 = vector.extract_strided_slice %255 {offsets = [0, 24], sizes = [8, 8], strides = [1, 1]} : vector<8x32xbf16> to vector<8x8xbf16>
    %289 = arith.truncf %287 : vector<8x8xf32> to vector<8x8xbf16>
    %cst_130 = arith.constant dense<0.000000e+00> : vector<8x8xf32>
    %290 = tpu.matmul %289, %288, %cst_130 {dimension_numbers = #tpu.dot_dimension_numbers<[1], [0], [0], [1], [0, 0, 1, 1], [], []>} : vector<8x8xbf16>, vector<8x8xbf16>, vector<8x8xf32> -> vector<8x8xf32>
    %291 = vector.extract_strided_slice %248 {offsets = [24, 0], sizes = [8, 32], strides = [1, 1]} : vector<32x32xbf16> to vector<8x32xbf16>
    %292 = arith.truncf %290 : vector<8x8xf32> to vector<8x8xbf16>
    %cst_131 = arith.constant dense<0.000000e+00> : vector<8x32xf32>
    %293 = tpu.matmul %292, %291, %cst_131 {dimension_numbers = #tpu.dot_dimension_numbers<[1], [0], [0], [1], [0, 0, 1, 1], [], []>} : vector<8x8xbf16>, vector<8x32xbf16>, vector<8x32xf32> -> vector<8x32xf32>
    %294 = arith.addf %284, %293 : vector<8x32xf32>
    %295 = vector.broadcast %250 : vector<1x32xf32> to vector<8x32xf32>
    %296 = arith.addf %294, %295 : vector<8x32xf32>
    %297 = arith.addf %231, %296 : vector<8x32xf32>
    %298 = vector.extract_strided_slice %233 {offsets = [0, 0], sizes = [1, 32], strides = [1, 1]} : vector<3x32xf32> to vector<1x32xf32>
    %299 = vector.extract_strided_slice %235 {offsets = [0, 0], sizes = [1, 32], strides = [1, 1]} : vector<3x32xf32> to vector<1x32xf32>
    %cst_132 = arith.constant dense<0.000000e+00> : vector<8xf32>
    %300 = vector.multi_reduction <add>, %297, %cst_132 [1] : vector<8x32xf32> to vector<8xf32>
    %301 = vector.shape_cast %300 : vector<8xf32> to vector<8x1xf32>
    %cst_133 = arith.constant 3.200000e+01 : f32
    %302 = vector.broadcast %cst_133 : f32 to vector<8x1xf32>
    %303 = arith.divf %301, %302 : vector<8x1xf32>
    %304 = vector.broadcast %303 : vector<8x1xf32> to vector<8x32xf32>
    %305 = arith.subf %297, %304 : vector<8x32xf32>
    %306 = arith.mulf %305, %305 : vector<8x32xf32>
    %cst_134 = arith.constant dense<0.000000e+00> : vector<8xf32>
    %307 = vector.multi_reduction <add>, %306, %cst_134 [1] : vector<8x32xf32> to vector<8xf32>
    %308 = vector.shape_cast %307 : vector<8xf32> to vector<8x1xf32>
    %cst_135 = arith.constant 3.200000e+01 : f32
    %309 = vector.broadcast %cst_135 : f32 to vector<8x1xf32>
    %310 = arith.divf %308, %309 : vector<8x1xf32>
    %311 = vector.broadcast %303 : vector<8x1xf32> to vector<8x32xf32>
    %312 = arith.subf %297, %311 : vector<8x32xf32>
    %cst_136 = arith.constant 9.99999974E-6 : f32
    %313 = vector.broadcast %cst_136 : f32 to vector<8x1xf32>
    %314 = arith.addf %310, %313 : vector<8x1xf32>
    %315 = math.rsqrt %314 : vector<8x1xf32>
    %316 = vector.broadcast %315 : vector<8x1xf32> to vector<8x32xf32>
    %317 = arith.mulf %312, %316 : vector<8x32xf32>
    %318 = vector.broadcast %298 : vector<1x32xf32> to vector<8x32xf32>
    %319 = arith.mulf %317, %318 : vector<8x32xf32>
    %320 = vector.broadcast %299 : vector<1x32xf32> to vector<8x32xf32>
    %321 = arith.addf %319, %320 : vector<8x32xf32>
    %c1_137 = arith.constant 1 : index
    %c0_138 = arith.constant 0 : index
    %c0_139 = arith.constant 0 : index
    %322 = vector.load %arg8[%c1_137, %c0_138, %c0_139] : memref<2x32x32xbf16, #tpu.memory_space<vmem>>, vector<1x32x32xbf16>
    %323 = vector.shape_cast %322 : vector<1x32x32xbf16> to vector<32x32xbf16>
    %324 = arith.truncf %321 : vector<8x32xf32> to vector<8x32xbf16>
    %cst_140 = arith.constant dense<0.000000e+00> : vector<8x32xf32>
    %325 = tpu.matmul %324, %323, %cst_140 {dimension_numbers = #tpu.dot_dimension_numbers<[1], [0], [0], [1], [0, 0, 1, 1], [], []>} : vector<8x32xbf16>, vector<32x32xbf16>, vector<8x32xf32> -> vector<8x32xf32>
    %c1_141 = arith.constant 1 : index
    %c0_142 = arith.constant 0 : index
    %c0_143 = arith.constant 0 : index
    %326 = vector.load %arg9[%c1_141, %c0_142, %c0_143] : memref<2x1x32xf32, #tpu.memory_space<vmem>>, vector<1x1x32xf32>
    %327 = vector.shape_cast %326 : vector<1x1x32xf32> to vector<1x32xf32>
    %328 = vector.broadcast %327 : vector<1x32xf32> to vector<8x32xf32>
    %329 = arith.addf %325, %328 : vector<8x32xf32>
    %c1_144 = arith.constant 1 : index
    %c0_145 = arith.constant 0 : index
    %c0_146 = arith.constant 0 : index
    %330 = vector.load %arg10[%c1_144, %c0_145, %c0_146] : memref<2x32x64xbf16, #tpu.memory_space<vmem>>, vector<1x32x64xbf16>
    %331 = vector.shape_cast %330 : vector<1x32x64xbf16> to vector<32x64xbf16>
    %cst_147 = arith.constant dense<0.000000e+00> : vector<8x64xf32>
    %332 = tpu.matmul %6, %331, %cst_147 {dimension_numbers = #tpu.dot_dimension_numbers<[1], [0], [0], [1], [0, 0, 1, 1], [], []>} : vector<8x32xbf16>, vector<32x64xbf16>, vector<8x64xf32> -> vector<8x64xf32>
    %c1_148 = arith.constant 1 : index
    %c0_149 = arith.constant 0 : index
    %c0_150 = arith.constant 0 : index
    %333 = vector.load %arg11[%c1_148, %c0_149, %c0_150] : memref<2x1x64xf32, #tpu.memory_space<vmem>>, vector<1x1x64xf32>
    %334 = vector.shape_cast %333 : vector<1x1x64xf32> to vector<1x64xf32>
    %335 = vector.broadcast %334 : vector<1x64xf32> to vector<8x64xf32>
    %336 = arith.addf %332, %335 : vector<8x64xf32>
    %337 = vector.extract_strided_slice %336 {offsets = [0, 0], sizes = [8, 32], strides = [1, 1]} : vector<8x64xf32> to vector<8x32xf32>
    %338 = vector.extract_strided_slice %336 {offsets = [0, 32], sizes = [8, 32], strides = [1, 1]} : vector<8x64xf32> to vector<8x32xf32>
    %c1_151 = arith.constant 1 : index
    %c0_152 = arith.constant 0 : index
    %c0_153 = arith.constant 0 : index
    %339 = vector.load %arg12[%c1_151, %c0_152, %c0_153] : memref<2x32x32xbf16, #tpu.memory_space<vmem>>, vector<1x32x32xbf16>
    %340 = vector.shape_cast %339 : vector<1x32x32xbf16> to vector<32x32xbf16>
    %c1_154 = arith.constant 1 : index
    %c0_155 = arith.constant 0 : index
    %c0_156 = arith.constant 0 : index
    %341 = vector.load %arg13[%c1_154, %c0_155, %c0_156] : memref<2x1x32xf32, #tpu.memory_space<vmem>>, vector<1x1x32xf32>
    %342 = vector.shape_cast %341 : vector<1x1x32xf32> to vector<1x32xf32>
    %cst_157 = arith.constant 0.353553385 : f32
    %343 = vector.broadcast %cst_157 : f32 to vector<8x32xf32>
    %344 = arith.mulf %329, %343 : vector<8x32xf32>
    %345 = arith.truncf %344 : vector<8x32xf32> to vector<8x32xbf16>
    %346 = arith.truncf %337 : vector<8x32xf32> to vector<8x32xbf16>
    %347 = arith.truncf %338 : vector<8x32xf32> to vector<8x32xbf16>
    %348 = vector.extract_strided_slice %345 {offsets = [0, 0], sizes = [8, 8], strides = [1, 1]} : vector<8x32xbf16> to vector<8x8xbf16>
    %349 = vector.extract_strided_slice %346 {offsets = [0, 0], sizes = [8, 8], strides = [1, 1]} : vector<8x32xbf16> to vector<8x8xbf16>
    %cst_158 = arith.constant dense<0.000000e+00> : vector<8x8xf32>
    %350 = tpu.matmul %348, %349, %cst_158 {dimension_numbers = #tpu.dot_dimension_numbers<[1], [1], [0], [0], [0, 0, 1, 0], [], []>} : vector<8x8xbf16>, vector<8x8xbf16>, vector<8x8xf32> -> vector<8x8xf32>
    %351 = vector.extract_strided_slice %347 {offsets = [0, 0], sizes = [8, 8], strides = [1, 1]} : vector<8x32xbf16> to vector<8x8xbf16>
    %352 = arith.truncf %350 : vector<8x8xf32> to vector<8x8xbf16>
    %cst_159 = arith.constant dense<0.000000e+00> : vector<8x8xf32>
    %353 = tpu.matmul %352, %351, %cst_159 {dimension_numbers = #tpu.dot_dimension_numbers<[1], [0], [0], [1], [0, 0, 1, 1], [], []>} : vector<8x8xbf16>, vector<8x8xbf16>, vector<8x8xf32> -> vector<8x8xf32>
    %354 = vector.extract_strided_slice %340 {offsets = [0, 0], sizes = [8, 32], strides = [1, 1]} : vector<32x32xbf16> to vector<8x32xbf16>
    %355 = arith.truncf %353 : vector<8x8xf32> to vector<8x8xbf16>
    %cst_160 = arith.constant dense<0.000000e+00> : vector<8x32xf32>
    %356 = tpu.matmul %355, %354, %cst_160 {dimension_numbers = #tpu.dot_dimension_numbers<[1], [0], [0], [1], [0, 0, 1, 1], [], []>} : vector<8x8xbf16>, vector<8x32xbf16>, vector<8x32xf32> -> vector<8x32xf32>
    %357 = vector.extract_strided_slice %345 {offsets = [0, 8], sizes = [8, 8], strides = [1, 1]} : vector<8x32xbf16> to vector<8x8xbf16>
    %358 = vector.extract_strided_slice %346 {offsets = [0, 8], sizes = [8, 8], strides = [1, 1]} : vector<8x32xbf16> to vector<8x8xbf16>
    %cst_161 = arith.constant dense<0.000000e+00> : vector<8x8xf32>
    %359 = tpu.matmul %357, %358, %cst_161 {dimension_numbers = #tpu.dot_dimension_numbers<[1], [1], [0], [0], [0, 0, 1, 0], [], []>} : vector<8x8xbf16>, vector<8x8xbf16>, vector<8x8xf32> -> vector<8x8xf32>
    %360 = vector.extract_strided_slice %347 {offsets = [0, 8], sizes = [8, 8], strides = [1, 1]} : vector<8x32xbf16> to vector<8x8xbf16>
    %361 = arith.truncf %359 : vector<8x8xf32> to vector<8x8xbf16>
    %cst_162 = arith.constant dense<0.000000e+00> : vector<8x8xf32>
    %362 = tpu.matmul %361, %360, %cst_162 {dimension_numbers = #tpu.dot_dimension_numbers<[1], [0], [0], [1], [0, 0, 1, 1], [], []>} : vector<8x8xbf16>, vector<8x8xbf16>, vector<8x8xf32> -> vector<8x8xf32>
    %363 = vector.extract_strided_slice %340 {offsets = [8, 0], sizes = [8, 32], strides = [1, 1]} : vector<32x32xbf16> to vector<8x32xbf16>
    %364 = arith.truncf %362 : vector<8x8xf32> to vector<8x8xbf16>
    %cst_163 = arith.constant dense<0.000000e+00> : vector<8x32xf32>
    %365 = tpu.matmul %364, %363, %cst_163 {dimension_numbers = #tpu.dot_dimension_numbers<[1], [0], [0], [1], [0, 0, 1, 1], [], []>} : vector<8x8xbf16>, vector<8x32xbf16>, vector<8x32xf32> -> vector<8x32xf32>
    %366 = arith.addf %356, %365 : vector<8x32xf32>
    %367 = vector.extract_strided_slice %345 {offsets = [0, 16], sizes = [8, 8], strides = [1, 1]} : vector<8x32xbf16> to vector<8x8xbf16>
    %368 = vector.extract_strided_slice %346 {offsets = [0, 16], sizes = [8, 8], strides = [1, 1]} : vector<8x32xbf16> to vector<8x8xbf16>
    %cst_164 = arith.constant dense<0.000000e+00> : vector<8x8xf32>
    %369 = tpu.matmul %367, %368, %cst_164 {dimension_numbers = #tpu.dot_dimension_numbers<[1], [1], [0], [0], [0, 0, 1, 0], [], []>} : vector<8x8xbf16>, vector<8x8xbf16>, vector<8x8xf32> -> vector<8x8xf32>
    %370 = vector.extract_strided_slice %347 {offsets = [0, 16], sizes = [8, 8], strides = [1, 1]} : vector<8x32xbf16> to vector<8x8xbf16>
    %371 = arith.truncf %369 : vector<8x8xf32> to vector<8x8xbf16>
    %cst_165 = arith.constant dense<0.000000e+00> : vector<8x8xf32>
    %372 = tpu.matmul %371, %370, %cst_165 {dimension_numbers = #tpu.dot_dimension_numbers<[1], [0], [0], [1], [0, 0, 1, 1], [], []>} : vector<8x8xbf16>, vector<8x8xbf16>, vector<8x8xf32> -> vector<8x8xf32>
    %373 = vector.extract_strided_slice %340 {offsets = [16, 0], sizes = [8, 32], strides = [1, 1]} : vector<32x32xbf16> to vector<8x32xbf16>
    %374 = arith.truncf %372 : vector<8x8xf32> to vector<8x8xbf16>
    %cst_166 = arith.constant dense<0.000000e+00> : vector<8x32xf32>
    %375 = tpu.matmul %374, %373, %cst_166 {dimension_numbers = #tpu.dot_dimension_numbers<[1], [0], [0], [1], [0, 0, 1, 1], [], []>} : vector<8x8xbf16>, vector<8x32xbf16>, vector<8x32xf32> -> vector<8x32xf32>
    %376 = arith.addf %366, %375 : vector<8x32xf32>
    %377 = vector.extract_strided_slice %345 {offsets = [0, 24], sizes = [8, 8], strides = [1, 1]} : vector<8x32xbf16> to vector<8x8xbf16>
    %378 = vector.extract_strided_slice %346 {offsets = [0, 24], sizes = [8, 8], strides = [1, 1]} : vector<8x32xbf16> to vector<8x8xbf16>
    %cst_167 = arith.constant dense<0.000000e+00> : vector<8x8xf32>
    %379 = tpu.matmul %377, %378, %cst_167 {dimension_numbers = #tpu.dot_dimension_numbers<[1], [1], [0], [0], [0, 0, 1, 0], [], []>} : vector<8x8xbf16>, vector<8x8xbf16>, vector<8x8xf32> -> vector<8x8xf32>
    %380 = vector.extract_strided_slice %347 {offsets = [0, 24], sizes = [8, 8], strides = [1, 1]} : vector<8x32xbf16> to vector<8x8xbf16>
    %381 = arith.truncf %379 : vector<8x8xf32> to vector<8x8xbf16>
    %cst_168 = arith.constant dense<0.000000e+00> : vector<8x8xf32>
    %382 = tpu.matmul %381, %380, %cst_168 {dimension_numbers = #tpu.dot_dimension_numbers<[1], [0], [0], [1], [0, 0, 1, 1], [], []>} : vector<8x8xbf16>, vector<8x8xbf16>, vector<8x8xf32> -> vector<8x8xf32>
    %383 = vector.extract_strided_slice %340 {offsets = [24, 0], sizes = [8, 32], strides = [1, 1]} : vector<32x32xbf16> to vector<8x32xbf16>
    %384 = arith.truncf %382 : vector<8x8xf32> to vector<8x8xbf16>
    %cst_169 = arith.constant dense<0.000000e+00> : vector<8x32xf32>
    %385 = tpu.matmul %384, %383, %cst_169 {dimension_numbers = #tpu.dot_dimension_numbers<[1], [0], [0], [1], [0, 0, 1, 1], [], []>} : vector<8x8xbf16>, vector<8x32xbf16>, vector<8x32xf32> -> vector<8x32xf32>
    %386 = arith.addf %376, %385 : vector<8x32xf32>
    %387 = vector.broadcast %342 : vector<1x32xf32> to vector<8x32xf32>
    %388 = arith.addf %386, %387 : vector<8x32xf32>
    %389 = arith.addf %321, %388 : vector<8x32xf32>
    %390 = vector.extract_strided_slice %233 {offsets = [1, 0], sizes = [1, 32], strides = [1, 1]} : vector<3x32xf32> to vector<1x32xf32>
    %391 = vector.extract_strided_slice %235 {offsets = [1, 0], sizes = [1, 32], strides = [1, 1]} : vector<3x32xf32> to vector<1x32xf32>
    %cst_170 = arith.constant dense<0.000000e+00> : vector<8xf32>
    %392 = vector.multi_reduction <add>, %389, %cst_170 [1] : vector<8x32xf32> to vector<8xf32>
    %393 = vector.shape_cast %392 : vector<8xf32> to vector<8x1xf32>
    %cst_171 = arith.constant 3.200000e+01 : f32
    %394 = vector.broadcast %cst_171 : f32 to vector<8x1xf32>
    %395 = arith.divf %393, %394 : vector<8x1xf32>
    %396 = vector.broadcast %395 : vector<8x1xf32> to vector<8x32xf32>
    %397 = arith.subf %389, %396 : vector<8x32xf32>
    %398 = arith.mulf %397, %397 : vector<8x32xf32>
    %cst_172 = arith.constant dense<0.000000e+00> : vector<8xf32>
    %399 = vector.multi_reduction <add>, %398, %cst_172 [1] : vector<8x32xf32> to vector<8xf32>
    %400 = vector.shape_cast %399 : vector<8xf32> to vector<8x1xf32>
    %cst_173 = arith.constant 3.200000e+01 : f32
    %401 = vector.broadcast %cst_173 : f32 to vector<8x1xf32>
    %402 = arith.divf %400, %401 : vector<8x1xf32>
    %403 = vector.broadcast %395 : vector<8x1xf32> to vector<8x32xf32>
    %404 = arith.subf %389, %403 : vector<8x32xf32>
    %cst_174 = arith.constant 9.99999974E-6 : f32
    %405 = vector.broadcast %cst_174 : f32 to vector<8x1xf32>
    %406 = arith.addf %402, %405 : vector<8x1xf32>
    %407 = math.rsqrt %406 : vector<8x1xf32>
    %408 = vector.broadcast %407 : vector<8x1xf32> to vector<8x32xf32>
    %409 = arith.mulf %404, %408 : vector<8x32xf32>
    %410 = vector.broadcast %390 : vector<1x32xf32> to vector<8x32xf32>
    %411 = arith.mulf %409, %410 : vector<8x32xf32>
    %412 = vector.broadcast %391 : vector<1x32xf32> to vector<8x32xf32>
    %413 = arith.addf %411, %412 : vector<8x32xf32>
    %c1_175 = arith.constant 1 : index
    %c0_176 = arith.constant 0 : index
    %c0_177 = arith.constant 0 : index
    %414 = vector.load %arg14[%c1_175, %c0_176, %c0_177] : memref<2x32x64xbf16, #tpu.memory_space<vmem>>, vector<1x32x64xbf16>
    %415 = vector.shape_cast %414 : vector<1x32x64xbf16> to vector<32x64xbf16>
    %416 = arith.truncf %413 : vector<8x32xf32> to vector<8x32xbf16>
    %cst_178 = arith.constant dense<0.000000e+00> : vector<8x64xf32>
    %417 = tpu.matmul %416, %415, %cst_178 {dimension_numbers = #tpu.dot_dimension_numbers<[1], [0], [0], [1], [0, 0, 1, 1], [], []>} : vector<8x32xbf16>, vector<32x64xbf16>, vector<8x64xf32> -> vector<8x64xf32>
    %c1_179 = arith.constant 1 : index
    %c0_180 = arith.constant 0 : index
    %c0_181 = arith.constant 0 : index
    %418 = vector.load %arg15[%c1_179, %c0_180, %c0_181] : memref<2x1x64xf32, #tpu.memory_space<vmem>>, vector<1x1x64xf32>
    %419 = vector.shape_cast %418 : vector<1x1x64xf32> to vector<1x64xf32>
    %420 = vector.broadcast %419 : vector<1x64xf32> to vector<8x64xf32>
    %421 = arith.addf %417, %420 : vector<8x64xf32>
    %cst_182 = arith.constant 0.000000e+00 : f32
    %422 = vector.broadcast %cst_182 : f32 to vector<8x64xf32>
    %423 = arith.maximumf %421, %422 : vector<8x64xf32>
    %c1_183 = arith.constant 1 : index
    %c0_184 = arith.constant 0 : index
    %c0_185 = arith.constant 0 : index
    %424 = vector.load %arg16[%c1_183, %c0_184, %c0_185] : memref<2x64x32xbf16, #tpu.memory_space<vmem>>, vector<1x64x32xbf16>
    %425 = vector.shape_cast %424 : vector<1x64x32xbf16> to vector<64x32xbf16>
    %426 = arith.truncf %423 : vector<8x64xf32> to vector<8x64xbf16>
    %cst_186 = arith.constant dense<0.000000e+00> : vector<8x32xf32>
    %427 = tpu.matmul %426, %425, %cst_186 {dimension_numbers = #tpu.dot_dimension_numbers<[1], [0], [0], [1], [0, 0, 1, 1], [], []>} : vector<8x64xbf16>, vector<64x32xbf16>, vector<8x32xf32> -> vector<8x32xf32>
    %c1_187 = arith.constant 1 : index
    %c0_188 = arith.constant 0 : index
    %c0_189 = arith.constant 0 : index
    %428 = vector.load %arg17[%c1_187, %c0_188, %c0_189] : memref<2x1x32xf32, #tpu.memory_space<vmem>>, vector<1x1x32xf32>
    %429 = vector.shape_cast %428 : vector<1x1x32xf32> to vector<1x32xf32>
    %430 = vector.broadcast %429 : vector<1x32xf32> to vector<8x32xf32>
    %431 = arith.addf %427, %430 : vector<8x32xf32>
    %432 = arith.addf %413, %431 : vector<8x32xf32>
    %433 = vector.extract_strided_slice %233 {offsets = [2, 0], sizes = [1, 32], strides = [1, 1]} : vector<3x32xf32> to vector<1x32xf32>
    %434 = vector.extract_strided_slice %235 {offsets = [2, 0], sizes = [1, 32], strides = [1, 1]} : vector<3x32xf32> to vector<1x32xf32>
    %cst_190 = arith.constant dense<0.000000e+00> : vector<8xf32>
    %435 = vector.multi_reduction <add>, %432, %cst_190 [1] : vector<8x32xf32> to vector<8xf32>
    %436 = vector.shape_cast %435 : vector<8xf32> to vector<8x1xf32>
    %cst_191 = arith.constant 3.200000e+01 : f32
    %437 = vector.broadcast %cst_191 : f32 to vector<8x1xf32>
    %438 = arith.divf %436, %437 : vector<8x1xf32>
    %439 = vector.broadcast %438 : vector<8x1xf32> to vector<8x32xf32>
    %440 = arith.subf %432, %439 : vector<8x32xf32>
    %441 = arith.mulf %440, %440 : vector<8x32xf32>
    %cst_192 = arith.constant dense<0.000000e+00> : vector<8xf32>
    %442 = vector.multi_reduction <add>, %441, %cst_192 [1] : vector<8x32xf32> to vector<8xf32>
    %443 = vector.shape_cast %442 : vector<8xf32> to vector<8x1xf32>
    %cst_193 = arith.constant 3.200000e+01 : f32
    %444 = vector.broadcast %cst_193 : f32 to vector<8x1xf32>
    %445 = arith.divf %443, %444 : vector<8x1xf32>
    %446 = vector.broadcast %438 : vector<8x1xf32> to vector<8x32xf32>
    %447 = arith.subf %432, %446 : vector<8x32xf32>
    %cst_194 = arith.constant 9.99999974E-6 : f32
    %448 = vector.broadcast %cst_194 : f32 to vector<8x1xf32>
    %449 = arith.addf %445, %448 : vector<8x1xf32>
    %450 = math.rsqrt %449 : vector<8x1xf32>
    %451 = vector.broadcast %450 : vector<8x1xf32> to vector<8x32xf32>
    %452 = arith.mulf %447, %451 : vector<8x32xf32>
    %453 = vector.broadcast %433 : vector<1x32xf32> to vector<8x32xf32>
    %454 = arith.mulf %452, %453 : vector<8x32xf32>
    %455 = vector.broadcast %434 : vector<1x32xf32> to vector<8x32xf32>
    %456 = arith.addf %454, %455 : vector<8x32xf32>
    %c0_195 = arith.constant 0 : index
    %c0_196 = arith.constant 0 : index
    %457 = vector.load %arg20[%c0_195, %c0_196] : memref<32x32xbf16, #tpu.memory_space<vmem>>, vector<32x32xbf16>
    %458 = arith.truncf %456 : vector<8x32xf32> to vector<8x32xbf16>
    %cst_197 = arith.constant dense<0.000000e+00> : vector<8x32xf32>
    %459 = tpu.matmul %458, %457, %cst_197 {dimension_numbers = #tpu.dot_dimension_numbers<[1], [0], [0], [1], [0, 0, 1, 1], [], []>} : vector<8x32xbf16>, vector<32x32xbf16>, vector<8x32xf32> -> vector<8x32xf32>
    %c0_198 = arith.constant 0 : index
    %c0_199 = arith.constant 0 : index
    %460 = vector.load %arg21[%c0_198, %c0_199] : memref<1x32xf32, #tpu.memory_space<vmem>>, vector<1x32xf32>
    %461 = vector.broadcast %460 : vector<1x32xf32> to vector<8x32xf32>
    %462 = arith.addf %459, %461 : vector<8x32xf32>
    %cst_200 = arith.constant dense<0xFF800000> : vector<8xf32>
    %463 = vector.multi_reduction <maximumf>, %462, %cst_200 [1] : vector<8x32xf32> to vector<8xf32>
    %464 = vector.shape_cast %463 : vector<8xf32> to vector<8x1xf32>
    %465 = vector.broadcast %464 : vector<8x1xf32> to vector<8x32xf32>
    %466 = arith.subf %462, %465 : vector<8x32xf32>
    %467 = math.exp %466 : vector<8x32xf32>
    %cst_201 = arith.constant dense<0.000000e+00> : vector<8xf32>
    %468 = vector.multi_reduction <add>, %467, %cst_201 [1] : vector<8x32xf32> to vector<8xf32>
    %469 = vector.shape_cast %468 : vector<8xf32> to vector<8x1xf32>
    %470 = tpu.reciprocal %469 {approx = true} : vector<8x1xf32> -> vector<8x1xf32>
    %471 = vector.broadcast %470 : vector<8x1xf32> to vector<8x32xf32>
    %472 = arith.mulf %467, %471 : vector<8x32xf32>
    %c0_202 = arith.constant 0 : index
    %c0_203 = arith.constant 0 : index
    %c0_204 = arith.constant 0 : index
    %473 = vector.load %arg22[%c0_202, %c0_203, %c0_204] : memref<1x8x32xf32, #tpu.memory_space<vmem>>, vector<1x8x32xf32>
    %474 = vector.shape_cast %473 : vector<1x8x32xf32> to vector<8x32xf32>
    %475 = vector.shape_cast %472 : vector<8x32xf32> to vector<1x8x32xf32>
    tpu.vector_store %arg22[%c0_202, %c0_203, %c0_204], %475 {strides = array<i32>} : memref<1x8x32xf32, #tpu.memory_space<vmem>>, vector<1x8x32xf32>,
    return
  }
  func.func @transform_0(%arg0: i32) -> (i32, i32, i32) {
    %c0_i32 = arith.constant 0 : i32
    %c0_i32_0 = arith.constant 0 : i32
    %c0_i32_1 = arith.constant 0 : i32
    return %arg0, %c0_i32, %c0_i32_0 : i32, i32, i32
  }
  func.func @transform_1(%arg0: i32) -> (i32, i32, i32) {
    %c0_i32 = arith.constant 0 : i32
    %c0_i32_0 = arith.constant 0 : i32
    %c0_i32_1 = arith.constant 0 : i32
    return %arg0, %c0_i32, %c0_i32_0 : i32, i32, i32
  }
  func.func @transform_2(%arg0: i32) -> (i32, i32) {
    %c0_i32 = arith.constant 0 : i32
    %c0_i32_0 = arith.constant 0 : i32
    %c0_i32_1 = arith.constant 0 : i32
    return %c0_i32, %c0_i32_0 : i32, i32
  }
  func.func @transform_3(%arg0: i32) -> (i32, i32, i32) {
    %c0_i32 = arith.constant 0 : i32
    %c0_i32_0 = arith.constant 0 : i32
    %c0_i32_1 = arith.constant 0 : i32
    %c0_i32_2 = arith.constant 0 : i32
    return %c0_i32, %c0_i32_0, %c0_i32_1 : i32, i32, i32
  }
  func.func @transform_4(%arg0: i32) -> (i32, i32, i32) {
    %c0_i32 = arith.constant 0 : i32
    %c0_i32_0 = arith.constant 0 : i32
    %c0_i32_1 = arith.constant 0 : i32
    %c0_i32_2 = arith.constant 0 : i32
    return %c0_i32, %c0_i32_0, %c0_i32_1 : i32, i32, i32
  }
  func.func @transform_5(%arg0: i32) -> (i32, i32, i32) {
    %c0_i32 = arith.constant 0 : i32
    %c0_i32_0 = arith.constant 0 : i32
    %c0_i32_1 = arith.constant 0 : i32
    %c0_i32_2 = arith.constant 0 : i32
    return %c0_i32, %c0_i32_0, %c0_i32_1 : i32, i32, i32
  }
  func.func @transform_6(%arg0: i32) -> (i32, i32, i32) {
    %c0_i32 = arith.constant 0 : i32
    %c0_i32_0 = arith.constant 0 : i32
    %c0_i32_1 = arith.constant 0 : i32
    %c0_i32_2 = arith.constant 0 : i32
    return %c0_i32, %c0_i32_0, %c0_i32_1 : i32, i32, i32
  }
  func.func @transform_7(%arg0: i32) -> (i32, i32, i32) {
    %c0_i32 = arith.constant 0 : i32
    %c0_i32_0 = arith.constant 0 : i32
    %c0_i32_1 = arith.constant 0 : i32
    %c0_i32_2 = arith.constant 0 : i32
    return %c0_i32, %c0_i32_0, %c0_i32_1 : i32, i32, i32
  }
  func.func @transform_8(%arg0: i32) -> (i32, i32, i32) {
    %c0_i32 = arith.constant 0 : i32
    %c0_i32_0 = arith.constant 0 : i32
    %c0_i32_1 = arith.constant 0 : i32
    %c0_i32_2 = arith.constant 0 : i32
    return %c0_i32, %c0_i32_0, %c0_i32_1 : i32, i32, i32
  }
  func.func @transform_9(%arg0: i32) -> (i32, i32, i32) {
    %c0_i32 = arith.constant 0 : i32
    %c0_i32_0 = arith.constant 0 : i32
    %c0_i32_1 = arith.constant 0 : i32
    %c0_i32_2 = arith.constant 0 : i32
    return %c0_i32, %c0_i32_0, %c0_i32_1 : i32, i32, i32
  }
  func.func @transform_10(%arg0: i32) -> (i32, i32, i32) {
    %c0_i32 = arith.constant 0 : i32
    %c0_i32_0 = arith.constant 0 : i32
    %c0_i32_1 = arith.constant 0 : i32
    %c0_i32_2 = arith.constant 0 : i32
    return %c0_i32, %c0_i32_0, %c0_i32_1 : i32, i32, i32
  }
  func.func @transform_11(%arg0: i32) -> (i32, i32, i32) {
    %c0_i32 = arith.constant 0 : i32
    %c0_i32_0 = arith.constant 0 : i32
    %c0_i32_1 = arith.constant 0 : i32
    %c0_i32_2 = arith.constant 0 : i32
    return %c0_i32, %c0_i32_0, %c0_i32_1 : i32, i32, i32
  }
  func.func @transform_12(%arg0: i32) -> (i32, i32, i32) {
    %c0_i32 = arith.constant 0 : i32
    %c0_i32_0 = arith.constant 0 : i32
    %c0_i32_1 = arith.constant 0 : i32
    %c0_i32_2 = arith.constant 0 : i32
    return %c0_i32, %c0_i32_0, %c0_i32_1 : i32, i32, i32
  }
  func.func @transform_13(%arg0: i32) -> (i32, i32, i32) {
    %c0_i32 = arith.constant 0 : i32
    %c0_i32_0 = arith.constant 0 : i32
    %c0_i32_1 = arith.constant 0 : i32
    %c0_i32_2 = arith.constant 0 : i32
    return %c0_i32, %c0_i32_0, %c0_i32_1 : i32, i32, i32
  }
  func.func @transform_14(%arg0: i32) -> (i32, i32, i32) {
    %c0_i32 = arith.constant 0 : i32
    %c0_i32_0 = arith.constant 0 : i32
    %c0_i32_1 = arith.constant 0 : i32
    %c0_i32_2 = arith.constant 0 : i32
    return %c0_i32, %c0_i32_0, %c0_i32_1 : i32, i32, i32
  }
  func.func @transform_15(%arg0: i32) -> (i32, i32, i32) {
    %c0_i32 = arith.constant 0 : i32
    %c0_i32_0 = arith.constant 0 : i32
    %c0_i32_1 = arith.constant 0 : i32
    %c0_i32_2 = arith.constant 0 : i32
    return %c0_i32, %c0_i32_0, %c0_i32_1 : i32, i32, i32
  }
  func.func @transform_16(%arg0: i32) -> (i32, i32, i32) {
    %c0_i32 = arith.constant 0 : i32
    %c0_i32_0 = arith.constant 0 : i32
    %c0_i32_1 = arith.constant 0 : i32
    %c0_i32_2 = arith.constant 0 : i32
    return %c0_i32, %c0_i32_0, %c0_i32_1 : i32, i32, i32
  }
  func.func @transform_17(%arg0: i32) -> (i32, i32, i32) {
    %c0_i32 = arith.constant 0 : i32
    %c0_i32_0 = arith.constant 0 : i32
    %c0_i32_1 = arith.constant 0 : i32
    %c0_i32_2 = arith.constant 0 : i32
    return %c0_i32, %c0_i32_0, %c0_i32_1 : i32, i32, i32
  }
  func.func @transform_18(%arg0: i32) -> (i32, i32, i32) {
    %c0_i32 = arith.constant 0 : i32
    %c0_i32_0 = arith.constant 0 : i32
    %c0_i32_1 = arith.constant 0 : i32
    %c0_i32_2 = arith.constant 0 : i32
    return %c0_i32, %c0_i32_0, %c0_i32_1 : i32, i32, i32
  }
  func.func @transform_19(%arg0: i32) -> (i32, i32) {
    %c0_i32 = arith.constant 0 : i32
    %c0_i32_0 = arith.constant 0 : i32
    %c0_i32_1 = arith.constant 0 : i32
    return %c0_i32, %c0_i32_0 : i32, i32
  }
  func.func @transform_20(%arg0: i32) -> (i32, i32) {
    %c0_i32 = arith.constant 0 : i32
    %c0_i32_0 = arith.constant 0 : i32
    %c0_i32_1 = arith.constant 0 : i32
    return %c0_i32, %c0_i32_0 : i32, i32
  }
  func.func @transform_21(%arg0: i32) -> (i32, i32, i32) {
    %c0_i32 = arith.constant 0 : i32
    %c0_i32_0 = arith.constant 0 : i32
    %c0_i32_1 = arith.constant 0 : i32
    return %arg0, %c0_i32, %c0_i32_0 : i32, i32, i32
  }
}

</mosaic_0001>

<bundles_post_ra>
// kernel: decoder_forward.1
= control target key start
LH: loop header
LB: loop body
LE: loop exit
PB: predicated region body
PF: predicated region fallthrough
CT: control target
= control target key end

     0   :  { %s6814_s0 = inlined_call_operand.hbm [shape: f32[2,8,32], index: 0, kind: input, shape index: {}]   ;;  %s6815_s1 = inlined_call_operand.hbm [shape: f32[2,8,32], index: 1, kind: input, shape index: {}]   ;;  %s6816_s2 = inlined_call_operand.vmem [shape: f32[8,32], index: 2, kind: input, shape index: {}]   ;;  %s6817_s3 = inlined_call_operand.vmem [shape: bf16[2,32,96], index: 3, kind: input, shape index: {}]   ;;  %s6818_s4 = inlined_call_operand.vmem [shape: f32[2,1,96], index: 4, kind: input, shape index: {}]   ;;  %s6819_s5 = inlined_call_operand.vmem [shape: bf16[2,32,32], index: 5, kind: input, shape index: {}]   ;;  %s6820_s6 = inlined_call_operand.hbm [shape: f32[2,1,32], index: 6, kind: input, shape index: {}]   ;;  %s6821_s7 = inlined_call_operand.vmem [shape: bf16[2,32,32], index: 7, kind: input, shape index: {}]   ;;  %s6822_s8 = inlined_call_operand.hbm [shape: f32[2,1,32], index: 8, kind: input, shape index: {}]   ;;  %s6823_s9 = inlined_call_operand.vmem [shape: bf16[2,32,64], index: 9, kind: input, shape index: {}]   ;;  %s6824_s10 = inlined_call_operand.hbm [shape: f32[2,1,64], index: 10, kind: input, shape index: {}]   ;;  %s6825_s11 = inlined_call_operand.vmem [shape: bf16[2,32,32], index: 11, kind: input, shape index: {}]   ;;  %s6826_s12 = inlined_call_operand.hbm [shape: f32[2,1,32], index: 12, kind: input, shape index: {}]   ;;  %s6827_s13 = inlined_call_operand.hbm [shape: bf16[2,32,64], index: 13, kind: input, shape index: {}]   ;;  %s6828_s14 = inlined_call_operand.hbm [shape: f32[2,1,64], index: 14, kind: input, shape index: {}]   ;;  %s6829_s15 = inlined_call_operand.vmem [shape: bf16[2,64,32], index: 15, kind: input, shape index: {}]   ;;  %s6830_s16 = inlined_call_operand.hbm [shape: f32[2,1,32], index: 16, kind: input, shape index: {}]   ;;  %s6831_s17 = inlined_call_operand.vmem [shape: f32[2,3,32], index: 17, kind: input, shape index: {}]   ;;  %s6832_s18 = inlined_call_operand.vmem [shape: f32[2,3,32], index: 18, kind: input, shape index: {}]   ;;  %s6833_s19 = inlined_call_operand.hbm [shape: bf16[32,32], index: 19, kind: input, shape index: {}]   ;;  %s6834_s20 = inlined_call_operand.hbm [shape: f32[1,32], index: 20, kind: input, shape index: {}]   ;;  %s6835_s21 = inlined_call_operand.hbm [shape: f32[2,8,32], index: 21, kind: output, shape index: {}]  }
   0x1   :  { %6877 = sst [smem:[#allocation29_spill]] %s6814_s0 }
   0x2   :  { %6878 = sst [smem:[#allocation30_spill]] %s6815_s1 }
   0x3   :  { %6879 = sst [smem:[#allocation31_spill]] %s6816_s2 }
   0x4   :  { %6880 = sst [smem:[#allocation32_spill]] %s6817_s3 }
   0x5   :  { %6881 = sst [smem:[#allocation33_spill]] %s6818_s4 }
   0x6   :  { %6882 = sst [smem:[#allocation34_spill]] %s6819_s5 }
   0x7   :  { %6883 = sst [smem:[#allocation35_spill]] %s6820_s6 }
   0x8   :  { %6884 = sst [smem:[#allocation36_spill]] %s6821_s7 }
   0x9   :  { %6885 = sst [smem:[#allocation37_spill]] %s6822_s8 }
   0xa   :  { %6886 = sst [smem:[#allocation38_spill]] %s6823_s9 }
   0xb   :  { %6887 = sst [smem:[#allocation39_spill]] %s6824_s10 }
   0xc   :  { %6888 = sst [smem:[#allocation40_spill]] %s6825_s11 }
   0xd   :  { %6889 = sst [smem:[#allocation41_spill]] %s6826_s12 }
   0xe   :  { %6890 = sst [smem:[#allocation42_spill]] %s6827_s13 }
   0xf   :  { %6891 = sst [smem:[#allocation43_spill]] %s6828_s14 }
  0x10   :  { %6892 = sst [smem:[#allocation44_spill]] %s6829_s15 }
  0x11   :  { %6893 = sst [smem:[#allocation45_spill]] %s6830_s16 }
  0x12   :  { %6894 = sst [smem:[#allocation46_spill]] %s6831_s17 }
  0x13   :  { %6895 = sst [smem:[#allocation47_spill]] %s6832_s18 }
  0x14   :  { %6896 = sst [smem:[#allocation48_spill]] %s6833_s19 }
  0x15   :  { %6897 = sst [smem:[#allocation49_spill]] %s6834_s20 }
  0x16   :  { %6898 = sst [smem:[#allocation50_spill]] %s6835_s21 }
  0x17   :  { %26 = vsyncpa [#allocation3], 0 }
  0x18   :  { %28 = vsyncpa [#allocation3 + $0x1], 0 }
  0x19   :  { %29 = vsyncpa [#allocation6], 0 }
  0x1a   :  { %31 = vsyncpa [#allocation6 + $0x1], 0 }
  0x1b   :  { %32 = vsyncpa [#allocation9], 0 }
  0x1c   :  { %33 = vsyncpa [#allocation12], 0 }
  0x1d   :  { %34 = vsyncpa [#allocation15], 0 }
  0x1e   :  { %35 = vsyncpa [#allocation18], 0 }
  0x1f   :  { %36 = vsyncpa [#allocation4], 0 }
  0x20   :  { %38 = vsyncpa [#allocation4 + $0x1], 0  ;;  %s5807_s2 = smov 0   ;;  %s5809_s25 = smov 0  }
  0x21   :  { %s5811_s26 = smov 0   ;;  %s5813_s27 = smov 0  }
  0x22 LB: > { %s5668_s3 = smov [#allocation7]   ;;  %s5828_s29 = sadd.s32 4294967295, %s5666_s27   ;;  %s5666_s27 = sphi %s5813_s27, %s6962_s27   ;;  %s5662_s26 = sphi %s5811_s26, %s6961_s26   ;;  %s5658_s25 = sphi %s5809_s25, %s6960_s25   ;;  %s5654_s2 = sphi %s5807_s2, %s6959_s2  }
  0x23   : > { %s550_s28 = sshll.u32 %s5668_s3, 4  ;;  %p4383_p0 = scmp.ge.s32.totalorder %s5666_s27, 1  ;;  %s5833_s28 = int_to_ptr.vmem [resolvable:$true] %s550_s28 }
  0x24   : > { %p6848_p1 = scmp.eq.s32.totalorder %s5828_s29, 0  ;;  %p526_p2 = scmp.lt.s32.totalorder %s5666_s27, 3 }
  0x25   : > { %s5669_s4 = smov [#allocation8]   ;;  %s5670_s22 = smov [#allocation11]  }
  0x26   : > { %p5835_p3 = pnand %p4383_p0, %p526_p2  ;;  %s566_s30 = sshll.u32 %s5669_s4, 4  ;;  %s5848_s30 = int_to_ptr.vmem [resolvable:$true] %s566_s30 }
  0x27   : > { %s598_s23 = sshll.u32 %s5670_s22, 4  ;;  %s6901_s6 = sld [smem:[#allocation35_spill]]  ;;  %s5850_s23 = int_to_ptr.vmem [resolvable:$true] %s598_s23 }
  0x28   : > { %s6899_s0 = scalar_select %p5835_p3, 1, 0 }
  0x29   : > { %p5105_p5 = pneg %p5835_p3 }
  0x2b   : > { %p5844_p6 = pnand %p5105_p5, %p6848_p1 }
  0x2d   : > { %s5264_s3 = scalar_lea.hbm %s6901_s6, 32  ;;  %p5860_p8 = pneg %p5844_p6 }
  0x2e   : > { %p5265_p7 = scmp.ne.s32.totalorder %s6901_s6, %s5264_s3  ;;  %p5271_p11 = scmp.lt.u32.totalorder %s5264_s3, %s6901_s6 }
  0x30   : > { %p5267_p9 = pnand %p5860_p8, %p5265_p7 }
  0x32   : > { %p5268_p10 = pneg %p5267_p9 }
  0x34   : > { %p5273_p12 = pnand %p5271_p11, %p5268_p10 }
  0x36   : > { %5276 = shalt.err (!%p5273_p12)
}
  0x37   : > { %s5277_s15 = scalar_lea.vmem %s5833_s28, 32  ;;  %p5285_p5 = scmp.lt.s32.totalorder %s5833_s28, %s5833_s28 }
  0x38   : > { %p5278_p13 = scmp.ne.s32.totalorder %s5833_s28, %s5277_s15  ;;  %p5286_p4 = scmp.lt.s32.totalorder %s5277_s15, %s5277_s15 }
  0x3a   : > { %p5280_p0 = pnand %p5278_p13, %p5860_p8  ;;  %p5287_p7 = por %p5286_p4, %p5285_p5 }
  0x3c   : > { %p5281_p2 = pneg %p5280_p0 }
  0x3e   : > { %p5288_p9 = pnand %p5287_p7, %p5281_p2 }
  0x40   : > { %5291 = shalt.err (!%p5288_p9)
}
  0x41   : > { %s6850_s21 = smov 16   ;;  %s6854_s11 = smov 1  }
  0x42   : > { %5108 = dma.hbm_to_vmem [thread:$0]  (!%p5844_p6), %s6901_s6, 32, %s5833_s28, [#allocation6], %s6850_s21, %s6850_s21, %s6854_s11  }
  0x43   : > { %s6903_s8 = sld [smem:[#allocation37_spill]] }
  0x49   : > { %s5292_s15 = scalar_lea.hbm %s6903_s8, 32 }
  0x4a   : > { %p5293_p4 = scmp.ne.s32.totalorder %s6903_s8, %s5292_s15  ;;  %p5299_p12 = scmp.lt.u32.totalorder %s5292_s15, %s6903_s8 }
  0x4c   : > { %p5295_p10 = pnand %p5293_p4, %p5860_p8 }
  0x4e   : > { %p5296_p11 = pneg %p5295_p10 }
  0x50   : > { %p5301_p13 = pnand %p5299_p12, %p5296_p11 }
  0x52   : > { %5304 = shalt.err (!%p5301_p13)
}
  0x53   : > { %s5305_s28 = scalar_lea.vmem %s5848_s30, 32  ;;  %p5313_p7 = scmp.lt.s32.totalorder %s5848_s30, %s5848_s30 }
  0x54   : > { %p5306_p0 = scmp.ne.s32.totalorder %s5848_s30, %s5305_s28  ;;  %p5314_p9 = scmp.lt.s32.totalorder %s5305_s28, %s5305_s28 }
  0x56   : > { %p5308_p2 = pnand %p5306_p0, %p5860_p8  ;;  %p5315_p4 = por %p5314_p9, %p5313_p7 }
  0x58   : > { %p5309_p5 = pneg %p5308_p2 }
  0x5a   : > { %p5316_p10 = pnand %p5315_p4, %p5309_p5 }
  0x5c   : > { %5319 = shalt.err (!%p5316_p10)
}
  0x5d   : > { %5111 = dma.hbm_to_vmem [thread:$0]  (!%p5844_p6), %s6903_s8, 32, %s5848_s30, [#allocation9], %s6850_s21, %s6850_s21, %s6854_s11  }
  0x5e   : > { %s6904_s12 = sld [smem:[#allocation41_spill]] }
  0x64   : > { %s5320_s1 = scalar_lea.hbm %s6904_s12, 32 }
  0x65   : > { %p5321_p11 = scmp.ne.s32.totalorder %s6904_s12, %s5320_s1  ;;  %p5327_p0 = scmp.lt.u32.totalorder %s5320_s1, %s6904_s12 }
  0x67   : > { %p5323_p12 = pnand %p5321_p11, %p5860_p8 }
  0x69   : > { %p5324_p13 = pneg %p5323_p12 }
  0x6b   : > { %p5329_p2 = pnand %p5327_p0, %p5324_p13 }
  0x6d   : > { %5332 = shalt.err (!%p5329_p2)
}
  0x6e   : > { %s5333_s30 = scalar_lea.vmem %s5850_s23, 32  ;;  %p5341_p4 = scmp.lt.s32.totalorder %s5850_s23, %s5850_s23 }
  0x6f   : > { %p5334_p5 = scmp.ne.s32.totalorder %s5850_s23, %s5333_s30  ;;  %p5342_p10 = scmp.lt.s32.totalorder %s5333_s30, %s5333_s30 }
  0x71   : > { %p5336_p7 = pnand %p5334_p5, %p5860_p8  ;;  %p5343_p11 = por %p5342_p10, %p5341_p4 }
  0x73   : > { %p5337_p9 = pneg %p5336_p7 }
  0x75   : > { %p5344_p12 = pnand %p5343_p11, %p5337_p9 }
  0x77   : > { %5347 = shalt.err (!%p5344_p12)
}
  0x78   : > { %5117 = dma.hbm_to_vmem [thread:$0]  (!%p5844_p6), %s6904_s12, 32, %s5850_s23, [#allocation12], %s6850_s21, %s6850_s21, %s6854_s11  }
  0x79   : > { %s5673_s9 = smov [#allocation14]   ;;  %s6905_s14 = sld [smem:[#allocation43_spill]] }
  0x7a   : > { %s624_s17 = sshll.u32 %s5673_s9, 4  ;;  %s625_s17 = int_to_ptr.vmem [resolvable:$true] %s624_s17 }
  0x7f   : > { %s5348_s24 = scalar_lea.hbm %s6905_s14, 32 }
  0x80   : > { %p5349_p13 = scmp.ne.s32.totalorder %s6905_s14, %s5348_s24  ;;  %p5355_p5 = scmp.lt.u32.totalorder %s5348_s24, %s6905_s14 }
  0x82   : > { %p5351_p0 = pnand %p5349_p13, %p5860_p8 }
  0x84   : > { %p5352_p2 = pneg %p5351_p0 }
  0x86   : > { %p5357_p7 = pnand %p5355_p5, %p5352_p2 }
  0x88   : > { %5360 = shalt.err (!%p5357_p7)
}
  0x89   : > { %s5361_s23 = scalar_lea.vmem %s625_s17, 32  ;;  %p5369_p11 = scmp.lt.s32.totalorder %s625_s17, %s625_s17 }
  0x8a   : > { %p5362_p9 = scmp.ne.s32.totalorder %s625_s17, %s5361_s23  ;;  %p5370_p12 = scmp.lt.s32.totalorder %s5361_s23, %s5361_s23 }
  0x8c   : > { %p5364_p4 = pnand %p5362_p9, %p5860_p8  ;;  %p5371_p1 = por %p5370_p12, %p5369_p11 }
  0x8e   : > { %p5365_p10 = pneg %p5364_p4 }
  0x90   : > { %p5372_p3 = pnand %p5371_p1, %p5365_p10 }
  0x92   : > { %5375 = shalt.err (!%p5372_p3)
}
  0x93   : > { %5123 = dma.hbm_to_vmem [thread:$0]  (!%p5844_p6), %s6905_s14, 32, %s625_s17, [#allocation15], %s6850_s21, %s6850_s21, %s6854_s11  }
  0x94   : > { %s5674_s9 = smov [#allocation17]   ;;  %s5675_s1 = smov [#allocation10]  }
  0x95   : > { %s659_s18 = sshll.u32 %s5674_s9, 4  ;;  %s582_s24 = sshll.u32 %s5675_s1, 4  ;;  %s660_s18 = int_to_ptr.vmem [resolvable:$true] %s659_s18  ;;  %s5957_s24 = int_to_ptr.vmem [resolvable:$true] %s582_s24 }
  0x96   : > { %s6906_s19 = sld [smem:[#allocation48_spill]] }
  0x9c   : > { %s5376_s15 = scalar_lea.hbm %s6906_s19, 256 }
  0x9d   : > { %p5377_p1 = scmp.ne.s32.totalorder %s6906_s19, %s5376_s15  ;;  %p5383_p0 = scmp.lt.u32.totalorder %s5376_s15, %s6906_s19 }
  0x9f   : > { %p5379_p3 = pnand %p5377_p1, %p5860_p8 }
  0xa1   : > { %p5380_p13 = pneg %p5379_p3 }
  0xa3   : > { %p5385_p2 = pnand %p5383_p0, %p5380_p13 }
  0xa5   : > { %5388 = shalt.err (!%p5385_p2)
}
  0xa6   : > { %s5389_s7 = scalar_lea.vmem %s660_s18, 256  ;;  %p5397_p4 = scmp.lt.s32.totalorder %s660_s18, %s660_s18 }
  0xa7   : > { %p5390_p5 = scmp.ne.s32.totalorder %s660_s18, %s5389_s7  ;;  %p5398_p10 = scmp.lt.s32.totalorder %s5389_s7, %s5389_s7 }
  0xa9   : > { %p5392_p7 = pnand %p5390_p5, %p5860_p8  ;;  %p5399_p11 = por %p5398_p10, %p5397_p4 }
  0xab   : > { %p5393_p9 = pneg %p5392_p7 }
  0xad   : > { %p5400_p12 = pnand %p5399_p11, %p5393_p9 }
  0xaf   : > { %5403 = shalt.err (!%p5400_p12)
}
  0xb0   : > { %s6852_s9 = smov 64   ;;  %s6853_s1 = smov 4  }
  0xb1   : > { %5129 = dma.hbm_to_vmem [thread:$0]  (!%p5844_p6), %s6906_s19, 256, %s660_s18, [#allocation18], %s6852_s9, %s6852_s9, %s6853_s1  }
  0xb2   : > { %s6907_s10 = sld [smem:[#allocation39_spill]] }
  0xb8   : > { %s5404_s23 = scalar_lea.hbm %s6907_s10, 32 }
  0xb9   : > { %p5405_p1 = scmp.ne.s32.totalorder %s6907_s10, %s5404_s23  ;;  %p5411_p0 = scmp.lt.u32.totalorder %s5404_s23, %s6907_s10 }
  0xbb   : > { %p5407_p3 = pnand %p5405_p1, %p5860_p8 }
  0xbd   : > { %p5408_p13 = pneg %p5407_p3 }
  0xbf   : > { %p5413_p2 = pnand %p5411_p0, %p5408_p13 }
  0xc1   : > { %5416 = shalt.err (!%p5413_p2)
}
  0xc2   : > { %s5417_s18 = scalar_lea.vmem %s5957_s24, 32  ;;  %p5425_p4 = scmp.lt.s32.totalorder %s5957_s24, %s5957_s24 }
  0xc3   : > { %p5418_p5 = scmp.ne.s32.totalorder %s5957_s24, %s5417_s18  ;;  %p5426_p10 = scmp.lt.s32.totalorder %s5417_s18, %s5417_s18 }
  0xc5   : > { %p5420_p7 = pnand %p5418_p5, %p5860_p8  ;;  %p5427_p11 = por %p5426_p10, %p5425_p4 }
  0xc7   : > { %p5421_p9 = pneg %p5420_p7 }
  0xc9   : > { %p5428_p12 = pnand %p5427_p11, %p5421_p9 }
  0xcb   : > { %5431 = shalt.err (!%p5428_p12)
}
  0xcc   : > { %s6908_s21 = smov 16   ;;  %s5678_s15 = smov [#allocation13]  }
  0xcd   : > { %5114 = dma.hbm_to_vmem [thread:$0]  (!%p5844_p6), %s6907_s10, 32, %s5957_s24, [#allocation9], %s6908_s21, %s6908_s21, %s6854_s11  }
  0xce   : > { %s611_s30 = sshll.u32 %s5678_s15, 4  ;;  %s5679_s23 = smov [#allocation16]   ;;  %s612_s30 = int_to_ptr.vmem [resolvable:$true] %s611_s30 }
  0xcf   : > { %s640_s28 = sshll.u32 %s5679_s23, 4  ;;  %s6909_s13 = sld [smem:[#allocation42_spill]]  ;;  %s6006_s28 = int_to_ptr.vmem [resolvable:$true] %s640_s28 }
  0xd5   : > { %s5432_s18 = scalar_lea.hbm %s6909_s13, 512 }
  0xd6   : > { %p5433_p1 = scmp.ne.s32.totalorder %s6909_s13, %s5432_s18  ;;  %p5439_p0 = scmp.lt.u32.totalorder %s5432_s18, %s6909_s13 }
  0xd8   : > { %p5435_p3 = pnand %p5433_p1, %p5860_p8 }
  0xda   : > { %p5436_p13 = pneg %p5435_p3 }
  0xdc   : > { %p5441_p2 = pnand %p5439_p0, %p5436_p13 }
  0xde   : > { %5444 = shalt.err (!%p5441_p2)
}
  0xdf   : > { %s5445_s22 = scalar_lea.vmem %s612_s30, 512  ;;  %p5453_p4 = scmp.lt.s32.totalorder %s612_s30, %s612_s30 }
  0xe0   : > { %p5446_p5 = scmp.ne.s32.totalorder %s612_s30, %s5445_s22  ;;  %p5454_p10 = scmp.lt.s32.totalorder %s5445_s22, %s5445_s22 }
  0xe2   : > { %p5448_p7 = pnand %p5446_p5, %p5860_p8  ;;  %p5455_p11 = por %p5454_p10, %p5453_p4 }
  0xe4   : > { %p5449_p9 = pneg %p5448_p7 }
  0xe6   : > { %p5456_p12 = pnand %p5455_p11, %p5449_p9 }
  0xe8   : > { %5459 = shalt.err (!%p5456_p12)
}
  0xe9   : > { %s6910_s9 = smov 4   ;;  %s6911_s1 = smov 64  }
  0xea   : > { %5120 = dma.hbm_to_vmem [thread:$0]  (!%p5844_p6), %s6909_s13, 512, %s612_s30, [#allocation12], %s6911_s1, %s6911_s1, %s6910_s9  }
  0xeb   : > { %s6912_s16 = sld [smem:[#allocation45_spill]] }
  0xf1   : > { %s5460_s18 = scalar_lea.hbm %s6912_s16, 32 }
  0xf2   : > { %p5461_p1 = scmp.ne.s32.totalorder %s6912_s16, %s5460_s18  ;;  %p5467_p0 = scmp.lt.u32.totalorder %s5460_s18, %s6912_s16 }
  0xf4   : > { %p5463_p3 = pnand %p5461_p1, %p5860_p8 }
  0xf6   : > { %p5464_p13 = pneg %p5463_p3 }
  0xf8   : > { %p5469_p2 = pnand %p5467_p0, %p5464_p13 }
  0xfa   : > { %5472 = shalt.err (!%p5469_p2)
}
  0xfb   : > { %s5473_s30 = scalar_lea.vmem %s6006_s28, 32  ;;  %p5481_p4 = scmp.lt.s32.totalorder %s6006_s28, %s6006_s28 }
  0xfc   : > { %p5474_p5 = scmp.ne.s32.totalorder %s6006_s28, %s5473_s30  ;;  %p5482_p10 = scmp.lt.s32.totalorder %s5473_s30, %s5473_s30 }
  0xfe   : > { %p5476_p7 = pnand %p5474_p5, %p5860_p8  ;;  %p5483_p11 = por %p5482_p10, %p5481_p4 }
 0x100   : > { %p5477_p9 = pneg %p5476_p7 }
 0x102   : > { %p5484_p12 = pnand %p5483_p11, %p5477_p9 }
 0x104   : > { %5487 = shalt.err (!%p5484_p12)
}
 0x105   : > { %s6913_s11 = smov 1   ;;  %s5680_s15 = smov [#allocation19]  }
 0x106   : > { %5126 = dma.hbm_to_vmem [thread:$0]  (!%p5844_p6), %s6912_s16, 32, %s6006_s28, [#allocation15], %s6908_s21, %s6908_s21, %s6913_s11  }
 0x107   : > { %s673_s23 = sshll.u32 %s5680_s15, 4  ;;  %s6914_s20 = sld [smem:[#allocation49_spill]]  ;;  %s674_s23 = int_to_ptr.vmem [resolvable:$true] %s673_s23 }
 0x10d   : > { %s5488_s18 = scalar_lea.hbm %s6914_s20, 16 }
 0x10e   : > { %p5489_p1 = scmp.ne.s32.totalorder %s6914_s20, %s5488_s18  ;;  %p5495_p0 = scmp.lt.u32.totalorder %s5488_s18, %s6914_s20 }
 0x110   : > { %p5491_p3 = pnand %p5489_p1, %p5860_p8 }
 0x112   : > { %p5492_p13 = pneg %p5491_p3 }
 0x114   : > { %p5497_p2 = pnand %p5495_p0, %p5492_p13 }
 0x116   : > { %5500 = shalt.err (!%p5497_p2)
}
 0x117   : > { %s5501_s21 = scalar_lea.vmem %s674_s23, 16  ;;  %s5508_s28 = scalar_lea.vmem %s674_s23, 32 }
 0x118   : > { %p5502_p5 = scmp.ne.s32.totalorder %s674_s23, %s5501_s21  ;;  %p5509_p4 = scmp.lt.s32.totalorder %s674_s23, %s674_s23 }
 0x119   : > { %p5510_p10 = scmp.lt.s32.totalorder %s5508_s28, %s5501_s21 }
 0x11a   : > { %p5504_p7 = pnand %p5502_p5, %p5860_p8 }
 0x11b   : > { %p5511_p11 = por %p5510_p10, %p5509_p4 }
 0x11c   : > { %p5505_p9 = pneg %p5504_p7 }
 0x11e   : > { %p5512_p12 = pnand %p5511_p11, %p5505_p9 }
 0x120   : > { %5515 = shalt.err (!%p5512_p12)
}
 0x121   : > { %5132 = dma.hbm_to_vmem [thread:$0]  (!%p5844_p6), %s6914_s20, 16, %s674_s23, [#allocation18]  }
 0x122   : > { %s4382_s4 = sadd.s32 4294967294, %s5666_s27   ;;  %s6075_s5 = sadd.s32 1, %s5666_s27  }
 0x123   : > { %s51_s1 = sadd.s32 1, %s5662_s26  ;;  %s48_s15 = ssub.s32 %s5666_s27, %s6075_s5 }
 0x124   : > { %p58_p8 = scmp.ne.s32.totalorder %s5662_s26, %s5658_s25  ;;  %p49_p1 = scmp.eq.s32.totalorder %s48_s15, 0 }
 0x125   : > { %p59_p3 = scmp.eq.s32.totalorder %s5666_s27, 0  ;;  %p64_p13 = scmp.ne.s32.totalorder %s5658_s25, %s5654_s2 }
 0x126   : > { %p513_p0 = scmp.eq.s32.totalorder %s5828_s29, 1  ;;  %p6915_p5 = scmp.eq.s32.totalorder %s5828_s29, 0 }
 0x127   : > { %s6087_s17 = scalar_select %p49_p1, %s5662_s26, %s51_s1  }
 0x128   : > { %p60_p2 = por %p59_p3, %p58_p8  ;;  %p6091_p7 = por %p6915_p5, %p64_p13 }
 0x129   : > { %p6095_p6 = por %p513_p0, %p58_p8  ;;  %p519_p9 = scmp.eq.s32.totalorder %s4382_s4, 1 }
 0x12a   : > { %s6916_s7 = scalar_select %p6091_p7, 1, 0 }
 0x12b   : > { %s6917_s23 = scalar_select %p6095_p6, 1, 0 }
 0x12c   : > { %p5153_p4 = scmp.lt.s32.totalorder %s5666_s27, 2  ;;  %s684_s18 = sand.u32 1, %s5662_s26  }
 0x12d   : > { %p6101_p10 = por %p519_p9, %p64_p13  ;;  %s6105_s24 = sshll.u32 %s684_s18, 3 }
 0x12e   : > { %s4395_s22 = sshll.u32 %s5666_s27, 7  ;;  %s6919_s28 = sld [smem:[#allocation29_spill]] }
 0x12f   : > { %s6918_s3 = scalar_select %p6101_p10, 1, 0 }
 0x130   : > { %s688_s9 = scalar_lea.vmem [#allocation2], %s6105_s24  ;;  %p6114_p11 = pnand %p5153_p4, %p60_p2 }
 0x131   : > { %s695_s4 = sshll.u32 %s688_s9, 4  ;;  %s6921_s8 = sld [smem:[#allocation30_spill]]  ;;  %s6118_s4 = int_to_ptr.vmem [resolvable:$true] %s695_s4 }
 0x132   : > { %s685_s21 = scalar_lea.sflag [#allocation3], %s684_s18  ;;  %p5518_p8 = pneg %p6114_p11 }
 0x134   : > { %s6111_s11 = scalar_lea.hbm %s6919_s28, %s4395_s22  ;;  %s5521_s13 = scalar_lea.hbm %s6919_s28, 256 }
 0x135   : > { %s5516_s10 = scalar_lea.hbm %s6111_s11, 128  ;;  %p5522_p13 = scmp.lt.u32.totalorder %s6111_s11, %s6919_s28 }
 0x136   : > { %p5517_p12 = scmp.ne.s32.totalorder %s6111_s11, %s5516_s10  ;;  %p5523_p0 = scmp.lt.u32.totalorder %s5521_s13, %s5516_s10 }
 0x137   : > { %s6123_s30 = scalar_lea.hbm %s6921_s8, %s4395_s22  ;;  %p5525_p5 = scmp.lt.u32.totalorder %s5516_s10, %s6111_s11 }
 0x138   : > { %p5519_p1 = pnand %p5518_p8, %p5517_p12  ;;  %p5524_p2 = por %p5523_p0, %p5522_p13 }
 0x13a   : > { %p5520_p3 = pneg %p5519_p1  ;;  %p5526_p9 = por %p5525_p5, %p5524_p2 }
 0x13c   : > { %p5527_p4 = pnand %p5526_p9, %p5520_p3 }
 0x13e   : > { %5530 = shalt.err (!%p5527_p4)
}
 0x13f   : > { %s5531_s6 = scalar_lea.vmem %s6118_s4, 128  ;;  %s5681_s12 = smov [#allocation2]  }
 0x140   : > { %p5532_p12 = scmp.ne.s32.totalorder %s6118_s4, %s5531_s6  ;;  %s5536_s18 = sshll.u32 %s5681_s12, 4  ;;  %s5537_s18 = int_to_ptr.vmem [resolvable:$false] %s5536_s18 }
 0x141   : > { %s5538_s14 = scalar_lea.vmem %s5537_s18, 256  ;;  %p5539_p6 = scmp.lt.s32.totalorder %s6118_s4, %s5537_s18 }
 0x142   : > { %p5534_p1 = pnand %p5532_p12, %p5518_p8  ;;  %p5540_p13 = scmp.lt.s32.totalorder %s5538_s14, %s5531_s6 }
 0x144   : > { %p5535_p10 = pneg %p5534_p1  ;;  %p5541_p0 = por %p5540_p13, %p5539_p6 }
 0x146   : > { %p5542_p2 = pnand %p5541_p0, %p5535_p10 }
 0x148   : > { %5545 = shalt.err (!%p5542_p2)
}
 0x149   : > { %5136 = dma.hbm_to_vmem [thread:$0]  (!%p6114_p11), %s6111_s11, 128, %s6118_s4, %s685_s21  }
 0x14a   : > { %s702_s10 = sand.u32 1, %s5666_s27   ;;  %s706_s13 = scalar_lea.vmem [#allocation5], %s6105_s24 }
 0x14b   : > { %s713_s16 = sshll.u32 %s706_s13, 4  ;;  %s703_s22 = scalar_lea.sflag [#allocation6], %s702_s10  ;;  %s714_s16 = int_to_ptr.vmem [resolvable:$true] %s713_s16 }
 0x14c   : > { %s5546_s15 = scalar_lea.hbm %s6123_s30, 128  ;;  %s5551_s12 = scalar_lea.hbm %s6921_s8, 256 }
 0x14d   : > { %p5547_p6 = scmp.ne.s32.totalorder %s6123_s30, %s5546_s15  ;;  %p5552_p5 = scmp.lt.u32.totalorder %s6123_s30, %s6921_s8 }
 0x14e   : > { %p5553_p9 = scmp.lt.u32.totalorder %s5551_s12, %s5546_s15  ;;  %p5555_p12 = scmp.lt.u32.totalorder %s5546_s15, %s6123_s30 }
 0x14f   : > { %p5549_p10 = pnand %p5547_p6, %p5518_p8 }
 0x150   : > { %p5554_p4 = por %p5553_p9, %p5552_p5 }
 0x151   : > { %p5550_p3 = pneg %p5549_p10 }
 0x152   : > { %p5556_p1 = por %p5555_p12, %p5554_p4 }
 0x154   : > { %p5557_p13 = pnand %p5556_p1, %p5550_p3 }
 0x156   : > { %5560 = shalt.err (!%p5557_p13)
}
 0x157   : > { %s5561_s24 = scalar_lea.vmem %s714_s16, 128  ;;  %s5682_s11 = smov [#allocation5]  }
 0x158   : > { %p5562_p0 = scmp.ne.s32.totalorder %s714_s16, %s5561_s24  ;;  %s5566_s4 = sshll.u32 %s5682_s11, 4  ;;  %s5567_s4 = int_to_ptr.vmem [resolvable:$false] %s5566_s4 }
 0x159   : > { %s5568_s21 = scalar_lea.vmem %s5567_s4, 256  ;;  %p5569_p10 = scmp.lt.s32.totalorder %s714_s16, %s5567_s4 }
 0x15a   : > { %p5564_p2 = pnand %p5562_p0, %p5518_p8  ;;  %p5570_p7 = scmp.lt.s32.totalorder %s5568_s21, %s5561_s24 }
 0x15c   : > { %p5565_p6 = pneg %p5564_p2  ;;  %p5571_p5 = por %p5570_p7, %p5569_p10 }
 0x15e   : > { %p5572_p9 = pnand %p5571_p5, %p5565_p6 }
 0x160   : > { %5575 = shalt.err (!%p5572_p9)
}
 0x161   : > { %5139 = dma.hbm_to_vmem [thread:$0]  (!%p6114_p11), %s6123_s30, 128, %s714_s16, %s703_s22  }
 0x162   : > { %p6922_p3 = scmp.ne.s32.totalorder %s6899_s0, 0 }
 0x163   : > { %s6174_s10 = sand.u32 (!%p6922_p3), 1, %s5658_s25   ;;  %p6923_p7 = scmp.ne.s32.totalorder (!%p6922_p3), %s6916_s7, 0 }
 0x164   : > { %722 = sbr.rel (%p6922_p3) target bundleno = 10273 (0x2821), region = 104  ;;  %s6177_s13 = sshll.u32 (!%p6922_p3), %s6174_s10, 3 }
 0x165   : > { %s725_s15 = scalar_lea.sflag (!%p6922_p3), [#allocation3], %s6174_s10  ;;  %s728_s9 = scalar_lea.vmem (!%p6922_p3), [#allocation2], %s6177_s13 }
 0x16b   : > { %5621 = dma.done.wait (%p6923_p7), %s725_s15, 128  }
 0x16c   : > { %5623 = vsyncadd (%p6923_p7), %s725_s15, 4294967168  ;;  %s733_s0 = sand.u32 1, %s5828_s29   ;;  %s737_s30 = scalar_lea.vmem [#allocation5], %s6177_s13 }
 0x16d   : > { %s734_s1 = scalar_lea.sflag [#allocation6], %s733_s0 }
 0x16e   : > { %5625 = dma.done.wait (%p6923_p7), %s734_s1, 128  }
 0x16f   : > { %5627 = vsyncadd (%p6923_p7), %s734_s1, 4294967168  ;;  %p6924_p11 = scmp.eq.s32.totalorder %s5828_s29, 0 }
 0x171   : > { %5629 = dma.done.wait (%p6924_p11), [#allocation6], 32   ;;  %p6925_p8 = pmov %p6924_p11 }
 0x173   : > { %5631 = vsyncadd (%p6925_p8), [#allocation6], 4294967264  ;;  %p6926_p4 = pmov %p6925_p8 }
 0x175   : > { %5633 = dma.done.wait (%p6926_p4), [#allocation9], 64   ;;  %p6927_p12 = pmov %p6926_p4 }
 0x176   : > { %p6928_p1 = pmov %p6926_p4 }
 0x177   : > { %5635 = vsyncadd (%p6927_p12), [#allocation9], 4294967232 }
 0x178   : > { %5637 = dma.done.wait (%p6928_p1), [#allocation12], 544   ;;  %p6929_p13 = pmov %p6928_p1 }
 0x179   : > { %p6930_p0 = pmov %p6928_p1 }
 0x17a   : > { %5639 = vsyncadd (%p6929_p13), [#allocation12], 4294966752 }
 0x17b   : > { %5641 = dma.done.wait (%p6930_p0), [#allocation15], 64   ;;  %p6931_p2 = pmov %p6930_p0 }
 0x17c   : > { %p6932_p6 = pmov %p6930_p0 }
 0x17d   : > { %5643 = vsyncadd (%p6931_p2), [#allocation15], 4294967232 }
 0x17e   : > { %5645 = dma.done.wait (%p6932_p6), [#allocation18], 272   ;;  %p6933_p10 = pmov %p6930_p0 }
 0x17f   : > { %v5683_v0 = vmov 0.0   ;;  %vm5684_vm0 = vmmov 0   ;;  %s6934_s22 = sld [smem:[#allocation32_spill]]  ;;  %v838_v3 = vld [vmem:[%s728_s9] sm:$0xff]  ;;  %s6935_s24 = sld [smem:[#allocation31_spill]]  ;;  %vm869_vm1 = vcmask 261120  }
 0x180   : > { %5647 = vsyncadd (%p6933_p10), [#allocation18], 4294967024  ;;  %4679 = vmatprep.subr.bf16.mxu0 %v5683_v0  ;;  %4683 = vmatprep.mubr.msk.bf16.mxu0 %vm5684_vm0, %v5683_v0  ;;  %s6936_s21 = sld [smem:[#allocation33_spill]]  ;;  %s6871_s15 = smov 96   ;;  %vm924_vm2 = vcmask 64512   ;;  %vm977_vm3 = vcmask 1043456  }
 0x181   : > { %4687 = vmatprep.subr.bf16.mxu1 %v5683_v0  ;;  %4689 = vmatprep.mubr.msk.bf16.mxu1 %vm5684_vm0, %v5683_v0  ;;  %s6869_s9 = smov 120   ;;  %s6874_s0 = smov 88   ;;  %vm2405_vm4 = vcmask 523264  }
 0x182   : > { %s6860_s1 = smov 64   ;;  %s6859_s7 = smov 56  }
 0x183   : > { %s6861_s16 = smov 80   ;;  %s6867_s6 = smov 112  }
 0x184   : > { %s6858_s12 = smov 48   ;;  %s6863_s18 = smov 72  }
 0x185   : > { %v5222_v1 = vld [vmem:[%s6934_s22] sm:$0xff]   ;;  %v5223_v2 = vld [vmem:[%s6934_s22 + $0x8] sm:$0xff]   ;;  %s6865_s14 = smov 104   ;;  %s6938_s11 = sld [smem:[#allocation38_spill]] }
 0x186   : > { %4680 = vmatpush3.bf16.msra.mxu0 %v5222_v1  ;;  %v839_v4 = vld [vmem:[%s6935_s24] sm:$0xff]  ;;  %s6857_s24 = smov 40   ;;  %s6947_s4 = smov 64  }
 0x187   : > { %4681 = vmatprep.subr.bf16.mxu0 %v5683_v0  ;;  %v6227_v5 = vadd.f32 %v839_v4, %v838_v3  ;;  %v4411_v7 = vld [vmem:[%s6936_s21] ss:$0 sm:$0xff]  ;;  %s6948_s8 = smov 120   ;;  %s6951_s19 = smov 112  }
 0x188   : > { %s6952_s20 = smov 104   ;;  %p6956_p9 = scmp.ne.s32.totalorder %s6917_s23, 0 }
 0x189   : > { %v849_v6 = vpack.c.bf16 %v6227_v5, %v6227_v5 }
 0x18a   : > { %4682 = vmatpush3.bf16.msra.mxu0 %v5223_v2 }
 0x18b   : > { %4693 = vmatprep.subr.bf16.mxu0 %v5683_v0 }
 0x18d   : > { %4684 = vmatmul.mubr.msk.bf16.vlgmr.msra.gmra.mrb[0].mxu0 %vm869_vm1, %v849_v6 }
 0x18e   : > { %4695 = vmatprep.mubr.msk.bf16.mxu0 %vm5684_vm0, %v5683_v0 }
 0x260   : > { %v907_v8 = vpop.f32.mrb[0].mxu0 }
 0x261   : > { %v908_v9 = vadd.f32 %v4411_v7, %v907_v8  ;;  %v4685_v10 = vpop.f32.mrb[1].mxu0 }
 0x262   : > { %v910_v11 = vpop.f32.mrb[2].mxu0 }
 0x263   : > { %v918_v12 = vmul.f32 0.35355338, %v908_v9  ;;  %v920_v13 = vpack.c.bf16 %v908_v9, %v908_v9  ;;  %v4686_v14 = vpop.f32.mrb[3].mxu0 }
 0x265   : > { %v919_v15 = vpack.c.bf16 %v918_v12, %v918_v12  ;;  %922 = vrot.lane.b32.xlu0 %v920_v13, %s6871_s15 }
 0x267   : > { %1023 = vrot.lane.b32.xlu1 %v919_v15, %s6869_s9 }
 0x269   : > { %1025 = vrot.lane.b32.xlu0 %v920_v13, %s6874_s0 }
 0x26b   : > { %972 = vrot.lane.b32.xlu1 %v920_v13, %s6860_s1  ;;  %s6945_s1 = sld [smem:[#allocation44_spill]] }
 0x26d   : > { %1074 = vrot.lane.b32.xlu0 %v920_v13, %s6859_s7  ;;  %s6940_s7 = sld [smem:[#allocation46_spill]] }
 0x26f   : > { %1217 = vrot.lane.b32.xlu1 %v920_v13, %s6861_s16  ;;  %s6943_s16 = smov 80  }
 0x271   : > { %1215 = vrot.lane.b32.xlu0 %v919_v15, %s6867_s6 }
 0x273   : > { %1266 = vrot.lane.b32.xlu1 %v920_v13, %s6858_s12  ;;  %s6939_s12 = sld [smem:[#allocation36_spill]] }
 0x275   : > { %1364 = vrot.lane.b32.xlu0 %v920_v13, %s6863_s18  ;;  %s6941_s18 = sld [smem:[#allocation47_spill]] }
 0x277   : > { %1362 = vrot.lane.b32.xlu1 %v919_v15, %s6865_s14 }
 0x279   : > { %1413 = vrot.lane.b32.xlu0 %v920_v13, %s6857_s24  ;;  %s6937_s24 = sld [smem:[#allocation34_spill]] }
 0x27f   : > { %v913_v30 = vld [vmem:[%s6937_s24] sm:$0xf]  ;;  %v914_v37 = vld [vmem:[%s6937_s24 + $0x4] sm:$0xf]  ;;  %v915_v54 = vld [vmem:[%s6937_s24 + $0x8] sm:$0xf] }
 0x280   : > { %v1173_v34 = vsel %vm977_vm3, %v913_v30, 0  ;;  %v1127_v38 = vsel %vm977_vm3, %v914_v37, 0  ;;  %v1319_v55 = vsel %vm977_vm3, %v915_v54, 0 }
 0x2d7   : > { %v923_v16 = vpop.permute.xlu0 %922 }
 0x2d8   : > { %v929_v17 = vsel %vm924_vm2, %v923_v16, 0 }
 0x2d9   : > { %4688 = vmatpush3.bf16.xpose.msra.mxu1 %v929_v17  ;;  %v1024_v18 = vpop.permute.xlu1 %1023 }
 0x2da   : > { %4699 = vmatprep.subr.bf16.mxu1 %v5683_v0 }
 0x2db   : > { %v1026_v19 = vpop.permute.xlu0 %1025 }
 0x2dc   : > { %v1031_v22 = vsel %vm924_vm2, %v1026_v19, 0 }
 0x2dd   : > { %v973_v20 = vpop.permute.xlu1 %972 }
 0x2de   : > { %v979_v21 = vsel %vm977_vm3, %v973_v20, 0 }
 0x2df   : > { %4694 = vmatpush3.bf16.msra.mxu0 %v979_v21  ;;  %v1075_v23 = vpop.permute.xlu0 %1074 }
 0x2e0   : > { %4690 = vmatmul.mubr.msk.bf16.vlgmr.msra.gmra.mrb[0].mxu1 %vm924_vm2, %v919_v15  ;;  %4705 = vmatprep.subr.bf16.mxu0 %v5683_v0  ;;  %v1080_v28 = vsel %vm977_vm3, %v1075_v23, 0  ;;  %v916_v23 = vld [vmem:[%s6937_s24 + $0xc] sm:$0xf] }
 0x2e1   : > { %4700 = vmatpush3.bf16.xpose.msra.mxu1 %v1031_v22  ;;  %4701 = vmatprep.mubr.msk.bf16.mxu1 %vm5684_vm0, %v5683_v0  ;;  %v1218_v39 = vpop.permute.xlu1 %1217 }
 0x2e2   : > { %4711 = vmatprep.subr.bf16.mxu1 %v5683_v0  ;;  %v1223_v51 = vsel %vm924_vm2, %v1218_v39, 0 }
 0x2e3   : > { %v1216_v53 = vpop.permute.xlu0 %1215 }
 0x2e5   : > { %v1267_v40 = vpop.permute.xlu1 %1266 }
 0x2e6   : > { %v1272_v45 = vsel %vm977_vm3, %v1267_v40, 0 }
 0x2e7   : > { %v1365_v2 = vpop.permute.xlu0 %1364 }
 0x2e8   : > { %4702 = vmatmul.mubr.msk.bf16.vlgmr.msra.gmra.mrb[4].mxu1 %vm924_vm2, %v1024_v18  ;;  %v1370_v8 = vsel %vm924_vm2, %v1365_v2, 0 }
 0x2e9   : > { %4713 = vmatprep.mubr.msk.bf16.mxu1 %vm5684_vm0, %v5683_v0  ;;  %4712 = vmatpush3.bf16.msra.mxu1 %v1127_v38  ;;  %v1363_v10 = vpop.permute.xlu1 %1362 }
 0x2ea   : > { %4723 = vmatprep.subr.bf16.mxu1 %v5683_v0 }
 0x2eb   : > { %v1414_v11 = vpop.permute.xlu0 %1413 }
 0x2ec   : > { %v1419_v16 = vsel %vm977_vm3, %v1414_v11, 0 }
 0x3b3   : > { %v965_v24 = vpop.f32.mrb[0].mxu1 }
 0x3b4   : > { %v971_v25 = vpack.c.bf16 %v965_v24, %v965_v24  ;;  %v4691_v26 = vpop.f32.mrb[1].mxu1  ;;  %v1466_v24 = vsel %vm977_vm3, %v916_v23, 0 }
 0x3b5   : > { %v968_v27 = vpop.f32.mrb[2].mxu1 }
 0x3b6   : > { %v4692_v29 = vpop.f32.mrb[3].mxu1  ;;  %4696 = vmatmul.mubr.msk.bf16.vlgmr.msra.gmra.mrb[4].mxu0 %vm924_vm2, %v971_v25 }
 0x3b7   : > { %4706 = vmatpush3.bf16.msra.mxu0 %v1080_v28  ;;  %4707 = vmatprep.mubr.msk.bf16.mxu0 %vm5684_vm0, %v5683_v0 }
 0x3b8   : > { %4717 = vmatprep.subr.bf16.mxu0 %v5683_v0 }
 0x3bb   : > { %v1067_v31 = vpop.f32.mrb[4].mxu1 }
 0x3bc   : > { %v1073_v32 = vpack.c.bf16 %v1067_v31, %v1067_v31  ;;  %v4703_v33 = vpop.f32.mrb[5].mxu1 }
 0x3bd   : > { %v1070_v35 = vpop.f32.mrb[6].mxu1 }
 0x3be   : > { %v4704_v36 = vpop.f32.mrb[7].mxu1  ;;  %4708 = vmatmul.mubr.msk.bf16.vlgmr.msra.gmra.mrb[8].mxu0 %vm924_vm2, %v1073_v32  ;;  %v4427_v35 = vld [vmem:[#allocation7] ss:$0 sm:$0xff] }
 0x3bf   : > { %4718 = vmatpush3.bf16.msra.mxu0 %v1173_v34  ;;  %4719 = vmatprep.mubr.msk.bf16.mxu0 %vm5684_vm0, %v5683_v0 }
 0x3c0   : > { %4729 = vmatprep.subr.bf16.mxu0 %v5683_v0 }
 0x489   : > { %v1015_v41 = vpop.f32.mrb[4].mxu0 }
 0x48a   : > { %v1021_v42 = vpack.c.bf16 %v1015_v41, %v1015_v41  ;;  %v4697_v43 = vpop.f32.mrb[5].mxu0 }
 0x48b   : > { %v1018_v44 = vpop.f32.mrb[6].mxu0 }
 0x48c   : > { %v4698_v46 = vpop.f32.mrb[7].mxu0  ;;  %4720 = vmatmul.mubr.msk.bf16.vlgmr.msra.gmra.mrb[12].mxu0 %vm924_vm2, %v1021_v42 }
 0x48d   : > { %4730 = vmatpush3.bf16.msra.mxu0 %v1272_v45  ;;  %4731 = vmatprep.mubr.msk.bf16.mxu0 %vm5684_vm0, %v5683_v0 }
 0x48e   : > { %4741 = vmatprep.subr.bf16.mxu0 %v5683_v0 }
 0x491   : > { %v1116_v47 = vpop.f32.mrb[8].mxu0 }
 0x492   : > { %v1122_v48 = vpack.c.bf16 %v1116_v47, %v1116_v47  ;;  %v4709_v49 = vpop.f32.mrb[9].mxu0 }
 0x493   : > { %v1119_v50 = vpop.f32.mrb[10].mxu0  ;;  %v5224_v49 = vld [vmem:[%s6938_s11] sm:$0xff]  }
 0x494   : > { %v4710_v52 = vpop.f32.mrb[11].mxu0  ;;  %4714 = vmatmul.mubr.msk.bf16.vlgmr.msra.gmra.mrb[8].mxu1 %vm924_vm2, %v1122_v48  ;;  %v841_v50 = vld [vmem:[%s737_s30] sm:$0xff]  ;;  %s6942_s30 = smov 72  }
 0x495   : > { %4724 = vmatpush3.bf16.xpose.msra.mxu1 %v1223_v51  ;;  %4725 = vmatprep.mubr.msk.bf16.mxu1 %vm5684_vm0, %v5683_v0  ;;  %v6333_v51 = vpack.c.bf16 %v841_v50, %v841_v50  ;;  %v5226_v52 = vld [vmem:[%s6939_s12] sm:$0xff]  }
 0x496   : > { %4735 = vmatprep.subr.bf16.mxu1 %v5683_v0 }
 0x49c   : > { %4726 = vmatmul.mubr.msk.bf16.vlgmr.msra.gmra.mrb[12].mxu1 %vm924_vm2, %v1216_v53  ;;  %v5227_v53 = vld [vmem:[%s6939_s12 + $0x8] sm:$0xff]  }
 0x49d   : > { %4737 = vmatprep.mubr.msk.bf16.mxu1 %vm5684_vm0, %v5683_v0  ;;  %4736 = vmatpush3.bf16.msra.mxu1 %v1319_v55 }
 0x49e   : > { %4747 = vmatprep.subr.bf16.mxu1 %v5683_v0 }
 0x55f   : > { %v1209_v56 = vpop.f32.mrb[12].mxu0 }
 0x560   : > { %v4721_v57 = vpop.f32.mrb[13].mxu0 }
 0x561   : > { %v1212_v58 = vpop.f32.mrb[14].mxu0 }
 0x562   : > { %v4722_v59 = vpop.f32.mrb[15].mxu0 }
 0x567   : > { %v1163_v60 = vpop.f32.mrb[8].mxu1 }
 0x568   : > { %v1210_v61 = vadd.f32 %v1209_v56, %v1163_v60  ;;  %v4715_v62 = vpop.f32.mrb[9].mxu1  ;;  %v1531_v56 = vlaneseq  ;;  %v6356_v60 = vld [vmem:[%s6940_s7] sm:$0x7] }
 0x569   : > { %v1166_v63 = vpop.f32.mrb[10].mxu1 }
 0x56a   : > { %v4716_v1 = vpop.f32.mrb[11].mxu1  ;;  %v6348_v58 = vshrl.u32 %v1531_v56, 7 }
 0x56c   : > { %v6351_v59 = vsub.s32 0, %v6348_v58 }
 0x56e   : > { %v1534_v62 = vrot.slane %v6356_v60, %v6351_v59 }
 0x56f   : > { %v1259_v3 = vpop.f32.mrb[12].mxu1 }
 0x570   : > { %v1265_v4 = vpack.c.bf16 %v1259_v3, %v1259_v3  ;;  %v4727_v6 = vpop.f32.mrb[13].mxu1 }
 0x571   : > { %v1262_v7 = vpop.f32.mrb[14].mxu1 }
 0x572   : > { %v4728_v9 = vpop.f32.mrb[15].mxu1  ;;  %4732 = vmatmul.mubr.msk.bf16.vlgmr.msra.gmra.mrb[16].mxu0 %vm924_vm2, %v1265_v4  ;;  %v4432_v7 = vld [vmem:[#allocation10] ss:$0 sm:$0xff] }
 0x573   : > { %4742 = vmatpush3.bf16.xpose.msra.mxu0 %v1370_v8  ;;  %4743 = vmatprep.mubr.msk.bf16.mxu0 %vm5684_vm0, %v5683_v0 }
 0x574   : > { %4753 = vmatprep.subr.bf16.mxu0 %v5683_v0 }
 0x57a   : > { %4744 = vmatmul.mubr.msk.bf16.vlgmr.msra.gmra.mrb[20].mxu0 %vm924_vm2, %v1363_v10 }
 0x57b   : > { %4755 = vmatprep.mubr.msk.bf16.mxu0 %vm5684_vm0, %v5683_v0  ;;  %4754 = vmatpush3.bf16.msra.mxu0 %v1466_v24 }
 0x57c   : > { %4767 = vmatprep.subr.bf16.mxu0 %v5683_v0 }
 0x645   : > { %v1308_v12 = vpop.f32.mrb[16].mxu0 }
 0x646   : > { %v1314_v13 = vpack.c.bf16 %v1308_v12, %v1308_v12  ;;  %v4733_v14 = vpop.f32.mrb[17].mxu0 }
 0x647   : > { %v1311_v15 = vpop.f32.mrb[18].mxu0 }
 0x648   : > { %v4734_v17 = vpop.f32.mrb[19].mxu0  ;;  %4738 = vmatmul.mubr.msk.bf16.vlgmr.msra.gmra.mrb[16].mxu1 %vm924_vm2, %v1314_v13  ;;  %v4428_v15 = vld [vmem:[#allocation8] ss:$0 sm:$0xff] }
 0x649   : > { %4748 = vmatpush3.bf16.msra.mxu1 %v1419_v16  ;;  %4749 = vmatprep.mubr.msk.bf16.mxu1 %vm5684_vm0, %v5683_v0 }
 0x64a   : > { %4759 = vmatprep.subr.bf16.mxu1 %v5683_v0 }
 0x64d   : > { %v1406_v18 = vpop.f32.mrb[20].mxu0 }
 0x64e   : > { %v1412_v19 = vpack.c.bf16 %v1406_v18, %v1406_v18  ;;  %v4745_v20 = vpop.f32.mrb[21].mxu0 }
 0x64f   : > { %v1409_v21 = vpop.f32.mrb[22].mxu0 }
 0x650   : > { %v4746_v22 = vpop.f32.mrb[23].mxu0  ;;  %4750 = vmatmul.mubr.msk.bf16.vlgmr.msra.gmra.mrb[20].mxu1 %vm924_vm2, %v1412_v19 }
 0x651   : > { %4763 = vmatprep.mubr.msk.bf16.mxu1 %vm5684_vm0, %v5683_v0  ;;  %4760 = vmatpush3.bf16.msra.mxu1 %v5226_v52 }
 0x652   : > { %4761 = vmatprep.subr.bf16.mxu1 %v5683_v0 }
 0x655   : > { %4762 = vmatpush3.bf16.msra.mxu1 %v5227_v53 }
 0x656   : > { %4775 = vmatprep.subr.bf16.mxu1 %v5683_v0 }
 0x71b   : > { %v1355_v25 = vpop.f32.mrb[16].mxu1 }
 0x71c   : > { %v1361_v26 = vadd.f32 %v1355_v25, %v1210_v61  ;;  %v4739_v27 = vpop.f32.mrb[17].mxu1  ;;  %v6361_v61 = vld [vmem:[%s6941_s18] sm:$0x7] }
 0x71d   : > { %v1358_v28 = vpop.f32.mrb[18].mxu1  ;;  %v1539_v2 = vrot.slane %v6361_v61, %v6351_v59 }
 0x71e   : > { %v4740_v29 = vpop.f32.mrb[19].mxu1 }
 0x723   : > { %v1455_v30 = vpop.f32.mrb[20].mxu1 }
 0x724   : > { %v1461_v31 = vpack.c.bf16 %v1455_v30, %v1455_v30  ;;  %v4751_v32 = vpop.f32.mrb[21].mxu1 }
 0x725   : > { %v1458_v33 = vpop.f32.mrb[22].mxu1 }
 0x726   : > { %v4752_v34 = vpop.f32.mrb[23].mxu1  ;;  %4756 = vmatmul.mubr.msk.bf16.vlgmr.msra.gmra.mrb[24].mxu0 %vm924_vm2, %v1461_v31 }
 0x727   : > { %4771 = vmatprep.mubr.msk.bf16.mxu0 %vm5684_vm0, %v5683_v0  ;;  %4768 = vmatpush3.bf16.msra.mxu0 %v5224_v49 }
 0x728   : > { %4769 = vmatprep.subr.bf16.mxu0 %v5683_v0 }
 0x7f9   : > { %v1502_v36 = vpop.f32.mrb[24].mxu0 }
 0x7fa   : > { %v1508_v37 = vadd.f32 %v1502_v36, %v1361_v26  ;;  %v4757_v38 = vpop.f32.mrb[25].mxu0 }
 0x7fb   : > { %v1505_v39 = vpop.f32.mrb[26].mxu0 }
 0x7fc   : > { %v1515_v40 = vadd.f32 %v4427_v35, %v1508_v37  ;;  %v4758_v41 = vpop.f32.mrb[27].mxu0 }
 0x7fe   : > { %v1516_v42 = vadd.f32 %v1515_v40, %v6227_v5  ;;  %v5225_v5 = vld [vmem:[%s6938_s11 + $0x8] sm:$0xff]  }
 0x7ff   : > { %4770 = vmatpush3.bf16.msra.mxu0 %v5225_v5 }
 0x800   : > { %v1517_v43 = vsel %vm869_vm1, %v1516_v42, 0.0  ;;  %4781 = vmatprep.subr.bf16.mxu0 %v5683_v0 }
 0x801   : > { %1518 = vadd.xlane.f32.xlu1 %v1517_v43 }
 0x802   : > { %4772 = vmatmul.mubr.msk.bf16.vlgmr.msra.gmra.mrb[28].mxu0 %vm869_vm1, %v6333_v51 }
 0x803   : > { %4783 = vmatprep.mubr.msk.bf16.mxu0 %vm5684_vm0, %v5683_v0 }
 0x88e   : > { %v1519_v44 = vpop.xlane.xlu1 %1518 }
 0x88f   : > { %v1521_v45 = vmul.f32 0.03125, %v1519_v44 }
 0x891   : > { %v1522_v46 = vsub.f32 %v1516_v42, %v1521_v45 }
 0x893   : > { %v1523_v47 = vmul.f32 %v1522_v46, %v1522_v46 }
 0x895   : > { %v1524_v48 = vsel %vm869_vm1, %v1523_v47, 0.0 }
 0x896   : > { %1525 = vadd.xlane.f32.xlu0 %v1524_v48 }
 0x8d5   : > { %v1668_v8 = vpop.f32.mrb[28].mxu0 }
 0x8d6   : > { %v1669_v9 = vadd.f32 %v4432_v7, %v1668_v8  ;;  %v4773_v10 = vpop.f32.mrb[29].mxu0 }
 0x8d7   : > { %v1671_v11 = vpop.f32.mrb[30].mxu0 }
 0x8d8   : > { %v1681_v12 = vpack.c.bf16 %v1669_v9, %v1669_v9  ;;  %v4774_v13 = vpop.f32.mrb[31].mxu0 }
 0x8da   : > { %1782 = vrot.lane.b32.xlu0 %v1681_v12, %s6869_s9  ;;  %v1686_v14 = vsel %vm924_vm2, %v1681_v12, 0 }
 0x8de   : > { %1831 = vrot.lane.b32.xlu0 %v1681_v12, %s6874_s0 }
 0x923   : > { %v1526_v54 = vpop.xlane.xlu0 %1525 }
 0x924   : > { %v1527_v55 = vmul.f32 0.03125, %v1526_v54 }
 0x926   : > { %v1528_v57 = vadd.f32 1e-05, %v1527_v55 }
 0x928   : > { %5248 = vrsqrt.f32 %v1528_v57 }
 0x932   : > { %v5249_v63 = vpop.eup %5248 }
 0x933   : > { %v1530_v1 = vmul.f32 %v5249_v63, %v1522_v46 }
 0x935   : > { %v1535_v3 = vmul.f32 %v1534_v62, %v1530_v1 }
 0x937   : > { %v6367_v4 = vadd.f32 %v1539_v2, %v1535_v3 }
 0x939   : > { %v1545_v6 = vpack.c.bf16 %v6367_v4, %v6367_v4 }
 0x93b   : > { %4764 = vmatmul.mubr.msk.bf16.vlgmr.msra.gmra.mrb[24].mxu1 %vm869_vm1, %v1545_v6 }
 0x93c   : > { %4777 = vmatprep.mubr.msk.bf16.mxu1 %vm5684_vm0, %v5683_v0  ;;  %4776 = vmatpush3.bf16.xpose.msra.mxu1 %v1686_v14 }
 0x93d   : > { %4787 = vmatprep.subr.bf16.mxu1 %v5683_v0 }
 0x94c   : > { %v1783_v23 = vpop.permute.xlu0 %1782 }
 0x94d   : > { %v1788_v24 = vsel %vm924_vm2, %v1783_v23, 0 }
 0x950   : > { %v1832_v28 = vpop.permute.xlu0 %1831 }
 0x951   : > { %v1837_v33 = vsel %vm977_vm3, %v1832_v28, 0 }
 0xa0e   : > { %v1602_v16 = vpop.f32.mrb[24].mxu1 }
 0xa0f   : > { %v1603_v17 = vadd.f32 %v4428_v15, %v1602_v16  ;;  %v4765_v18 = vpop.f32.mrb[25].mxu1 }
 0xa10   : > { %v1605_v19 = vpop.f32.mrb[26].mxu1 }
 0xa11   : > { %v1679_v20 = vmul.f32 0.35355338, %v1603_v17  ;;  %v4766_v21 = vpop.f32.mrb[27].mxu1 }
 0xa13   : > { %v1680_v22 = vpack.c.bf16 %v1679_v20, %v1679_v20 }
 0xa15   : > { %1780 = vrot.lane.b32.xlu1 %v1680_v22, %s6869_s9  ;;  %1972 = vrot.lane.b32.xlu0 %v1680_v22, %s6867_s6  ;;  %s6950_s9 = smov 48  }
 0xa16   : > { %4778 = vmatmul.mubr.msk.bf16.vlgmr.msra.gmra.mrb[28].mxu1 %vm924_vm2, %v1680_v22 }
 0xa17   : > { %4788 = vmatpush3.bf16.xpose.msra.mxu1 %v1788_v24  ;;  %4789 = vmatprep.mubr.msk.bf16.mxu1 %vm5684_vm0, %v5683_v0 }
 0xa18   : > { %4799 = vmatprep.subr.bf16.mxu1 %v5683_v0 }
 0xa19   : > { %1730 = vrot.lane.b32.xlu1 %v1681_v12, %s6871_s15  ;;  %2121 = vrot.lane.b32.xlu0 %v1681_v12, %s6865_s14  ;;  %s6949_s15 = smov 56  }
 0xa1d   : > { %1974 = vrot.lane.b32.xlu1 %v1681_v12, %s6867_s6  ;;  %2170 = vrot.lane.b32.xlu0 %v1681_v12, %s6942_s30  ;;  %s6946_s6 = smov 96  }
 0xa21   : > { %2023 = vrot.lane.b32.xlu1 %v1681_v12, %s6943_s16 }
 0xa25   : > { %2119 = vrot.lane.b32.xlu1 %v1680_v22, %s6865_s14  ;;  %s6944_s14 = sld [smem:[#allocation40_spill]] }
 0xa2b   : > { %v1675_v35 = vld [vmem:[%s6944_s14 + $0x4] sm:$0xf]  ;;  %v1674_v37 = vld [vmem:[%s6944_s14] sm:$0xf]  ;;  %v1676_v6 = vld [vmem:[%s6944_s14 + $0x8] sm:$0xf] }
 0xa2c   : > { %v1884_v36 = vsel %vm977_vm3, %v1675_v35, 0  ;;  %v1930_v41 = vsel %vm977_vm3, %v1674_v37, 0  ;;  %v2076_v7 = vsel %vm977_vm3, %v1676_v6, 0 }
 0xa87   : > { %v1781_v25 = vpop.permute.xlu1 %1780  ;;  %v1973_v62 = vpop.permute.xlu0 %1972 }
 0xa88   : > { %4790 = vmatmul.mubr.msk.bf16.vlgmr.msra.gmra.mrb[32].mxu1 %vm924_vm2, %v1781_v25 }
 0xa89   : > { %4801 = vmatprep.mubr.msk.bf16.mxu1 %vm5684_vm0, %v5683_v0  ;;  %4800 = vmatpush3.bf16.msra.mxu1 %v1884_v36 }
 0xa8a   : > { %4811 = vmatprep.subr.bf16.mxu1 %v5683_v0 }
 0xa8b   : > { %v1731_v26 = vpop.permute.xlu1 %1730  ;;  %v2122_v13 = vpop.permute.xlu0 %2121 }
 0xa8c   : > { %v1736_v27 = vsel %vm977_vm3, %v1731_v26, 0  ;;  %v2127_v18 = vsel %vm924_vm2, %v2122_v13, 0 }
 0xa8d   : > { %4782 = vmatpush3.bf16.msra.mxu0 %v1736_v27 }
 0xa8e   : > { %4793 = vmatprep.subr.bf16.mxu0 %v5683_v0 }
 0xa8f   : > { %v1975_v44 = vpop.permute.xlu1 %1974  ;;  %v2171_v21 = vpop.permute.xlu0 %2170 }
 0xa90   : > { %v1980_v56 = vsel %vm924_vm2, %v1975_v44, 0  ;;  %v2176_v26 = vsel %vm977_vm3, %v2171_v21, 0 }
 0xa93   : > { %v2024_v45 = vpop.permute.xlu1 %2023 }
 0xa94   : > { %v2029_v5 = vsel %vm977_vm3, %v2024_v45, 0  ;;  %v4448_v45 = vld [vmem:[#allocation11] ss:$0 sm:$0xff] }
 0xa97   : > { %v2120_v20 = vpop.permute.xlu1 %2119 }
 0xae9   : > { %v1722_v29 = vpop.f32.mrb[28].mxu1 }
 0xaea   : > { %v1728_v30 = vpack.c.bf16 %v1722_v29, %v1722_v29  ;;  %v4779_v31 = vpop.f32.mrb[29].mxu1 }
 0xaeb   : > { %v1725_v32 = vpop.f32.mrb[30].mxu1 }
 0xaec   : > { %v4780_v34 = vpop.f32.mrb[31].mxu1  ;;  %4784 = vmatmul.mubr.msk.bf16.vlgmr.msra.gmra.mrb[32].mxu0 %vm924_vm2, %v1728_v30 }
 0xaed   : > { %4794 = vmatpush3.bf16.msra.mxu0 %v1837_v33  ;;  %4795 = vmatprep.mubr.msk.bf16.mxu0 %vm5684_vm0, %v5683_v0  ;;  %v1677_v33 = vld [vmem:[%s6944_s14 + $0xc] sm:$0xf] }
 0xaee   : > { %4805 = vmatprep.subr.bf16.mxu0 %v5683_v0  ;;  %v2223_v34 = vsel %vm977_vm3, %v1677_v33, 0 }
 0xb5b   : > { %v1824_v38 = vpop.f32.mrb[32].mxu1 }
 0xb5c   : > { %v1830_v39 = vpack.c.bf16 %v1824_v38, %v1824_v38  ;;  %v4791_v40 = vpop.f32.mrb[33].mxu1 }
 0xb5d   : > { %v1827_v42 = vpop.f32.mrb[34].mxu1 }
 0xb5e   : > { %v4792_v43 = vpop.f32.mrb[35].mxu1  ;;  %4796 = vmatmul.mubr.msk.bf16.vlgmr.msra.gmra.mrb[36].mxu0 %vm924_vm2, %v1830_v39 }
 0xb5f   : > { %4806 = vmatpush3.bf16.msra.mxu0 %v1930_v41  ;;  %4807 = vmatprep.mubr.msk.bf16.mxu0 %vm5684_vm0, %v5683_v0 }
 0xb60   : > { %4817 = vmatprep.subr.bf16.mxu0 %v5683_v0 }
 0xbbf   : > { %v1772_v46 = vpop.f32.mrb[32].mxu0 }
 0xbc0   : > { %v1778_v47 = vpack.c.bf16 %v1772_v46, %v1772_v46  ;;  %v4785_v48 = vpop.f32.mrb[33].mxu0 }
 0xbc1   : > { %v1775_v49 = vpop.f32.mrb[34].mxu0 }
 0xbc2   : > { %v4786_v50 = vpop.f32.mrb[35].mxu0  ;;  %4808 = vmatmul.mubr.msk.bf16.vlgmr.msra.gmra.mrb[40].mxu0 %vm924_vm2, %v1778_v47 }
 0xbc3   : > { %4818 = vmatpush3.bf16.msra.mxu0 %v2029_v5  ;;  %4819 = vmatprep.mubr.msk.bf16.mxu0 %vm5684_vm0, %v5683_v0 }
 0xbc4   : > { %4829 = vmatprep.subr.bf16.mxu0 %v5683_v0 }
 0xc31   : > { %v1873_v52 = vpop.f32.mrb[36].mxu0 }
 0xc32   : > { %v1879_v53 = vpack.c.bf16 %v1873_v52, %v1873_v52  ;;  %v4797_v54 = vpop.f32.mrb[37].mxu0 }
 0xc33   : > { %v1876_v55 = vpop.f32.mrb[38].mxu0 }
 0xc34   : > { %v4798_v57 = vpop.f32.mrb[39].mxu0  ;;  %4802 = vmatmul.mubr.msk.bf16.vlgmr.msra.gmra.mrb[36].mxu1 %vm924_vm2, %v1879_v53 }
 0xc35   : > { %4812 = vmatpush3.bf16.xpose.msra.mxu1 %v1980_v56  ;;  %4813 = vmatprep.mubr.msk.bf16.mxu1 %vm5684_vm0, %v5683_v0 }
 0xc36   : > { %4823 = vmatprep.subr.bf16.mxu1 %v5683_v0 }
 0xc3c   : > { %4814 = vmatmul.mubr.msk.bf16.vlgmr.msra.gmra.mrb[40].mxu1 %vm924_vm2, %v1973_v62 }
 0xc3d   : > { %4825 = vmatprep.mubr.msk.bf16.mxu1 %vm5684_vm0, %v5683_v0  ;;  %4824 = vmatpush3.bf16.msra.mxu1 %v2076_v7 }
 0xc3e   : > { %4835 = vmatprep.subr.bf16.mxu1 %v5683_v0 }
 0xc95   : > { %v1966_v63 = vpop.f32.mrb[40].mxu0 }
 0xc96   : > { %v4809_v1 = vpop.f32.mrb[41].mxu0 }
 0xc97   : > { %v1969_v2 = vpop.f32.mrb[42].mxu0  ;;  %v5229_v1 = vld [vmem:[#allocation13 + $0x8] sm:$0xff]  }
 0xc98   : > { %v4810_v3 = vpop.f32.mrb[43].mxu0  ;;  %v5231_v2 = vld [vmem:[%s6945_s1 + $0x8] sm:$0xff]  }
 0xd07   : > { %v1920_v8 = vpop.f32.mrb[36].mxu1 }
 0xd08   : > { %v1967_v9 = vadd.f32 %v1966_v63, %v1920_v8  ;;  %v4803_v10 = vpop.f32.mrb[37].mxu1  ;;  %v5228_v63 = vld [vmem:[#allocation13] sm:$0xff]   ;;  %v6470_v8 = vsub.s32 1, %v6348_v58 }
 0xd09   : > { %v1923_v11 = vpop.f32.mrb[38].mxu1 }
 0xd0a   : > { %v4804_v12 = vpop.f32.mrb[39].mxu1 }
 0xd0b   : > { %v2295_v12 = vrot.slane %v6361_v61, %v6470_v8 }
 0xd0f   : > { %v2016_v14 = vpop.f32.mrb[40].mxu1 }
 0xd10   : > { %v2022_v15 = vpack.c.bf16 %v2016_v14, %v2016_v14  ;;  %v4815_v16 = vpop.f32.mrb[41].mxu1 }
 0xd11   : > { %v2019_v17 = vpop.f32.mrb[42].mxu1  ;;  %v5232_v16 = vld [vmem:[%s6945_s1 + $0x10] sm:$0xff]  }
 0xd12   : > { %v4816_v19 = vpop.f32.mrb[43].mxu1  ;;  %4820 = vmatmul.mubr.msk.bf16.vlgmr.msra.gmra.mrb[44].mxu0 %vm924_vm2, %v2022_v15  ;;  %v5233_v17 = vld [vmem:[%s6945_s1 + $0x18] sm:$0xff]  }
 0xd13   : > { %4830 = vmatpush3.bf16.xpose.msra.mxu0 %v2127_v18  ;;  %4831 = vmatprep.mubr.msk.bf16.mxu0 %vm5684_vm0, %v5683_v0  ;;  %v4449_v18 = vld [vmem:[#allocation14] ss:$0 sm:$0xff] }
 0xd14   : > { %4841 = vmatprep.subr.bf16.mxu0 %v5683_v0 }
 0xd1a   : > { %4832 = vmatmul.mubr.msk.bf16.vlgmr.msra.gmra.mrb[48].mxu0 %vm924_vm2, %v2120_v20 }
 0xd1b   : > { %4843 = vmatprep.mubr.msk.bf16.mxu0 %vm5684_vm0, %v5683_v0  ;;  %4842 = vmatpush3.bf16.msra.mxu0 %v2223_v34 }
 0xd1c   : > { %4855 = vmatprep.subr.bf16.mxu0 %v5683_v0 }
 0xde5   : > { %v2065_v22 = vpop.f32.mrb[44].mxu0 }
 0xde6   : > { %v2071_v23 = vpack.c.bf16 %v2065_v22, %v2065_v22  ;;  %v4821_v24 = vpop.f32.mrb[45].mxu0 }
 0xde7   : > { %v2068_v25 = vpop.f32.mrb[46].mxu0 }
 0xde8   : > { %v4822_v27 = vpop.f32.mrb[47].mxu0  ;;  %4826 = vmatmul.mubr.msk.bf16.vlgmr.msra.gmra.mrb[44].mxu1 %vm924_vm2, %v2071_v23 }
 0xde9   : > { %4836 = vmatpush3.bf16.msra.mxu1 %v2176_v26  ;;  %4837 = vmatprep.mubr.msk.bf16.mxu1 %vm5684_vm0, %v5683_v0  ;;  %v4453_v26 = vld [vmem:[#allocation16] ss:$0 sm:$0xff] }
 0xdea   : > { %4847 = vmatprep.subr.bf16.mxu1 %v5683_v0 }
 0xded   : > { %v2163_v28 = vpop.f32.mrb[48].mxu0 }
 0xdee   : > { %v2169_v29 = vpack.c.bf16 %v2163_v28, %v2163_v28  ;;  %v4833_v30 = vpop.f32.mrb[49].mxu0 }
 0xdef   : > { %v2166_v31 = vpop.f32.mrb[50].mxu0 }
 0xdf0   : > { %v4834_v32 = vpop.f32.mrb[51].mxu0  ;;  %4838 = vmatmul.mubr.msk.bf16.vlgmr.msra.gmra.mrb[48].mxu1 %vm924_vm2, %v2169_v29 }
 0xdf1   : > { %4851 = vmatprep.mubr.msk.bf16.mxu1 %vm5684_vm0, %v5683_v0  ;;  %4848 = vmatpush3.bf16.msra.mxu1 %v5228_v63 }
 0xdf2   : > { %4849 = vmatprep.subr.bf16.mxu1 %v5683_v0 }
 0xdf5   : > { %4850 = vmatpush3.bf16.msra.mxu1 %v5229_v1 }
 0xdf6   : > { %4867 = vmatprep.subr.bf16.mxu1 %v5683_v0 }
 0xebb   : > { %v2112_v35 = vpop.f32.mrb[44].mxu1 }
 0xebc   : > { %v2118_v36 = vadd.f32 %v2112_v35, %v1967_v9  ;;  %v4827_v37 = vpop.f32.mrb[45].mxu1  ;;  %v2290_v9 = vrot.slane %v6356_v60, %v6470_v8 }
 0xebd   : > { %v2115_v38 = vpop.f32.mrb[46].mxu1 }
 0xebe   : > { %v4828_v39 = vpop.f32.mrb[47].mxu1 }
 0xebf   : > { %v5234_v39 = vld [vmem:[%s6934_s22 + $0x10] sm:$0xff]  }
 0xec3   : > { %v2212_v40 = vpop.f32.mrb[48].mxu1 }
 0xec4   : > { %v2218_v41 = vpack.c.bf16 %v2212_v40, %v2212_v40  ;;  %v4839_v42 = vpop.f32.mrb[49].mxu1  ;;  %v5235_v40 = vld [vmem:[%s6934_s22 + $0x18] sm:$0xff]   ;;  %s6954_s22 = smov 88  }
 0xec5   : > { %v2215_v43 = vpop.f32.mrb[50].mxu1 }
 0xec6   : > { %v4840_v44 = vpop.f32.mrb[51].mxu1  ;;  %4844 = vmatmul.mubr.msk.bf16.vlgmr.msra.gmra.mrb[52].mxu0 %vm924_vm2, %v2218_v41 }
 0xec7   : > { %4863 = vmatprep.mubr.msk.bf16.mxu0 %vm5684_vm0, %v5683_v0  ;;  %v6501_v44 = vsub.s32 2, %v6348_v58  ;;  %v4466_v58 = vld [vmem:[%s6936_s21 + $0x1] ss:$0 sm:$0xff] }
 0xf99   : > { %v2259_v46 = vpop.f32.mrb[52].mxu0 }
 0xf9a   : > { %v2265_v47 = vadd.f32 %v2259_v46, %v2118_v36  ;;  %v4845_v48 = vpop.f32.mrb[53].mxu0 }
 0xf9b   : > { %v2262_v49 = vpop.f32.mrb[54].mxu0  ;;  %v2471_v48 = vrot.slane %v6361_v61, %v6501_v44 }
 0xf9c   : > { %v2272_v5 = vadd.f32 %v4448_v45, %v2265_v47  ;;  %v4846_v50 = vpop.f32.mrb[55].mxu0  ;;  %v2466_v45 = vrot.slane %v6356_v60, %v6501_v44 }
 0xf9e   : > { %v2273_v52 = vadd.f32 %v2272_v5, %v6367_v4  ;;  %v5230_v4 = vld [vmem:[%s6945_s1] sm:$0xff]  }
 0xf9f   : > { %4856 = vmatpush3.bf16.msra.mxu0 %v5230_v4 }
 0xfa0   : > { %v2274_v53 = vsel %vm869_vm1, %v2273_v52, 0.0  ;;  %4857 = vmatprep.subr.bf16.mxu0 %v5683_v0 }
 0xfa1   : > { %2275 = vadd.xlane.f32.xlu1 %v2274_v53 }
 0xfa3   : > { %4858 = vmatpush3.bf16.msra.mxu0 %v5231_v2 }
 0xfa4   : > { %4859 = vmatprep.subr.bf16.mxu0 %v5683_v0 }
 0xfa7   : > { %4860 = vmatpush3.bf16.msra.mxu0 %v5232_v16 }
 0xfa8   : > { %4861 = vmatprep.subr.bf16.mxu0 %v5683_v0 }
 0xfab   : > { %4862 = vmatpush3.bf16.msra.mxu0 %v5233_v17 }
 0xfac   : > { %4881 = vmatprep.subr.bf16.mxu0 %v5683_v0 }
0x102e   : > { %v2276_v54 = vpop.xlane.xlu1 %2275 }
0x102f   : > { %v2277_v55 = vmul.f32 0.03125, %v2276_v54 }
0x1031   : > { %v2278_v56 = vsub.f32 %v2273_v52, %v2277_v55 }
0x1033   : > { %v2279_v57 = vmul.f32 %v2278_v56, %v2278_v56 }
0x1035   : > { %v2280_v62 = vsel %vm869_vm1, %v2279_v57, 0.0 }
0x1036   : > { %2281 = vadd.xlane.f32.xlu0 %v2280_v62 }
0x10c3   : > { %v2282_v3 = vpop.xlane.xlu0 %2281 }
0x10c4   : > { %v2283_v6 = vmul.f32 0.03125, %v2282_v3 }
0x10c6   : > { %v2284_v7 = vadd.f32 1e-05, %v2283_v6 }
0x10c8   : > { %5250 = vrsqrt.f32 %v2284_v7 }
0x10d2   : > { %v5251_v10 = vpop.eup %5250 }
0x10d3   : > { %v2286_v11 = vmul.f32 %v5251_v10, %v2278_v56 }
0x10d5   : > { %v2291_v13 = vmul.f32 %v2290_v9, %v2286_v11 }
0x10d7   : > { %v2296_v14 = vadd.f32 %v2295_v12, %v2291_v13 }
0x10d9   : > { %v2301_v15 = vpack.c.bf16 %v2296_v14, %v2296_v14 }
0x10db   : > { %4852 = vmatmul.mubr.msk.bf16.vlgmr.msra.gmra.mrb[52].mxu1 %vm869_vm1, %v2301_v15  ;;  %v4470_v15 = vld [vmem:[%s6937_s24 + $0x10] sm:$0xf] }
0x10dc   : > { %4871 = vmatprep.mubr.msk.bf16.mxu1 %vm5684_vm0, %v5683_v0  ;;  %4868 = vmatpush3.bf16.msra.mxu1 %v5234_v39  ;;  %v4472_v39 = vld [vmem:[%s6937_s24 + $0x18] sm:$0xf] }
0x10dd   : > { %4869 = vmatprep.subr.bf16.mxu1 %v5683_v0 }
0x10e0   : > { %4870 = vmatpush3.bf16.msra.mxu1 %v5235_v40  ;;  %v2952_v40 = vsel %vm977_vm3, %v4472_v39, 0  ;;  %v5238_v39 = vld [vmem:[%s6939_s12 + $0x10] sm:$0xff]  }
0x10e1   : > { %4875 = vmatprep.subr.bf16.mxu1 %v5683_v0 }
0x11ae   : > { %v2358_v19 = vpop.f32.mrb[52].mxu1 }
0x11af   : > { %v2359_v20 = vadd.f32 %v4449_v18, %v2358_v19  ;;  %v4853_v21 = vpop.f32.mrb[53].mxu1  ;;  %v2806_v19 = vsel %vm977_vm3, %v4470_v15, 0 }
0x11b0   : > { %v2361_v22 = vpop.f32.mrb[54].mxu1 }
0x11b1   : > { %v2364_v23 = vmax.f32 %v2359_v20, 0.0  ;;  %v4854_v24 = vpop.f32.mrb[55].mxu1  ;;  %v4471_v22 = vld [vmem:[%s6937_s24 + $0x14] sm:$0xf] }
0x11b3   : > { %v2373_v25 = vpack.c.bf16 %v2364_v23, %v2364_v23  ;;  %v2760_v23 = vsel %vm977_vm3, %v4471_v22, 0 }
0x11b5   : > { %4864 = vmatmul.mubr.msk.bf16.vlgmr.msra.gmra.mrb[56].mxu0 %vm2405_vm4, %v2373_v25 }
0x11b6   : > { %4883 = vmatprep.mubr.msk.bf16.mxu0 %vm5684_vm0, %v5683_v0 }
0x1288   : > { %v2443_v27 = vpop.f32.mrb[56].mxu0 }
0x1289   : > { %v2444_v28 = vadd.f32 %v4453_v26, %v2443_v27  ;;  %v4865_v29 = vpop.f32.mrb[57].mxu0 }
0x128a   : > { %v2446_v30 = vpop.f32.mrb[58].mxu0 }
0x128b   : > { %v4866_v31 = vpop.f32.mrb[59].mxu0  ;;  %v2449_v32 = vadd.f32 %v2444_v28, %v2296_v14 }
0x128d   : > { %v2450_v33 = vsel %vm869_vm1, %v2449_v32, 0.0 }
0x128e   : > { %2451 = vadd.xlane.f32.xlu0 %v2450_v33 }
0x131b   : > { %v2452_v34 = vpop.xlane.xlu0 %2451 }
0x131c   : > { %v2453_v35 = vmul.f32 0.03125, %v2452_v34 }
0x131e   : > { %v2454_v36 = vsub.f32 %v2449_v32, %v2453_v35 }
0x1320   : > { %v2455_v37 = vmul.f32 %v2454_v36, %v2454_v36 }
0x1322   : > { %v2456_v38 = vsel %vm869_vm1, %v2455_v37, 0.0 }
0x1323   : > { %2457 = vadd.xlane.f32.xlu1 %v2456_v38 }
0x13b0   : > { %v2458_v41 = vpop.xlane.xlu1 %2457 }
0x13b1   : > { %v2459_v42 = vmul.f32 0.03125, %v2458_v41 }
0x13b3   : > { %v2460_v43 = vadd.f32 1e-05, %v2459_v42 }
0x13b5   : > { %5252 = vrsqrt.f32 %v2460_v43 }
0x13bf   : > { %v5253_v46 = vpop.eup %5252 }
0x13c0   : > { %v2462_v47 = vmul.f32 %v5253_v46, %v2454_v36 }
0x13c2   : > { %v2467_v49 = vmul.f32 %v2466_v45, %v2462_v47 }
0x13c4   : > { %v6507_v5 = vadd.f32 %v2471_v48, %v2467_v49 }
0x13c6   : > { %v2482_v50 = vpack.c.bf16 %v6507_v5, %v6507_v5 }
0x13c8   : > { %4872 = vmatmul.mubr.msk.bf16.vlgmr.msra.gmra.mrb[56].mxu1 %vm869_vm1, %v2482_v50 }
0x13c9   : > { %4877 = vmatprep.mubr.msk.bf16.mxu1 %vm5684_vm0, %v5683_v0 }
0x149b   : > { %v2540_v60 = vpop.f32.mrb[56].mxu1 }
0x149c   : > { %v2541_v52 = vadd.f32 %v4466_v58, %v2540_v60  ;;  %v4873_v53 = vpop.f32.mrb[57].mxu1 }
0x149d   : > { %v2543_v54 = vpop.f32.mrb[58].mxu1 }
0x149e   : > { %v2553_v61 = vmul.f32 0.35355338, %v2541_v52  ;;  %v2555_v55 = vpack.c.bf16 %v2541_v52, %v2541_v52  ;;  %v4874_v56 = vpop.f32.mrb[59].mxu1 }
0x14a0   : > { %2658 = vrot.lane.b32.xlu1 %v2555_v55, %s6874_s0  ;;  %2557 = vrot.lane.b32.xlu0 %v2555_v55, %s6946_s6  ;;  %v2554_v57 = vpack.c.bf16 %v2553_v61, %v2553_v61  ;;  %s6953_s0 = smov 40  }
0x14a4   : > { %2606 = vrot.lane.b32.xlu0 %v2555_v55, %s6947_s4  ;;  %2656 = vrot.lane.b32.xlu1 %v2554_v57, %s6948_s8 }
0x14a8   : > { %2850 = vrot.lane.b32.xlu0 %v2555_v55, %s6943_s16  ;;  %2707 = vrot.lane.b32.xlu1 %v2555_v55, %s6949_s15 }
0x14ac   : > { %2899 = vrot.lane.b32.xlu0 %v2555_v55, %s6950_s9  ;;  %2848 = vrot.lane.b32.xlu1 %v2554_v57, %s6951_s19 }
0x14b0   : > { %2995 = vrot.lane.b32.xlu0 %v2554_v57, %s6952_s20  ;;  %2997 = vrot.lane.b32.xlu1 %v2555_v55, %s6942_s30 }
0x14b4   : > { %3046 = vrot.lane.b32.xlu1 %v2555_v55, %s6953_s0  ;;  %s6955_s0 = sld [smem:[#allocation50_spill]] }
0x1512   : > { %v2558_v62 = vpop.permute.xlu0 %2557  ;;  %v2659_v2 = vpop.permute.xlu1 %2658 }
0x1513   : > { %v2563_v63 = vsel %vm924_vm2, %v2558_v62, 0  ;;  %v2664_v3 = vsel %vm924_vm2, %v2659_v2, 0 }
0x1514   : > { %4876 = vmatpush3.bf16.xpose.msra.mxu1 %v2563_v63 }
0x1515   : > { %4887 = vmatprep.subr.bf16.mxu1 %v5683_v0 }
0x1516   : > { %v2607_v1 = vpop.permute.xlu0 %2606  ;;  %v2657_v6 = vpop.permute.xlu1 %2656 }
0x1517   : > { %v2612_v4 = vsel %vm977_vm3, %v2607_v1, 0 }
0x1518   : > { %4882 = vmatpush3.bf16.msra.mxu0 %v2612_v4 }
0x1519   : > { %4893 = vmatprep.subr.bf16.mxu0 %v5683_v0 }
0x151a   : > { %v2708_v7 = vpop.permute.xlu1 %2707  ;;  %v2851_v24 = vpop.permute.xlu0 %2850 }
0x151b   : > { %4878 = vmatmul.mubr.msk.bf16.vlgmr.msra.gmra.mrb[60].mxu1 %vm924_vm2, %v2554_v57  ;;  %v2713_v13 = vsel %vm977_vm3, %v2708_v7, 0  ;;  %v2856_v36 = vsel %vm924_vm2, %v2851_v24, 0  ;;  %v4486_v24 = vld [vmem:[#allocation7 + $0x1] ss:$0 sm:$0xff] }
0x151c   : > { %4888 = vmatpush3.bf16.xpose.msra.mxu1 %v2664_v3  ;;  %4889 = vmatprep.mubr.msk.bf16.mxu1 %vm5684_vm0, %v5683_v0 }
0x151d   : > { %4899 = vmatprep.subr.bf16.mxu1 %v5683_v0 }
0x151e   : > { %v2900_v25 = vpop.permute.xlu0 %2899  ;;  %v2849_v38 = vpop.permute.xlu1 %2848 }
0x151f   : > { %v2905_v30 = vsel %vm977_vm3, %v2900_v25, 0 }
0x1522   : > { %v2998_v58 = vpop.permute.xlu1 %2997  ;;  %v2996_v56 = vpop.permute.xlu0 %2995 }
0x1523   : > { %4890 = vmatmul.mubr.msk.bf16.vlgmr.msra.gmra.mrb[64].mxu1 %vm924_vm2, %v2657_v6  ;;  %v3003_v61 = vsel %vm924_vm2, %v2998_v58, 0 }
0x1524   : > { %4901 = vmatprep.mubr.msk.bf16.mxu1 %vm5684_vm0, %v5683_v0  ;;  %4900 = vmatpush3.bf16.msra.mxu1 %v2760_v23 }
0x1525   : > { %4911 = vmatprep.subr.bf16.mxu1 %v5683_v0 }
0x1526   : > { %v3047_v57 = vpop.permute.xlu1 %3046 }
0x1527   : > { %v3052_v2 = vsel %vm977_vm3, %v3047_v57, 0 }
0x15ee   : > { %v2599_v9 = vpop.f32.mrb[60].mxu1 }
0x15ef   : > { %v2605_v10 = vpack.c.bf16 %v2599_v9, %v2599_v9  ;;  %v4879_v11 = vpop.f32.mrb[61].mxu1 }
0x15f0   : > { %v2602_v12 = vpop.f32.mrb[62].mxu1 }
0x15f1   : > { %v4880_v14 = vpop.f32.mrb[63].mxu1  ;;  %4884 = vmatmul.mubr.msk.bf16.vlgmr.msra.gmra.mrb[60].mxu0 %vm924_vm2, %v2605_v10  ;;  %v4473_v12 = vld [vmem:[%s6937_s24 + $0x1c] sm:$0xf] }
0x15f2   : > { %4894 = vmatpush3.bf16.msra.mxu0 %v2713_v13  ;;  %4895 = vmatprep.mubr.msk.bf16.mxu0 %vm5684_vm0, %v5683_v0  ;;  %v3099_v13 = vsel %vm977_vm3, %v4473_v12, 0 }
0x15f3   : > { %4905 = vmatprep.subr.bf16.mxu0 %v5683_v0 }
0x15f6   : > { %v2700_v16 = vpop.f32.mrb[64].mxu1 }
0x15f7   : > { %v2706_v17 = vpack.c.bf16 %v2700_v16, %v2700_v16  ;;  %v4891_v18 = vpop.f32.mrb[65].mxu1 }
0x15f8   : > { %v2703_v20 = vpop.f32.mrb[66].mxu1 }
0x15f9   : > { %v4892_v21 = vpop.f32.mrb[67].mxu1  ;;  %4896 = vmatmul.mubr.msk.bf16.vlgmr.msra.gmra.mrb[64].mxu0 %vm924_vm2, %v2706_v17 }
0x15fa   : > { %4906 = vmatpush3.bf16.msra.mxu0 %v2806_v19  ;;  %4907 = vmatprep.mubr.msk.bf16.mxu0 %vm5684_vm0, %v5683_v0 }
0x15fb   : > { %4917 = vmatprep.subr.bf16.mxu0 %v5683_v0 }
0x16c4   : > { %v2648_v26 = vpop.f32.mrb[60].mxu0 }
0x16c5   : > { %v2654_v27 = vpack.c.bf16 %v2648_v26, %v2648_v26  ;;  %v4885_v28 = vpop.f32.mrb[61].mxu0 }
0x16c6   : > { %v2651_v29 = vpop.f32.mrb[62].mxu0 }
0x16c7   : > { %v4886_v31 = vpop.f32.mrb[63].mxu0  ;;  %4908 = vmatmul.mubr.msk.bf16.vlgmr.msra.gmra.mrb[68].mxu0 %vm924_vm2, %v2654_v27 }
0x16c8   : > { %4918 = vmatpush3.bf16.msra.mxu0 %v2905_v30  ;;  %4919 = vmatprep.mubr.msk.bf16.mxu0 %vm5684_vm0, %v5683_v0 }
0x16c9   : > { %4929 = vmatprep.subr.bf16.mxu0 %v5683_v0 }
0x16cc   : > { %v2749_v32 = vpop.f32.mrb[64].mxu0 }
0x16cd   : > { %v2755_v33 = vpack.c.bf16 %v2749_v32, %v2749_v32  ;;  %v4897_v34 = vpop.f32.mrb[65].mxu0 }
0x16ce   : > { %v2752_v35 = vpop.f32.mrb[66].mxu0 }
0x16cf   : > { %v4898_v37 = vpop.f32.mrb[67].mxu0  ;;  %4902 = vmatmul.mubr.msk.bf16.vlgmr.msra.gmra.mrb[68].mxu1 %vm924_vm2, %v2755_v33  ;;  %v5236_v33 = vld [vmem:[%s6938_s11 + $0x10] sm:$0xff]  }
0x16d0   : > { %4912 = vmatpush3.bf16.xpose.msra.mxu1 %v2856_v36  ;;  %4913 = vmatprep.mubr.msk.bf16.mxu1 %vm5684_vm0, %v5683_v0 }
0x16d1   : > { %4923 = vmatprep.subr.bf16.mxu1 %v5683_v0 }
0x16d7   : > { %4914 = vmatmul.mubr.msk.bf16.vlgmr.msra.gmra.mrb[72].mxu1 %vm924_vm2, %v2849_v38 }
0x16d8   : > { %4925 = vmatprep.mubr.msk.bf16.mxu1 %vm5684_vm0, %v5683_v0  ;;  %4924 = vmatpush3.bf16.msra.mxu1 %v2952_v40  ;;  %v5239_v40 = vld [vmem:[%s6939_s12 + $0x18] sm:$0xff]  }
0x16d9   : > { %4935 = vmatprep.subr.bf16.mxu1 %v5683_v0 }
0x179a   : > { %v2842_v41 = vpop.f32.mrb[68].mxu0 }
0x179b   : > { %v4909_v42 = vpop.f32.mrb[69].mxu0 }
0x179c   : > { %v2845_v43 = vpop.f32.mrb[70].mxu0 }
0x179d   : > { %v4910_v45 = vpop.f32.mrb[71].mxu0  ;;  %v6626_v43 = vld [vmem:[%s6940_s7 + $0x4] sm:$0x7] }
0x179e   : > { %v6631_v45 = vld [vmem:[%s6941_s18 + $0x4] sm:$0x7] }
0x17a2   : > { %v2796_v46 = vpop.f32.mrb[68].mxu1 }
0x17a3   : > { %v2843_v47 = vadd.f32 %v2842_v41, %v2796_v46  ;;  %v4903_v48 = vpop.f32.mrb[69].mxu1  ;;  %v3166_v46 = vrot.slane %v6626_v43, %v6351_v59 }
0x17a4   : > { %v2799_v49 = vpop.f32.mrb[70].mxu1 }
0x17a5   : > { %v4904_v50 = vpop.f32.mrb[71].mxu1  ;;  %v3171_v49 = vrot.slane %v6631_v45, %v6351_v59 }
0x17aa   : > { %v2892_v60 = vpop.f32.mrb[72].mxu1 }
0x17ab   : > { %v2898_v52 = vpack.c.bf16 %v2892_v60, %v2892_v60  ;;  %v4915_v53 = vpop.f32.mrb[73].mxu1 }
0x17ac   : > { %v2895_v54 = vpop.f32.mrb[74].mxu1 }
0x17ad   : > { %v4916_v55 = vpop.f32.mrb[75].mxu1  ;;  %4920 = vmatmul.mubr.msk.bf16.vlgmr.msra.gmra.mrb[72].mxu0 %vm924_vm2, %v2898_v52  ;;  %v4499_v52 = vld [vmem:[#allocation10 + $0x1] ss:$0 sm:$0xff] }
0x17ae   : > { %4930 = vmatpush3.bf16.xpose.msra.mxu0 %v3003_v61  ;;  %4931 = vmatprep.mubr.msk.bf16.mxu0 %vm5684_vm0, %v5683_v0 }
0x17af   : > { %4941 = vmatprep.subr.bf16.mxu0 %v5683_v0 }
0x17b5   : > { %4932 = vmatmul.mubr.msk.bf16.vlgmr.msra.gmra.mrb[76].mxu0 %vm924_vm2, %v2996_v56 }
0x17b6   : > { %4943 = vmatprep.mubr.msk.bf16.mxu0 %vm5684_vm0, %v5683_v0  ;;  %4942 = vmatpush3.bf16.msra.mxu0 %v3099_v13 }
0x17b7   : > { %4955 = vmatprep.subr.bf16.mxu0 %v5683_v0 }
0x1880   : > { %v2941_v62 = vpop.f32.mrb[72].mxu0 }
0x1881   : > { %v2947_v63 = vpack.c.bf16 %v2941_v62, %v2941_v62  ;;  %v4921_v1 = vpop.f32.mrb[73].mxu0 }
0x1882   : > { %v2944_v4 = vpop.f32.mrb[74].mxu0 }
0x1883   : > { %v4922_v3 = vpop.f32.mrb[75].mxu0  ;;  %4926 = vmatmul.mubr.msk.bf16.vlgmr.msra.gmra.mrb[76].mxu1 %vm924_vm2, %v2947_v63  ;;  %v4491_v4 = vld [vmem:[#allocation8 + $0x1] ss:$0 sm:$0xff] }
0x1884   : > { %4936 = vmatpush3.bf16.msra.mxu1 %v3052_v2  ;;  %4937 = vmatprep.mubr.msk.bf16.mxu1 %vm5684_vm0, %v5683_v0 }
0x1885   : > { %4947 = vmatprep.subr.bf16.mxu1 %v5683_v0 }
0x1888   : > { %v3039_v6 = vpop.f32.mrb[76].mxu0 }
0x1889   : > { %v3045_v7 = vpack.c.bf16 %v3039_v6, %v3039_v6  ;;  %v4933_v9 = vpop.f32.mrb[77].mxu0 }
0x188a   : > { %v3042_v10 = vpop.f32.mrb[78].mxu0 }
0x188b   : > { %v4934_v11 = vpop.f32.mrb[79].mxu0  ;;  %4938 = vmatmul.mubr.msk.bf16.vlgmr.msra.gmra.mrb[80].mxu1 %vm924_vm2, %v3045_v7 }
0x188c   : > { %4951 = vmatprep.mubr.msk.bf16.mxu1 %vm5684_vm0, %v5683_v0  ;;  %4948 = vmatpush3.bf16.msra.mxu1 %v5238_v39 }
0x188d   : > { %4949 = vmatprep.subr.bf16.mxu1 %v5683_v0 }
0x1890   : > { %4950 = vmatpush3.bf16.msra.mxu1 %v5239_v40 }
0x1891   : > { %4963 = vmatprep.subr.bf16.mxu1 %v5683_v0 }
0x1956   : > { %v2988_v14 = vpop.f32.mrb[76].mxu1 }
0x1957   : > { %v2994_v15 = vadd.f32 %v2988_v14, %v2843_v47  ;;  %v4927_v16 = vpop.f32.mrb[77].mxu1 }
0x1958   : > { %v2991_v17 = vpop.f32.mrb[78].mxu1 }
0x1959   : > { %v4928_v18 = vpop.f32.mrb[79].mxu1 }
0x195e   : > { %v3088_v19 = vpop.f32.mrb[80].mxu1 }
0x195f   : > { %v3094_v20 = vpack.c.bf16 %v3088_v19, %v3088_v19  ;;  %v4939_v21 = vpop.f32.mrb[81].mxu1 }
0x1960   : > { %v3091_v22 = vpop.f32.mrb[82].mxu1  ;;  %v4504_v21 = vld [vmem:[%s6944_s14 + $0x14] sm:$0xf] }
0x1961   : > { %v4940_v23 = vpop.f32.mrb[83].mxu1  ;;  %4944 = vmatmul.mubr.msk.bf16.vlgmr.msra.gmra.mrb[80].mxu0 %vm924_vm2, %v3094_v20  ;;  %v3519_v22 = vsel %vm977_vm3, %v4504_v21, 0 }
0x1962   : > { %4959 = vmatprep.mubr.msk.bf16.mxu0 %vm5684_vm0, %v5683_v0  ;;  %4956 = vmatpush3.bf16.msra.mxu0 %v5236_v33  ;;  %v4503_v23 = vld [vmem:[%s6944_s14 + $0x10] sm:$0xf] }
0x1963   : > { %4957 = vmatprep.subr.bf16.mxu0 %v5683_v0 }
0x1a34   : > { %v3135_v25 = vpop.f32.mrb[80].mxu0 }
0x1a35   : > { %v3141_v26 = vadd.f32 %v3135_v25, %v2994_v15  ;;  %v4945_v27 = vpop.f32.mrb[81].mxu0 }
0x1a36   : > { %v3138_v28 = vpop.f32.mrb[82].mxu0  ;;  %v3565_v27 = vsel %vm977_vm3, %v4503_v23, 0 }
0x1a37   : > { %v3148_v29 = vadd.f32 %v4486_v24, %v3141_v26  ;;  %v4946_v30 = vpop.f32.mrb[83].mxu0 }
0x1a39   : > { %v3149_v31 = vadd.f32 %v3148_v29, %v6507_v5  ;;  %v5237_v5 = vld [vmem:[%s6938_s11 + $0x18] sm:$0xff]  }
0x1a3a   : > { %4958 = vmatpush3.bf16.msra.mxu0 %v5237_v5 }
0x1a3b   : > { %v3150_v32 = vsel %vm869_vm1, %v3149_v31, 0.0  ;;  %4969 = vmatprep.subr.bf16.mxu0 %v5683_v0 }
0x1a3c   : > { %3151 = vadd.xlane.f32.xlu0 %v3150_v32 }
0x1a3d   : > { %4960 = vmatmul.mubr.msk.bf16.vlgmr.msra.gmra.mrb[84].mxu0 %vm869_vm1, %v6333_v51 }
0x1a3e   : > { %4971 = vmatprep.mubr.msk.bf16.mxu0 %vm5684_vm0, %v5683_v0 }
0x1ac9   : > { %v3152_v34 = vpop.xlane.xlu0 %3151 }
0x1aca   : > { %v3153_v35 = vmul.f32 0.03125, %v3152_v34 }
0x1acc   : > { %v3154_v36 = vsub.f32 %v3149_v31, %v3153_v35 }
0x1ace   : > { %v3155_v37 = vmul.f32 %v3154_v36, %v3154_v36 }
0x1ad0   : > { %v3156_v38 = vsel %vm869_vm1, %v3155_v37, 0.0 }
0x1ad1   : > { %3157 = vadd.xlane.f32.xlu1 %v3156_v38 }
0x1b10   : > { %v3301_v53 = vpop.f32.mrb[84].mxu0 }
0x1b11   : > { %v3302_v54 = vadd.f32 %v4499_v52, %v3301_v53  ;;  %v4961_v61 = vpop.f32.mrb[85].mxu0 }
0x1b12   : > { %v3304_v55 = vpop.f32.mrb[86].mxu0 }
0x1b13   : > { %v3316_v56 = vpack.c.bf16 %v3302_v54, %v3302_v54  ;;  %v4962_v57 = vpop.f32.mrb[87].mxu0 }
0x1b15   : > { %3417 = vrot.lane.b32.xlu0 %v3316_v56, %s6948_s8  ;;  %v3321_v59 = vsel %vm924_vm2, %v3316_v56, 0 }
0x1b19   : > { %3365 = vrot.lane.b32.xlu0 %v3316_v56, %s6946_s6 }
0x1b1d   : > { %3609 = vrot.lane.b32.xlu0 %v3316_v56, %s6951_s19 }
0x1b21   : > { %3658 = vrot.lane.b32.xlu0 %v3316_v56, %s6943_s16  ;;  %s836_s16 = scalar_lea.vmem [#allocation20], %s6177_s13 }
0x1b22   : > { %s4204_s6 = sshll.u32 %s836_s16, 4  ;;  %s6771_s6 = int_to_ptr.vmem [resolvable:$true] %s4204_s6 }
0x1b5e   : > { %v3158_v41 = vpop.xlane.xlu1 %3157 }
0x1b5f   : > { %v3159_v42 = vmul.f32 0.03125, %v3158_v41 }
0x1b61   : > { %v3160_v51 = vadd.f32 1e-05, %v3159_v42 }
0x1b63   : > { %5254 = vrsqrt.f32 %v3160_v51 }
0x1b6d   : > { %v5255_v47 = vpop.eup %5254 }
0x1b6e   : > { %v3162_v48 = vmul.f32 %v5255_v47, %v3154_v36 }
0x1b70   : > { %v3167_v50 = vmul.f32 %v3166_v46, %v3162_v48 }
0x1b72   : > { %v6637_v58 = vadd.f32 %v3171_v49, %v3167_v50  ;;  %v4505_v50 = vld [vmem:[%s6944_s14 + $0x18] sm:$0xf] }
0x1b74   : > { %v3178_v60 = vpack.c.bf16 %v6637_v58, %v6637_v58 }
0x1b76   : > { %4952 = vmatmul.mubr.msk.bf16.vlgmr.msra.gmra.mrb[84].mxu1 %vm869_vm1, %v3178_v60  ;;  %v3711_v60 = vsel %vm977_vm3, %v4505_v50, 0 }
0x1b77   : > { %4965 = vmatprep.mubr.msk.bf16.mxu1 %vm5684_vm0, %v5683_v0  ;;  %4964 = vmatpush3.bf16.xpose.msra.mxu1 %v3321_v59 }
0x1b78   : > { %4975 = vmatprep.subr.bf16.mxu1 %v5683_v0 }
0x1b87   : > { %v3418_v62 = vpop.permute.xlu0 %3417 }
0x1b88   : > { %v3423_v12 = vsel %vm924_vm2, %v3418_v62, 0 }
0x1b8b   : > { %v3366_v63 = vpop.permute.xlu0 %3365 }
0x1b8c   : > { %v3371_v1 = vsel %vm977_vm3, %v3366_v63, 0 }
0x1b8d   : > { %4970 = vmatpush3.bf16.msra.mxu0 %v3371_v1 }
0x1b8e   : > { %4981 = vmatprep.subr.bf16.mxu0 %v5683_v0 }
0x1b8f   : > { %v3610_v30 = vpop.permute.xlu0 %3609 }
0x1b90   : > { %v3615_v41 = vsel %vm924_vm2, %v3610_v30, 0  ;;  %v4519_v30 = vld [vmem:[#allocation11 + $0x1] ss:$0 sm:$0xff] }
0x1b93   : > { %v3659_v31 = vpop.permute.xlu0 %3658 }
0x1b94   : > { %v3664_v36 = vsel %vm977_vm3, %v3659_v31, 0 }
0x1c49   : > { %v3236_v2 = vpop.f32.mrb[84].mxu1 }
0x1c4a   : > { %v3237_v3 = vadd.f32 %v4491_v4, %v3236_v2  ;;  %v4953_v6 = vpop.f32.mrb[85].mxu1 }
0x1c4b   : > { %v3239_v7 = vpop.f32.mrb[86].mxu1 }
0x1c4c   : > { %v3314_v9 = vmul.f32 0.35355338, %v3237_v3  ;;  %v4954_v10 = vpop.f32.mrb[87].mxu1 }
0x1c4e   : > { %v3315_v11 = vpack.c.bf16 %v3314_v9, %v3314_v9 }
0x1c50   : > { %3415 = vrot.lane.b32.xlu1 %v3315_v11, %s6948_s8  ;;  %3754 = vrot.lane.b32.xlu0 %v3315_v11, %s6952_s20  ;;  %s5576_s8 = scalar_lea.vmem %s6771_s6, 128 }
0x1c51   : > { %4966 = vmatmul.mubr.msk.bf16.vlgmr.msra.gmra.mrb[88].mxu1 %vm924_vm2, %v3315_v11  ;;  %p5577_p5 = scmp.ne.s32.totalorder %s6771_s6, %s5576_s8 }
0x1c52   : > { %4976 = vmatpush3.bf16.xpose.msra.mxu1 %v3423_v12  ;;  %4977 = vmatprep.mubr.msk.bf16.mxu1 %vm5684_vm0, %v5683_v0 }
0x1c53   : > { %4987 = vmatprep.subr.bf16.mxu1 %v5683_v0  ;;  %p5578_p3 = pnand %p5577_p5, %p6956_p9 }
0x1c54   : > { %3466 = vrot.lane.b32.xlu1 %v3316_v56, %s6954_s22  ;;  %s4191_s22 = scalar_lea.sflag [#allocation4], %s6174_s10 }
0x1c55   : > { %p5579_p7 = pneg %p5578_p3 }
0x1c58   : > { %3607 = vrot.lane.b32.xlu1 %v3315_v11, %s6951_s19 }
0x1c5c   : > { %3756 = vrot.lane.b32.xlu1 %v3316_v56, %s6952_s20 }
0x1c60   : > { %3805 = vrot.lane.b32.xlu1 %v3316_v56, %s6942_s30  ;;  %s4543_s30 = sshll.u32 %s5828_s29, 7  ;;  %s5696_s29 = smov [#allocation20]  }
0x1c61   : > { %s6769_s4 = scalar_lea.hbm %s6955_s0, %s4543_s30  ;;  %s5580_s13 = sshll.u32 %s5696_s29, 4  ;;  %s5581_s13 = int_to_ptr.vmem [resolvable:$false] %s5580_s13 }
0x1c62   : > { %s5582_s19 = scalar_lea.vmem %s5581_s13, 256  ;;  %p5583_p11 = scmp.lt.s32.totalorder %s6771_s6, %s5581_s13 }
0x1c63   : > { %p5584_p8 = scmp.lt.s32.totalorder %s5582_s19, %s5576_s8 }
0x1c65   : > { %p5585_p4 = por %p5584_p8, %p5583_p11 }
0x1c67   : > { %p5586_p12 = pnand %p5585_p4, %p5579_p7 }
0x1cc2   : > { %v3416_v13 = vpop.permute.xlu1 %3415  ;;  %v3755_v2 = vpop.permute.xlu0 %3754 }
0x1cc3   : > { %4978 = vmatmul.mubr.msk.bf16.vlgmr.msra.gmra.mrb[92].mxu1 %vm924_vm2, %v3416_v13 }
0x1cc4   : > { %4989 = vmatprep.mubr.msk.bf16.mxu1 %vm5684_vm0, %v5683_v0  ;;  %4988 = vmatpush3.bf16.msra.mxu1 %v3519_v22 }
0x1cc5   : > { %4999 = vmatprep.subr.bf16.mxu1 %v5683_v0 }
0x1cc6   : > { %v3467_v14 = vpop.permute.xlu1 %3466 }
0x1cc7   : > { %v3472_v19 = vsel %vm977_vm3, %v3467_v14, 0 }
0x1cca   : > { %v3608_v51 = vpop.permute.xlu1 %3607 }
0x1cce   : > { %v3757_v56 = vpop.permute.xlu1 %3756 }
0x1ccf   : > { %v3762_v1 = vsel %vm924_vm2, %v3757_v56, 0 }
0x1cd2   : > { %v3806_v3 = vpop.permute.xlu1 %3805 }
0x1cd3   : > { %v3811_v11 = vsel %vm977_vm3, %v3806_v3, 0 }
0x1d24   : > { %v3357_v15 = vpop.f32.mrb[88].mxu1 }
0x1d25   : > { %v3363_v16 = vpack.c.bf16 %v3357_v15, %v3357_v15  ;;  %v4967_v17 = vpop.f32.mrb[89].mxu1 }
0x1d26   : > { %v3360_v18 = vpop.f32.mrb[90].mxu1 }
0x1d27   : > { %v4968_v20 = vpop.f32.mrb[91].mxu1  ;;  %4972 = vmatmul.mubr.msk.bf16.vlgmr.msra.gmra.mrb[88].mxu0 %vm924_vm2, %v3363_v16  ;;  %v4506_v18 = vld [vmem:[%s6944_s14 + $0x1c] sm:$0xf] }
0x1d28   : > { %4982 = vmatpush3.bf16.msra.mxu0 %v3472_v19  ;;  %4983 = vmatprep.mubr.msk.bf16.mxu0 %vm5684_vm0, %v5683_v0  ;;  %v3858_v19 = vsel %vm977_vm3, %v4506_v18, 0 }
0x1d29   : > { %4993 = vmatprep.subr.bf16.mxu0 %v5683_v0 }
0x1d96   : > { %v3459_v24 = vpop.f32.mrb[92].mxu1 }
0x1d97   : > { %v3465_v25 = vpack.c.bf16 %v3459_v24, %v3459_v24  ;;  %v4979_v26 = vpop.f32.mrb[93].mxu1 }
0x1d98   : > { %v3462_v28 = vpop.f32.mrb[94].mxu1 }
0x1d99   : > { %v4980_v29 = vpop.f32.mrb[95].mxu1  ;;  %4984 = vmatmul.mubr.msk.bf16.vlgmr.msra.gmra.mrb[92].mxu0 %vm924_vm2, %v3465_v25 }
0x1d9a   : > { %4994 = vmatpush3.bf16.msra.mxu0 %v3565_v27  ;;  %4995 = vmatprep.mubr.msk.bf16.mxu0 %vm5684_vm0, %v5683_v0 }
0x1d9b   : > { %5005 = vmatprep.subr.bf16.mxu0 %v5683_v0 }
0x1dfa   : > { %v3407_v32 = vpop.f32.mrb[88].mxu0 }
0x1dfb   : > { %v3413_v33 = vpack.c.bf16 %v3407_v32, %v3407_v32  ;;  %v4973_v34 = vpop.f32.mrb[89].mxu0 }
0x1dfc   : > { %v3410_v35 = vpop.f32.mrb[90].mxu0 }
0x1dfd   : > { %v4974_v37 = vpop.f32.mrb[91].mxu0  ;;  %4996 = vmatmul.mubr.msk.bf16.vlgmr.msra.gmra.mrb[96].mxu0 %vm924_vm2, %v3413_v33 }
0x1dfe   : > { %5006 = vmatpush3.bf16.msra.mxu0 %v3664_v36  ;;  %5007 = vmatprep.mubr.msk.bf16.mxu0 %vm5684_vm0, %v5683_v0 }
0x1dff   : > { %5017 = vmatprep.subr.bf16.mxu0 %v5683_v0 }
0x1e6c   : > { %v3508_v38 = vpop.f32.mrb[92].mxu0 }
0x1e6d   : > { %v3514_v5 = vpack.c.bf16 %v3508_v38, %v3508_v38  ;;  %v4985_v39 = vpop.f32.mrb[93].mxu0 }
0x1e6e   : > { %v3511_v40 = vpop.f32.mrb[94].mxu0 }
0x1e6f   : > { %v4986_v42 = vpop.f32.mrb[95].mxu0  ;;  %4990 = vmatmul.mubr.msk.bf16.vlgmr.msra.gmra.mrb[96].mxu1 %vm924_vm2, %v3514_v5 }
0x1e70   : > { %5000 = vmatpush3.bf16.xpose.msra.mxu1 %v3615_v41  ;;  %5001 = vmatprep.mubr.msk.bf16.mxu1 %vm5684_vm0, %v5683_v0 }
0x1e71   : > { %5011 = vmatprep.subr.bf16.mxu1 %v5683_v0 }
0x1e77   : > { %5002 = vmatmul.mubr.msk.bf16.vlgmr.msra.gmra.mrb[100].mxu1 %vm924_vm2, %v3608_v51  ;;  %v5240_v51 = vld [vmem:[#allocation13 + $0x10] sm:$0xff]  }
0x1e78   : > { %5013 = vmatprep.mubr.msk.bf16.mxu1 %vm5684_vm0, %v5683_v0  ;;  %5012 = vmatpush3.bf16.msra.mxu1 %v3711_v60  ;;  %v3925_v60 = vrot.slane %v6626_v43, %v6470_v8 }
0x1e79   : > { %5023 = vmatprep.subr.bf16.mxu1 %v5683_v0 }
0x1ed0   : > { %v3601_v46 = vpop.f32.mrb[96].mxu0 }
0x1ed1   : > { %v4997_v47 = vpop.f32.mrb[97].mxu0 }
0x1ed2   : > { %v3604_v48 = vpop.f32.mrb[98].mxu0  ;;  %v5243_v47 = vld [vmem:[%s6945_s1 + $0x28] sm:$0xff]  }
0x1ed3   : > { %v4998_v49 = vpop.f32.mrb[99].mxu0 }
0x1f42   : > { %v3555_v52 = vpop.f32.mrb[96].mxu1 }
0x1f43   : > { %v3602_v53 = vadd.f32 %v3601_v46, %v3555_v52  ;;  %v4991_v54 = vpop.f32.mrb[97].mxu1  ;;  %v5241_v46 = vld [vmem:[#allocation13 + $0x18] sm:$0xff]  }
0x1f44   : > { %v3558_v61 = vpop.f32.mrb[98].mxu1  ;;  %v3930_v54 = vrot.slane %v6631_v45, %v6470_v8  ;;  %v4520_v8 = vld [vmem:[#allocation14 + $0x1] ss:$0 sm:$0xff] }
0x1f45   : > { %v4992_v55 = vpop.f32.mrb[99].mxu1 }
0x1f4a   : > { %v3651_v57 = vpop.f32.mrb[100].mxu1 }
0x1f4b   : > { %v3657_v59 = vpack.c.bf16 %v3651_v57, %v3651_v57  ;;  %v5003_v62 = vpop.f32.mrb[101].mxu1  ;;  %v5244_v57 = vld [vmem:[%s6945_s1 + $0x30] sm:$0xff]  }
0x1f4c   : > { %v3654_v63 = vpop.f32.mrb[102].mxu1 }
0x1f4d   : > { %v5004_v4 = vpop.f32.mrb[103].mxu1  ;;  %5008 = vmatmul.mubr.msk.bf16.vlgmr.msra.gmra.mrb[100].mxu0 %vm924_vm2, %v3657_v59  ;;  %v5245_v59 = vld [vmem:[%s6945_s1 + $0x38] sm:$0xff]  }
0x1f4e   : > { %5018 = vmatpush3.bf16.xpose.msra.mxu0 %v3762_v1  ;;  %5019 = vmatprep.mubr.msk.bf16.mxu0 %vm5684_vm0, %v5683_v0 }
0x1f4f   : > { %5029 = vmatprep.subr.bf16.mxu0 %v5683_v0 }
0x1f55   : > { %5020 = vmatmul.mubr.msk.bf16.vlgmr.msra.gmra.mrb[104].mxu0 %vm924_vm2, %v3755_v2 }
0x1f56   : > { %5031 = vmatprep.mubr.msk.bf16.mxu0 %vm5684_vm0, %v5683_v0  ;;  %5030 = vmatpush3.bf16.msra.mxu0 %v3858_v19 }
0x1f57   : > { %5043 = vmatprep.subr.bf16.mxu0 %v5683_v0 }
0x2020   : > { %v3700_v6 = vpop.f32.mrb[100].mxu0 }
0x2021   : > { %v3706_v7 = vpack.c.bf16 %v3700_v6, %v3700_v6  ;;  %v5009_v9 = vpop.f32.mrb[101].mxu0 }
0x2022   : > { %v3703_v10 = vpop.f32.mrb[102].mxu0 }
0x2023   : > { %v5010_v12 = vpop.f32.mrb[103].mxu0  ;;  %5014 = vmatmul.mubr.msk.bf16.vlgmr.msra.gmra.mrb[104].mxu1 %vm924_vm2, %v3706_v7  ;;  %v4532_v7 = vld [vmem:[#allocation16 + $0x1] ss:$0 sm:$0xff] }
0x2024   : > { %5024 = vmatpush3.bf16.msra.mxu1 %v3811_v11  ;;  %5025 = vmatprep.mubr.msk.bf16.mxu1 %vm5684_vm0, %v5683_v0 }
0x2025   : > { %5035 = vmatprep.subr.bf16.mxu1 %v5683_v0 }
0x2028   : > { %v3798_v13 = vpop.f32.mrb[104].mxu0 }
0x2029   : > { %v3804_v14 = vpack.c.bf16 %v3798_v13, %v3798_v13  ;;  %v5021_v15 = vpop.f32.mrb[105].mxu0 }
0x202a   : > { %v3801_v16 = vpop.f32.mrb[106].mxu0 }
0x202b   : > { %v5022_v17 = vpop.f32.mrb[107].mxu0  ;;  %5026 = vmatmul.mubr.msk.bf16.vlgmr.msra.gmra.mrb[108].mxu1 %vm924_vm2, %v3804_v14 }
0x202c   : > { %5039 = vmatprep.mubr.msk.bf16.mxu1 %vm5684_vm0, %v5683_v0  ;;  %5036 = vmatpush3.bf16.msra.mxu1 %v5240_v51 }
0x202d   : > { %5037 = vmatprep.subr.bf16.mxu1 %v5683_v0 }
0x2030   : > { %5038 = vmatpush3.bf16.msra.mxu1 %v5241_v46 }
0x2031   : > { %5055 = vmatprep.subr.bf16.mxu1 %v5683_v0 }
0x20f6   : > { %v3747_v20 = vpop.f32.mrb[104].mxu1 }
0x20f7   : > { %v3753_v21 = vadd.f32 %v3747_v20, %v3602_v53  ;;  %v5015_v22 = vpop.f32.mrb[105].mxu1 }
0x20f8   : > { %v3750_v23 = vpop.f32.mrb[106].mxu1  ;;  %v5247_v22 = vld [vmem:[#allocation17 + $0x8] sm:$0xff]  }
0x20f9   : > { %v5016_v24 = vpop.f32.mrb[107].mxu1 }
0x20fe   : > { %v3847_v25 = vpop.f32.mrb[108].mxu1 }
0x20ff   : > { %v3853_v26 = vpack.c.bf16 %v3847_v25, %v3847_v25  ;;  %v5027_v27 = vpop.f32.mrb[109].mxu1 }
0x2100   : > { %v3850_v28 = vpop.f32.mrb[110].mxu1 }
0x2101   : > { %v5028_v29 = vpop.f32.mrb[111].mxu1  ;;  %5032 = vmatmul.mubr.msk.bf16.vlgmr.msra.gmra.mrb[108].mxu0 %vm924_vm2, %v3853_v26  ;;  %v4104_v26 = vrot.slane %v6626_v43, %v6501_v44 }
0x2102   : > { %5051 = vmatprep.mubr.msk.bf16.mxu0 %vm5684_vm0, %v5683_v0  ;;  %v4109_v29 = vrot.slane %v6631_v45, %v6501_v44 }
0x21d4   : > { %v3894_v31 = vpop.f32.mrb[108].mxu0 }
0x21d5   : > { %v3900_v32 = vadd.f32 %v3894_v31, %v3753_v21  ;;  %v5033_v33 = vpop.f32.mrb[109].mxu0  ;;  %v5246_v21 = vld [vmem:[#allocation17] sm:$0xff]  }
0x21d6   : > { %v3897_v34 = vpop.f32.mrb[110].mxu0  ;;  %v4538_v33 = vld [vmem:[#allocation19] ss:$0 sm:$0xff] }
0x21d7   : > { %v3907_v35 = vadd.f32 %v4519_v30, %v3900_v32  ;;  %v5034_v36 = vpop.f32.mrb[111].mxu0 }
0x21d9   : > { %v3908_v37 = vadd.f32 %v3907_v35, %v6637_v58  ;;  %v5242_v58 = vld [vmem:[%s6945_s1 + $0x20] sm:$0xff]  }
0x21da   : > { %5044 = vmatpush3.bf16.msra.mxu0 %v5242_v58 }
0x21db   : > { %v3909_v38 = vsel %vm869_vm1, %v3908_v37, 0.0  ;;  %5045 = vmatprep.subr.bf16.mxu0 %v5683_v0 }
0x21dc   : > { %3910 = vadd.xlane.f32.xlu0 %v3909_v38 }
0x21de   : > { %5046 = vmatpush3.bf16.msra.mxu0 %v5243_v47 }
0x21df   : > { %5047 = vmatprep.subr.bf16.mxu0 %v5683_v0 }
0x21e2   : > { %5048 = vmatpush3.bf16.msra.mxu0 %v5244_v57 }
0x21e3   : > { %5049 = vmatprep.subr.bf16.mxu0 %v5683_v0 }
0x21e6   : > { %5050 = vmatpush3.bf16.msra.mxu0 %v5245_v59 }
0x2269   : > { %v3911_v5 = vpop.xlane.xlu0 %3910 }
0x226a   : > { %v3912_v39 = vmul.f32 0.03125, %v3911_v5 }
0x226c   : > { %v3913_v40 = vsub.f32 %v3908_v37, %v3912_v39 }
0x226e   : > { %v3914_v41 = vmul.f32 %v3913_v40, %v3913_v40 }
0x2270   : > { %v3915_v42 = vsel %vm869_vm1, %v3914_v41, 0.0 }
0x2271   : > { %3916 = vadd.xlane.f32.xlu1 %v3915_v42 }
0x22fe   : > { %v3917_v48 = vpop.xlane.xlu1 %3916 }
0x22ff   : > { %v3918_v49 = vmul.f32 0.03125, %v3917_v48 }
0x2301   : > { %v3919_v50 = vadd.f32 1e-05, %v3918_v49 }
0x2303   : > { %5256 = vrsqrt.f32 %v3919_v50 }
0x230d   : > { %v5257_v52 = vpop.eup %5256 }
0x230e   : > { %v3921_v53 = vmul.f32 %v5257_v52, %v3913_v40 }
0x2310   : > { %v3926_v61 = vmul.f32 %v3925_v60, %v3921_v53 }
0x2312   : > { %v3931_v55 = vadd.f32 %v3930_v54, %v3926_v61 }
0x2314   : > { %v3937_v56 = vpack.c.bf16 %v3931_v55, %v3931_v55 }
0x2316   : > { %5040 = vmatmul.mubr.msk.bf16.vlgmr.msra.gmra.mrb[112].mxu1 %vm869_vm1, %v3937_v56 }
0x2317   : > { %5059 = vmatprep.mubr.msk.bf16.mxu1 %vm5684_vm0, %v5683_v0  ;;  %5056 = vmatpush3.bf16.msra.mxu1 %v5246_v21 }
0x2318   : > { %5057 = vmatprep.subr.bf16.mxu1 %v5683_v0 }
0x231b   : > { %5058 = vmatpush3.bf16.msra.mxu1 %v5247_v22 }
0x23e9   : > { %v3995_v62 = vpop.f32.mrb[112].mxu1 }
0x23ea   : > { %v3996_v63 = vadd.f32 %v4520_v8, %v3995_v62  ;;  %v5041_v1 = vpop.f32.mrb[113].mxu1 }
0x23eb   : > { %v3998_v4 = vpop.f32.mrb[114].mxu1 }
0x23ec   : > { %v4001_v2 = vmax.f32 %v3996_v63, 0.0  ;;  %v5042_v3 = vpop.f32.mrb[115].mxu1 }
0x23ee   : > { %v4011_v6 = vpack.c.bf16 %v4001_v2, %v4001_v2 }
0x23f0   : > { %5052 = vmatmul.mubr.msk.bf16.vlgmr.msra.gmra.mrb[112].mxu0 %vm2405_vm4, %v4011_v6 }
0x24c3   : > { %v4081_v9 = vpop.f32.mrb[112].mxu0 }
0x24c4   : > { %v4082_v10 = vadd.f32 %v4532_v7, %v4081_v9  ;;  %v5053_v11 = vpop.f32.mrb[113].mxu0 }
0x24c5   : > { %v4084_v12 = vpop.f32.mrb[114].mxu0 }
0x24c6   : > { %v5054_v13 = vpop.f32.mrb[115].mxu0  ;;  %v4087_v14 = vadd.f32 %v4082_v10, %v3931_v55 }
0x24c8   : > { %v4088_v15 = vsel %vm869_vm1, %v4087_v14, 0.0 }
0x24c9   : > { %4089 = vadd.xlane.f32.xlu0 %v4088_v15 }
0x2556   : > { %v4090_v16 = vpop.xlane.xlu0 %4089 }
0x2557   : > { %v4091_v17 = vmul.f32 0.03125, %v4090_v16 }
0x2559   : > { %v4092_v18 = vsub.f32 %v4087_v14, %v4091_v17 }
0x255b   : > { %v4093_v19 = vmul.f32 %v4092_v18, %v4092_v18 }
0x255d   : > { %v4094_v20 = vsel %vm869_vm1, %v4093_v19, 0.0 }
0x255e   : > { %4095 = vadd.xlane.f32.xlu0 %v4094_v20 }
0x25eb   : > { %v4096_v23 = vpop.xlane.xlu0 %4095 }
0x25ec   : > { %v4097_v24 = vmul.f32 0.03125, %v4096_v23 }
0x25ee   : > { %v4098_v25 = vadd.f32 1e-05, %v4097_v24 }
0x25f0   : > { %5258 = vrsqrt.f32 %v4098_v25 }
0x25fa   : > { %v5259_v27 = vpop.eup %5258 }
0x25fb   : > { %v4100_v28 = vmul.f32 %v5259_v27, %v4092_v18 }
0x25fd   : > { %v4105_v30 = vmul.f32 %v4104_v26, %v4100_v28 }
0x25ff   : > { %v4110_v31 = vadd.f32 %v4109_v29, %v4105_v30 }
0x2601   : > { %v4115_v32 = vpack.c.bf16 %v4110_v31, %v4110_v31 }
0x2603   : > { %5060 = vmatmul.mubr.msk.bf16.vlgmr.msra.gmra.mrb[116].mxu1 %vm869_vm1, %v4115_v32 }
0x26d6   : > { %v4172_v0 = vpop.f32.mrb[116].mxu1 }
0x26d7   : > { %v4173_v34 = vadd.f32 %v4538_v33, %v4172_v0  ;;  %v5061_v35 = vpop.f32.mrb[117].mxu1 }
0x26d8   : > { %v4175_v36 = vpop.f32.mrb[118].mxu1 }
0x26d9   : > { %v5062_v37 = vpop.f32.mrb[119].mxu1  ;;  %v4178_v43 = vsel %vm869_vm1, %v4173_v34, -inf }
0x26da   : > { %4179 = vmax.xlane.f32.xlu1 %v4178_v43 }
0x2767   : > { %v4180_v38 = vpop.xlane.xlu1 %4179 }
0x2768   : > { %v4181_v5 = vsub.f32 %v4173_v34, %v4180_v38 }
0x276a   : > { %v4182_v44 = vmul.f32 1.442695, %v4181_v5 }
0x276c   : > { %5260 = vpow2.f32 %v4182_v44 }
0x2776   : > { %v5261_v45 = vpop.eup %5260 }
0x2777   : > { %v4184_v39 = vsel %vm869_vm1, %v5261_v45, 0.0 }
0x2778   : > { %4185 = vadd.xlane.f32.xlu0 %v4184_v39 }
0x2805   : > { %v4186_v40 = vpop.xlane.xlu0 %4185 }
0x2806   : > { %5262 = vrcp.f32 %v4186_v40 }
0x2810   : > { %v5263_v41 = vpop.eup %5262 }
0x2811   : > { %v4188_v42 = vmul.f32 %v5263_v41, %v5261_v45 }
0x2813   : > { %4189 = vst.msk [vmem:[%s836_s16] sm:$0xff] %vm869_vm1, %v4188_v42 }
0x2814   : > { %5589 = shalt.err (!%p5586_p12)
}
0x2815   : > { %s5590_s10 = scalar_lea.hbm %s6769_s4, 128  ;;  %s5594_s30 = scalar_lea.hbm %s6955_s0, 256 }
0x2816   : > { %p5591_p1 = scmp.ne.s32.totalorder %s6769_s4, %s5590_s10  ;;  %p5595_p2 = scmp.lt.u32.totalorder %s6769_s4, %s6955_s0 }
0x2817   : > { %p5596_p6 = scmp.lt.u32.totalorder %s5594_s30, %s5590_s10  ;;  %p5598_p5 = scmp.lt.u32.totalorder %s5590_s10, %s6769_s4 }
0x2818   : > { %p5592_p13 = pnand %p5591_p1, %p6956_p9 }
0x2819   : > { %p5597_p10 = por %p5596_p6, %p5595_p2 }
0x281a   : > { %p5593_p0 = pneg %p5592_p13 }
0x281b   : > { %p5599_p3 = por %p5598_p5, %p5597_p10 }
0x281d   : > { %p5600_p7 = pnand %p5599_p3, %p5593_p0 }
0x281f   : > { %5603 = shalt.err (!%p5600_p7)
}
0x2820   : > { %5103 = dma.vmem_to_hbm [thread:$0]  (%p6956_p9), %s6771_s6, 128, %s6769_s4, %s4191_s22  }
0x2821 PF: > { %s4216_s9 = sand.u32 1, %s5654_s2   ;;  %p6957_p11 = scmp.ne.s32.totalorder %s6918_s3, 0 }
0x2822   : > { %p6958_p8 = scmp.ge.s32.totalorder %s5666_s27, 2  ;;  %s4217_s8 = scalar_lea.sflag [#allocation4], %s4216_s9 }
0x2824   : > { %p5141_p4 = pnand %p6958_p8, %p6957_p11 }
0x2826   : > { %5649 = dma.done.wait (!%p5141_p4), %s4217_s8, 128  }
0x2827   : > { %5651 = vsyncadd (!%p5141_p4), %s4217_s8, 4294967168  ;;  %p41_p12 = scmp.ge.s32.totalorder %s6075_s5, 4   ;;  %s6959_s2 = smov %s5658_s25 }
0x2828   : > { %s6960_s25 = smov %s5662_s26  ;;  %s6961_s26 = smov %s6087_s17 }
0x2829   : > { %s6962_s27 = smov %s6075_s5  ;;  %43 = sbr.rel (!%p41_p12) target bundleno = 34 (0x22), region = 214 }
0x2830   :  { %4222 = vsyncpa [#allocation3], 1 }
0x2831   :  { %4224 = vsyncpa [#allocation3 + $0x1], 1 }
0x2832   :  { %4225 = vsyncpa [#allocation6], 1 }
0x2833   :  { %4227 = vsyncpa [#allocation6 + $0x1], 1 }
0x2834   :  { %4228 = vsyncpa [#allocation9], 1 }
0x2835   :  { %4229 = vsyncpa [#allocation12], 1 }
0x2836   :  { %4230 = vsyncpa [#allocation15], 1 }
0x2837   :  { %4231 = vsyncpa [#allocation18], 1 }
0x2838   :  { %4232 = vsyncpa [#allocation4], 1 }
0x2839   :  { %4234 = vsyncpa [#allocation4 + $0x1], 1 }

</bundles_post_ra>
